<compile_context>
chip_gen: v6e
topology: v6e:2x2x1
jax: 0.10.0
libtpu: 0.0.40
codegen_flags: <defaults>
</compile_context>

<pallas_src>
import functools

import jax
import jax.numpy as jnp
from jax.experimental import pallas as pl
from jax.experimental.pallas import tpu as pltpu


# ---------------------------------------------------------------------------
# Pallas kernel: fused 3x3 / stride-2 conv + bias + ReLU for one NHWC image.
# ---------------------------------------------------------------------------
def _conv3x3_s2_relu_kernel(xe_ref, xo_ref, w_ref, b_ref, o_ref, *,
                            h_out, w_out, c_in, c_out):
    # xe_ref: [1, Hp, w_out+1, c_in]   even input columns (0,2,...) of padded image
    # xo_ref: [1, Hp, w_out+1, c_in]   odd  input columns (1,3,...)
    # w_ref : [9, c_in, c_out]         bf16 weights (tap-major), VMEM resident
    # b_ref : [1, c_out]               f32 bias, VMEM resident
    # o_ref : [1, h_out, w_out, c_out] f32 output tile
    del c_in  # implied by the ref shapes
    bias = b_ref[...]                                   # (1, c_out) f32

    # Hoist the nine tap weights out of the row loop (loaded once from VMEM).
    w_taps = [w_ref[t] for t in range(9)]               # each (c_in, c_out) bf16

    # Unrolled over output rows; every slice below is static and contiguous.
    for oh in range(h_out):
        acc = jnp.zeros((w_out, c_out), dtype=jnp.float32)
        for kh in range(3):
            r = 2 * oh + kh                              # padded input row (static)
            for kw in range(3):
                # Output col ow reads input col 2*ow + kw:
                #   kw=0 -> even plane, offset 0
                #   kw=1 -> odd  plane, offset 0
                #   kw=2 -> even plane, offset 1
                src = xe_ref if (kw % 2 == 0) else xo_ref
                col0 = kw // 2
                patch = src[0, r, pl.ds(col0, w_out), :].astype(jnp.bfloat16)
                acc = acc + jnp.dot(patch, w_taps[kh * 3 + kw],
                                    preferred_element_type=jnp.float32)
        # f32 epilogue: bias + ReLU.  This single ReLU is both the stage
        # activation and Backbone.forward's F.relu (ReLU is idempotent).
        acc = jnp.maximum(acc + bias, 0.0)
        o_ref[0, oh] = acc.astype(o_ref.dtype)


def _conv3x3_s2_relu(x_nhwc, w_bf16, b_f32):
    """x_nhwc: [N, H, W, C_in] f32; w_bf16: [9, C_in, C_out]; b_f32: [1, C_out]."""
    n, h, w, c_in = x_nhwc.shape
    c_out = w_bf16.shape[-1]
    h_out, w_out = h // 2, w // 2            # k=3, stride=2, pad=1, even H/W
    hp = h + 2
    wh = w_out + 1                           # columns per parity plane

    # Spatial zero-padding + even/odd column split (XLA level, ~1x bytes total,
    # no 9x im2col inflation).  Activations stay NHWC.
    x_pad = jnp.pad(x_nhwc, ((0, 0), (1, 1), (1, 1), (0, 0)))
    x_even = x_pad[:, :, 0::2, :]            # [n, hp, wh, c_in]
    x_odd = x_pad[:, :, 1::2, :]             # [n, hp, wh, c_in]

    kernel = functools.partial(_conv3x3_s2_relu_kernel, h_out=h_out,
                               w_out=w_out, c_in=c_in, c_out=c_out)
    out = pl.pallas_call(
        kernel,
        out_shape=jax.ShapeDtypeStruct((n, h_out, w_out, c_out), jnp.float32),
        grid=(n,),
        in_specs=[
            # One whole (small) parity plane per grid step.
            pl.BlockSpec((1, hp, wh, c_in), lambda i: (i, 0, 0, 0)),
            pl.BlockSpec((1, hp, wh, c_in), lambda i: (i, 0, 0, 0)),
            # Constant block index -> weights / bias stay resident in VMEM.
            pl.BlockSpec((9, c_in, c_out), lambda i: (0, 0, 0)),
            pl.BlockSpec((1, c_out), lambda i: (0, 0)),
        ],
        out_specs=pl.BlockSpec((1, h_out, w_out, c_out), lambda i: (i, 0, 0, 0)),
        compiler_params=pltpu.CompilerParams(dimension_semantics=("parallel",)),
    )(x_even, x_odd, w_bf16, b_f32)
    return out


def backbone_forward(x_nchw, params):
    """JAX/Pallas equivalent of Backbone.forward.

    params: list of (w4 [3,3,Cin,Cout] f32, b [Cout] f32), one tuple per stage.
    Returns a list of NCHW f32 feature maps (one per out_index), each already
    ReLU'd -- the trailing F.relu of the PyTorch forward is fused into the
    conv epilogue (ReLU is idempotent).
    """
    x = jnp.transpose(x_nchw, (0, 2, 3, 1))            # NCHW -> NHWC, once
    feats = []
    for w4, b in params:
        kh, kw, c_in, c_out = w4.shape
        w_taps = w4.reshape(kh * kw, c_in, c_out).astype(jnp.bfloat16)
        bb = b.reshape(1, c_out).astype(jnp.float32)
        x = _conv3x3_s2_relu(x, w_taps, bb)            # stays NHWC between stages
        feats.append(jnp.transpose(x, (0, 3, 1, 2)))   # NHWC -> NCHW, once per feature
    return feats


def init_params(key, c_in=4, stage_channels=(8, 16, 32)):
    params = []
    cin = c_in
    for cout in stage_channels:
        key, k_w, k_b = jax.random.split(key, 3)
        w4 = jax.random.normal(k_w, (3, 3, cin, cout), jnp.float32) * (2.0 / (9 * cin)) ** 0.5
        b = jax.random.normal(k_b, (cout,), jnp.float32) * 0.1
        params.append((w4, b))
        cin = cout
    return params


def _reference_forward(x_nchw, params):
    """Pure-JAX f32 reference (lax.conv) mirroring the module semantics."""
    feats = []
    x = x_nchw
    for w4, b in params:
        x = jax.lax.conv_general_dilated(
            x, w4, window_strides=(2, 2), padding=((1, 1), (1, 1)),
            dimension_numbers=("NCHW", "HWIO", "NCHW"))
        x = jnp.maximum(x + b.reshape(1, -1, 1, 1), 0.0)
        feats.append(x)  # forward's F.relu on an already-ReLU'd map is a no-op
    return feats


if __name__ == "__main__":
    key = jax.random.PRNGKey(0)
    k_x, k_p = jax.random.split(key)
    x = jax.random.normal(k_x, (2, 4, 16, 16), dtype=jnp.float32)   # NCHW input
    params = init_params(k_p)

    fwd = jax.jit(lambda inp: backbone_forward(inp, params))
    feats = fwd(x)
    jax.block_until_ready(feats)

    expected_shapes = [(2, 8, 8, 8), (2, 16, 4, 4), (2, 32, 2, 2)]
    got_shapes = [tuple(f.shape) for f in feats]
    assert got_shapes == expected_shapes, got_shapes

    refs = _reference_forward(x, params)
    for f, r in zip(feats, refs):
        err = float(jnp.max(jnp.abs(f - r)))
        assert jnp.allclose(f, r, rtol=1e-1, atol=1e-1), err

    print("KERNEL_OK")
</pallas_src>

<mosaic_0001>
module attributes {stable_mosaic.version = 11 : i64} {
  func.func @_conv3x3_s2_relu_kernel(%arg0: i32, %arg1: memref<1x18x9x4xf32, #tpu.memory_space<vmem>>, %arg2: memref<1x18x9x4xf32, #tpu.memory_space<vmem>>, %arg3: memref<9x4x8xbf16, #tpu.memory_space<vmem>>, %arg4: memref<1x8xf32, #tpu.memory_space<vmem>>, %arg5: memref<1x8x8x8xf32, #tpu.memory_space<vmem>>) attributes {dimension_semantics = [#tpu.dimension_semantics<parallel>], iteration_bounds = array<i64: 2>, scalar_prefetch = 0 : i64, scratch_operands = 0 : i64, tpu.core_type = #tpu.core_type<tc>, window_params = [{transform_indices = @transform_0, window_bounds = array<i64: 1, 18, 9, 4>}, {transform_indices = @transform_1, window_bounds = array<i64: 1, 18, 9, 4>}, {pipeline_mode = #tpu.pipeline_mode<synchronous>, transform_indices = @transform_2, window_bounds = array<i64: 9, 4, 8>}, {pipeline_mode = #tpu.pipeline_mode<synchronous>, transform_indices = @transform_3, window_bounds = array<i64: 1, 8>}, {transform_indices = @transform_4, window_bounds = array<i64: 1, 8, 8, 8>}]} {
    %c0 = arith.constant 0 : index
    %c0_0 = arith.constant 0 : index
    %0 = vector.load %arg4[%c0, %c0_0] : memref<1x8xf32, #tpu.memory_space<vmem>>, vector<1x8xf32>
    %c0_1 = arith.constant 0 : index
    %c0_2 = arith.constant 0 : index
    %c0_3 = arith.constant 0 : index
    %1 = vector.load %arg3[%c0_1, %c0_2, %c0_3] : memref<9x4x8xbf16, #tpu.memory_space<vmem>>, vector<1x4x8xbf16>
    %2 = vector.shape_cast %1 : vector<1x4x8xbf16> to vector<4x8xbf16>
    %c1 = arith.constant 1 : index
    %c0_4 = arith.constant 0 : index
    %c0_5 = arith.constant 0 : index
    %3 = vector.load %arg3[%c1, %c0_4, %c0_5] : memref<9x4x8xbf16, #tpu.memory_space<vmem>>, vector<1x4x8xbf16>
    %4 = vector.shape_cast %3 : vector<1x4x8xbf16> to vector<4x8xbf16>
    %c2 = arith.constant 2 : index
    %c0_6 = arith.constant 0 : index
    %c0_7 = arith.constant 0 : index
    %5 = vector.load %arg3[%c2, %c0_6, %c0_7] : memref<9x4x8xbf16, #tpu.memory_space<vmem>>, vector<1x4x8xbf16>
    %6 = vector.shape_cast %5 : vector<1x4x8xbf16> to vector<4x8xbf16>
    %c3 = arith.constant 3 : index
    %c0_8 = arith.constant 0 : index
    %c0_9 = arith.constant 0 : index
    %7 = vector.load %arg3[%c3, %c0_8, %c0_9] : memref<9x4x8xbf16, #tpu.memory_space<vmem>>, vector<1x4x8xbf16>
    %8 = vector.shape_cast %7 : vector<1x4x8xbf16> to vector<4x8xbf16>
    %c4 = arith.constant 4 : index
    %c0_10 = arith.constant 0 : index
    %c0_11 = arith.constant 0 : index
    %9 = vector.load %arg3[%c4, %c0_10, %c0_11] : memref<9x4x8xbf16, #tpu.memory_space<vmem>>, vector<1x4x8xbf16>
    %10 = vector.shape_cast %9 : vector<1x4x8xbf16> to vector<4x8xbf16>
    %c5 = arith.constant 5 : index
    %c0_12 = arith.constant 0 : index
    %c0_13 = arith.constant 0 : index
    %11 = vector.load %arg3[%c5, %c0_12, %c0_13] : memref<9x4x8xbf16, #tpu.memory_space<vmem>>, vector<1x4x8xbf16>
    %12 = vector.shape_cast %11 : vector<1x4x8xbf16> to vector<4x8xbf16>
    %c6 = arith.constant 6 : index
    %c0_14 = arith.constant 0 : index
    %c0_15 = arith.constant 0 : index
    %13 = vector.load %arg3[%c6, %c0_14, %c0_15] : memref<9x4x8xbf16, #tpu.memory_space<vmem>>, vector<1x4x8xbf16>
    %14 = vector.shape_cast %13 : vector<1x4x8xbf16> to vector<4x8xbf16>
    %c7 = arith.constant 7 : index
    %c0_16 = arith.constant 0 : index
    %c0_17 = arith.constant 0 : index
    %15 = vector.load %arg3[%c7, %c0_16, %c0_17] : memref<9x4x8xbf16, #tpu.memory_space<vmem>>, vector<1x4x8xbf16>
    %16 = vector.shape_cast %15 : vector<1x4x8xbf16> to vector<4x8xbf16>
    %c8 = arith.constant 8 : index
    %c0_18 = arith.constant 0 : index
    %c0_19 = arith.constant 0 : index
    %17 = vector.load %arg3[%c8, %c0_18, %c0_19] : memref<9x4x8xbf16, #tpu.memory_space<vmem>>, vector<1x4x8xbf16>
    %18 = vector.shape_cast %17 : vector<1x4x8xbf16> to vector<4x8xbf16>
    %cst = arith.constant 0.000000e+00 : f32
    %19 = vector.broadcast %cst : f32 to vector<8x8xf32>
    %c0_20 = arith.constant 0 : index
    %c0_21 = arith.constant 0 : index
    %c0_22 = arith.constant 0 : index
    %c0_23 = arith.constant 0 : index
    %20 = vector.load %arg1[%c0_20, %c0_21, %c0_22, %c0_23] : memref<1x18x9x4xf32, #tpu.memory_space<vmem>>, vector<1x1x8x4xf32>
    %21 = vector.shape_cast %20 : vector<1x1x8x4xf32> to vector<8x4xf32>
    %22 = arith.truncf %21 : vector<8x4xf32> to vector<8x4xbf16>
    %cst_24 = arith.constant dense<0.000000e+00> : vector<8x8xf32>
    %23 = tpu.matmul %22, %2, %cst_24 {dimension_numbers = #tpu.dot_dimension_numbers<[1], [0], [0], [1], [0, 0, 1, 1], [], []>} : vector<8x4xbf16>, vector<4x8xbf16>, vector<8x8xf32> -> vector<8x8xf32>
    %24 = arith.addf %19, %23 : vector<8x8xf32>
    %c0_25 = arith.constant 0 : index
    %c0_26 = arith.constant 0 : index
    %c0_27 = arith.constant 0 : index
    %c0_28 = arith.constant 0 : index
    %25 = vector.load %arg2[%c0_25, %c0_26, %c0_27, %c0_28] : memref<1x18x9x4xf32, #tpu.memory_space<vmem>>, vector<1x1x8x4xf32>
    %26 = vector.shape_cast %25 : vector<1x1x8x4xf32> to vector<8x4xf32>
    %27 = arith.truncf %26 : vector<8x4xf32> to vector<8x4xbf16>
    %cst_29 = arith.constant dense<0.000000e+00> : vector<8x8xf32>
    %28 = tpu.matmul %27, %4, %cst_29 {dimension_numbers = #tpu.dot_dimension_numbers<[1], [0], [0], [1], [0, 0, 1, 1], [], []>} : vector<8x4xbf16>, vector<4x8xbf16>, vector<8x8xf32> -> vector<8x8xf32>
    %29 = arith.addf %24, %28 : vector<8x8xf32>
    %c0_30 = arith.constant 0 : index
    %c0_31 = arith.constant 0 : index
    %c1_32 = arith.constant 1 : index
    %c0_33 = arith.constant 0 : index
    %30 = vector.load %arg1[%c0_30, %c0_31, %c1_32, %c0_33] : memref<1x18x9x4xf32, #tpu.memory_space<vmem>>, vector<1x1x8x4xf32>
    %31 = vector.shape_cast %30 : vector<1x1x8x4xf32> to vector<8x4xf32>
    %32 = arith.truncf %31 : vector<8x4xf32> to vector<8x4xbf16>
    %cst_34 = arith.constant dense<0.000000e+00> : vector<8x8xf32>
    %33 = tpu.matmul %32, %6, %cst_34 {dimension_numbers = #tpu.dot_dimension_numbers<[1], [0], [0], [1], [0, 0, 1, 1], [], []>} : vector<8x4xbf16>, vector<4x8xbf16>, vector<8x8xf32> -> vector<8x8xf32>
    %34 = arith.addf %29, %33 : vector<8x8xf32>
    %c0_35 = arith.constant 0 : index
    %c1_36 = arith.constant 1 : index
    %c0_37 = arith.constant 0 : index
    %c0_38 = arith.constant 0 : index
    %35 = vector.load %arg1[%c0_35, %c1_36, %c0_37, %c0_38] : memref<1x18x9x4xf32, #tpu.memory_space<vmem>>, vector<1x1x8x4xf32>
    %36 = vector.shape_cast %35 : vector<1x1x8x4xf32> to vector<8x4xf32>
    %37 = arith.truncf %36 : vector<8x4xf32> to vector<8x4xbf16>
    %cst_39 = arith.constant dense<0.000000e+00> : vector<8x8xf32>
    %38 = tpu.matmul %37, %8, %cst_39 {dimension_numbers = #tpu.dot_dimension_numbers<[1], [0], [0], [1], [0, 0, 1, 1], [], []>} : vector<8x4xbf16>, vector<4x8xbf16>, vector<8x8xf32> -> vector<8x8xf32>
    %39 = arith.addf %34, %38 : vector<8x8xf32>
    %c0_40 = arith.constant 0 : index
    %c1_41 = arith.constant 1 : index
    %c0_42 = arith.constant 0 : index
    %c0_43 = arith.constant 0 : index
    %40 = vector.load %arg2[%c0_40, %c1_41, %c0_42, %c0_43] : memref<1x18x9x4xf32, #tpu.memory_space<vmem>>, vector<1x1x8x4xf32>
    %41 = vector.shape_cast %40 : vector<1x1x8x4xf32> to vector<8x4xf32>
    %42 = arith.truncf %41 : vector<8x4xf32> to vector<8x4xbf16>
    %cst_44 = arith.constant dense<0.000000e+00> : vector<8x8xf32>
    %43 = tpu.matmul %42, %10, %cst_44 {dimension_numbers = #tpu.dot_dimension_numbers<[1], [0], [0], [1], [0, 0, 1, 1], [], []>} : vector<8x4xbf16>, vector<4x8xbf16>, vector<8x8xf32> -> vector<8x8xf32>
    %44 = arith.addf %39, %43 : vector<8x8xf32>
    %c0_45 = arith.constant 0 : index
    %c1_46 = arith.constant 1 : index
    %c1_47 = arith.constant 1 : index
    %c0_48 = arith.constant 0 : index
    %45 = vector.load %arg1[%c0_45, %c1_46, %c1_47, %c0_48] : memref<1x18x9x4xf32, #tpu.memory_space<vmem>>, vector<1x1x8x4xf32>
    %46 = vector.shape_cast %45 : vector<1x1x8x4xf32> to vector<8x4xf32>
    %47 = arith.truncf %46 : vector<8x4xf32> to vector<8x4xbf16>
    %cst_49 = arith.constant dense<0.000000e+00> : vector<8x8xf32>
    %48 = tpu.matmul %47, %12, %cst_49 {dimension_numbers = #tpu.dot_dimension_numbers<[1], [0], [0], [1], [0, 0, 1, 1], [], []>} : vector<8x4xbf16>, vector<4x8xbf16>, vector<8x8xf32> -> vector<8x8xf32>
    %49 = arith.addf %44, %48 : vector<8x8xf32>
    %c0_50 = arith.constant 0 : index
    %c2_51 = arith.constant 2 : index
    %c0_52 = arith.constant 0 : index
    %c0_53 = arith.constant 0 : index
    %50 = vector.load %arg1[%c0_50, %c2_51, %c0_52, %c0_53] : memref<1x18x9x4xf32, #tpu.memory_space<vmem>>, vector<1x1x8x4xf32>
    %51 = vector.shape_cast %50 : vector<1x1x8x4xf32> to vector<8x4xf32>
    %52 = arith.truncf %51 : vector<8x4xf32> to vector<8x4xbf16>
    %cst_54 = arith.constant dense<0.000000e+00> : vector<8x8xf32>
    %53 = tpu.matmul %52, %14, %cst_54 {dimension_numbers = #tpu.dot_dimension_numbers<[1], [0], [0], [1], [0, 0, 1, 1], [], []>} : vector<8x4xbf16>, vector<4x8xbf16>, vector<8x8xf32> -> vector<8x8xf32>
    %54 = arith.addf %49, %53 : vector<8x8xf32>
    %c0_55 = arith.constant 0 : index
    %c2_56 = arith.constant 2 : index
    %c0_57 = arith.constant 0 : index
    %c0_58 = arith.constant 0 : index
    %55 = vector.load %arg2[%c0_55, %c2_56, %c0_57, %c0_58] : memref<1x18x9x4xf32, #tpu.memory_space<vmem>>, vector<1x1x8x4xf32>
    %56 = vector.shape_cast %55 : vector<1x1x8x4xf32> to vector<8x4xf32>
    %57 = arith.truncf %56 : vector<8x4xf32> to vector<8x4xbf16>
    %cst_59 = arith.constant dense<0.000000e+00> : vector<8x8xf32>
    %58 = tpu.matmul %57, %16, %cst_59 {dimension_numbers = #tpu.dot_dimension_numbers<[1], [0], [0], [1], [0, 0, 1, 1], [], []>} : vector<8x4xbf16>, vector<4x8xbf16>, vector<8x8xf32> -> vector<8x8xf32>
    %59 = arith.addf %54, %58 : vector<8x8xf32>
    %c0_60 = arith.constant 0 : index
    %c2_61 = arith.constant 2 : index
    %c1_62 = arith.constant 1 : index
    %c0_63 = arith.constant 0 : index
    %60 = vector.load %arg1[%c0_60, %c2_61, %c1_62, %c0_63] : memref<1x18x9x4xf32, #tpu.memory_space<vmem>>, vector<1x1x8x4xf32>
    %61 = vector.shape_cast %60 : vector<1x1x8x4xf32> to vector<8x4xf32>
    %62 = arith.truncf %61 : vector<8x4xf32> to vector<8x4xbf16>
    %cst_64 = arith.constant dense<0.000000e+00> : vector<8x8xf32>
    %63 = tpu.matmul %62, %18, %cst_64 {dimension_numbers = #tpu.dot_dimension_numbers<[1], [0], [0], [1], [0, 0, 1, 1], [], []>} : vector<8x4xbf16>, vector<4x8xbf16>, vector<8x8xf32> -> vector<8x8xf32>
    %64 = arith.addf %59, %63 : vector<8x8xf32>
    %65 = vector.broadcast %0 : vector<1x8xf32> to vector<8x8xf32>
    %66 = arith.addf %64, %65 : vector<8x8xf32>
    %cst_65 = arith.constant 0.000000e+00 : f32
    %67 = vector.broadcast %cst_65 : f32 to vector<8x8xf32>
    %68 = arith.maximumf %66, %67 : vector<8x8xf32>
    %c0_66 = arith.constant 0 : index
    %c0_67 = arith.constant 0 : index
    %c0_68 = arith.constant 0 : index
    %c0_69 = arith.constant 0 : index
    %69 = vector.load %arg5[%c0_66, %c0_67, %c0_68, %c0_69] : memref<1x8x8x8xf32, #tpu.memory_space<vmem>>, vector<1x1x8x8xf32>
    %70 = vector.shape_cast %69 : vector<1x1x8x8xf32> to vector<8x8xf32>
    %71 = vector.shape_cast %68 : vector<8x8xf32> to vector<1x1x8x8xf32>
    tpu.vector_store %arg5[%c0_66, %c0_67, %c0_68, %c0_69], %71 {strides = array<i32>} : memref<1x8x8x8xf32, #tpu.memory_space<vmem>>, vector<1x1x8x8xf32>,
    %cst_70 = arith.constant 0.000000e+00 : f32
    %72 = vector.broadcast %cst_70 : f32 to vector<8x8xf32>
    %c0_71 = arith.constant 0 : index
    %c2_72 = arith.constant 2 : index
    %c0_73 = arith.constant 0 : index
    %c0_74 = arith.constant 0 : index
    %73 = vector.load %arg1[%c0_71, %c2_72, %c0_73, %c0_74] : memref<1x18x9x4xf32, #tpu.memory_space<vmem>>, vector<1x1x8x4xf32>
    %74 = vector.shape_cast %73 : vector<1x1x8x4xf32> to vector<8x4xf32>
    %75 = arith.truncf %74 : vector<8x4xf32> to vector<8x4xbf16>
    %cst_75 = arith.constant dense<0.000000e+00> : vector<8x8xf32>
    %76 = tpu.matmul %75, %2, %cst_75 {dimension_numbers = #tpu.dot_dimension_numbers<[1], [0], [0], [1], [0, 0, 1, 1], [], []>} : vector<8x4xbf16>, vector<4x8xbf16>, vector<8x8xf32> -> vector<8x8xf32>
    %77 = arith.addf %72, %76 : vector<8x8xf32>
    %c0_76 = arith.constant 0 : index
    %c2_77 = arith.constant 2 : index
    %c0_78 = arith.constant 0 : index
    %c0_79 = arith.constant 0 : index
    %78 = vector.load %arg2[%c0_76, %c2_77, %c0_78, %c0_79] : memref<1x18x9x4xf32, #tpu.memory_space<vmem>>, vector<1x1x8x4xf32>
    %79 = vector.shape_cast %78 : vector<1x1x8x4xf32> to vector<8x4xf32>
    %80 = arith.truncf %79 : vector<8x4xf32> to vector<8x4xbf16>
    %cst_80 = arith.constant dense<0.000000e+00> : vector<8x8xf32>
    %81 = tpu.matmul %80, %4, %cst_80 {dimension_numbers = #tpu.dot_dimension_numbers<[1], [0], [0], [1], [0, 0, 1, 1], [], []>} : vector<8x4xbf16>, vector<4x8xbf16>, vector<8x8xf32> -> vector<8x8xf32>
    %82 = arith.addf %77, %81 : vector<8x8xf32>
    %c0_81 = arith.constant 0 : index
    %c2_82 = arith.constant 2 : index
    %c1_83 = arith.constant 1 : index
    %c0_84 = arith.constant 0 : index
    %83 = vector.load %arg1[%c0_81, %c2_82, %c1_83, %c0_84] : memref<1x18x9x4xf32, #tpu.memory_space<vmem>>, vector<1x1x8x4xf32>
    %84 = vector.shape_cast %83 : vector<1x1x8x4xf32> to vector<8x4xf32>
    %85 = arith.truncf %84 : vector<8x4xf32> to vector<8x4xbf16>
    %cst_85 = arith.constant dense<0.000000e+00> : vector<8x8xf32>
    %86 = tpu.matmul %85, %6, %cst_85 {dimension_numbers = #tpu.dot_dimension_numbers<[1], [0], [0], [1], [0, 0, 1, 1], [], []>} : vector<8x4xbf16>, vector<4x8xbf16>, vector<8x8xf32> -> vector<8x8xf32>
    %87 = arith.addf %82, %86 : vector<8x8xf32>
    %c0_86 = arith.constant 0 : index
    %c3_87 = arith.constant 3 : index
    %c0_88 = arith.constant 0 : index
    %c0_89 = arith.constant 0 : index
    %88 = vector.load %arg1[%c0_86, %c3_87, %c0_88, %c0_89] : memref<1x18x9x4xf32, #tpu.memory_space<vmem>>, vector<1x1x8x4xf32>
    %89 = vector.shape_cast %88 : vector<1x1x8x4xf32> to vector<8x4xf32>
    %90 = arith.truncf %89 : vector<8x4xf32> to vector<8x4xbf16>
    %cst_90 = arith.constant dense<0.000000e+00> : vector<8x8xf32>
    %91 = tpu.matmul %90, %8, %cst_90 {dimension_numbers = #tpu.dot_dimension_numbers<[1], [0], [0], [1], [0, 0, 1, 1], [], []>} : vector<8x4xbf16>, vector<4x8xbf16>, vector<8x8xf32> -> vector<8x8xf32>
    %92 = arith.addf %87, %91 : vector<8x8xf32>
    %c0_91 = arith.constant 0 : index
    %c3_92 = arith.constant 3 : index
    %c0_93 = arith.constant 0 : index
    %c0_94 = arith.constant 0 : index
    %93 = vector.load %arg2[%c0_91, %c3_92, %c0_93, %c0_94] : memref<1x18x9x4xf32, #tpu.memory_space<vmem>>, vector<1x1x8x4xf32>
    %94 = vector.shape_cast %93 : vector<1x1x8x4xf32> to vector<8x4xf32>
    %95 = arith.truncf %94 : vector<8x4xf32> to vector<8x4xbf16>
    %cst_95 = arith.constant dense<0.000000e+00> : vector<8x8xf32>
    %96 = tpu.matmul %95, %10, %cst_95 {dimension_numbers = #tpu.dot_dimension_numbers<[1], [0], [0], [1], [0, 0, 1, 1], [], []>} : vector<8x4xbf16>, vector<4x8xbf16>, vector<8x8xf32> -> vector<8x8xf32>
    %97 = arith.addf %92, %96 : vector<8x8xf32>
    %c0_96 = arith.constant 0 : index
    %c3_97 = arith.constant 3 : index
    %c1_98 = arith.constant 1 : index
    %c0_99 = arith.constant 0 : index
    %98 = vector.load %arg1[%c0_96, %c3_97, %c1_98, %c0_99] : memref<1x18x9x4xf32, #tpu.memory_space<vmem>>, vector<1x1x8x4xf32>
    %99 = vector.shape_cast %98 : vector<1x1x8x4xf32> to vector<8x4xf32>
    %100 = arith.truncf %99 : vector<8x4xf32> to vector<8x4xbf16>
    %cst_100 = arith.constant dense<0.000000e+00> : vector<8x8xf32>
    %101 = tpu.matmul %100, %12, %cst_100 {dimension_numbers = #tpu.dot_dimension_numbers<[1], [0], [0], [1], [0, 0, 1, 1], [], []>} : vector<8x4xbf16>, vector<4x8xbf16>, vector<8x8xf32> -> vector<8x8xf32>
    %102 = arith.addf %97, %101 : vector<8x8xf32>
    %c0_101 = arith.constant 0 : index
    %c4_102 = arith.constant 4 : index
    %c0_103 = arith.constant 0 : index
    %c0_104 = arith.constant 0 : index
    %103 = vector.load %arg1[%c0_101, %c4_102, %c0_103, %c0_104] : memref<1x18x9x4xf32, #tpu.memory_space<vmem>>, vector<1x1x8x4xf32>
    %104 = vector.shape_cast %103 : vector<1x1x8x4xf32> to vector<8x4xf32>
    %105 = arith.truncf %104 : vector<8x4xf32> to vector<8x4xbf16>
    %cst_105 = arith.constant dense<0.000000e+00> : vector<8x8xf32>
    %106 = tpu.matmul %105, %14, %cst_105 {dimension_numbers = #tpu.dot_dimension_numbers<[1], [0], [0], [1], [0, 0, 1, 1], [], []>} : vector<8x4xbf16>, vector<4x8xbf16>, vector<8x8xf32> -> vector<8x8xf32>
    %107 = arith.addf %102, %106 : vector<8x8xf32>
    %c0_106 = arith.constant 0 : index
    %c4_107 = arith.constant 4 : index
    %c0_108 = arith.constant 0 : index
    %c0_109 = arith.constant 0 : index
    %108 = vector.load %arg2[%c0_106, %c4_107, %c0_108, %c0_109] : memref<1x18x9x4xf32, #tpu.memory_space<vmem>>, vector<1x1x8x4xf32>
    %109 = vector.shape_cast %108 : vector<1x1x8x4xf32> to vector<8x4xf32>
    %110 = arith.truncf %109 : vector<8x4xf32> to vector<8x4xbf16>
    %cst_110 = arith.constant dense<0.000000e+00> : vector<8x8xf32>
    %111 = tpu.matmul %110, %16, %cst_110 {dimension_numbers = #tpu.dot_dimension_numbers<[1], [0], [0], [1], [0, 0, 1, 1], [], []>} : vector<8x4xbf16>, vector<4x8xbf16>, vector<8x8xf32> -> vector<8x8xf32>
    %112 = arith.addf %107, %111 : vector<8x8xf32>
    %c0_111 = arith.constant 0 : index
    %c4_112 = arith.constant 4 : index
    %c1_113 = arith.constant 1 : index
    %c0_114 = arith.constant 0 : index
    %113 = vector.load %arg1[%c0_111, %c4_112, %c1_113, %c0_114] : memref<1x18x9x4xf32, #tpu.memory_space<vmem>>, vector<1x1x8x4xf32>
    %114 = vector.shape_cast %113 : vector<1x1x8x4xf32> to vector<8x4xf32>
    %115 = arith.truncf %114 : vector<8x4xf32> to vector<8x4xbf16>
    %cst_115 = arith.constant dense<0.000000e+00> : vector<8x8xf32>
    %116 = tpu.matmul %115, %18, %cst_115 {dimension_numbers = #tpu.dot_dimension_numbers<[1], [0], [0], [1], [0, 0, 1, 1], [], []>} : vector<8x4xbf16>, vector<4x8xbf16>, vector<8x8xf32> -> vector<8x8xf32>
    %117 = arith.addf %112, %116 : vector<8x8xf32>
    %118 = vector.broadcast %0 : vector<1x8xf32> to vector<8x8xf32>
    %119 = arith.addf %117, %118 : vector<8x8xf32>
    %cst_116 = arith.constant 0.000000e+00 : f32
    %120 = vector.broadcast %cst_116 : f32 to vector<8x8xf32>
    %121 = arith.maximumf %119, %120 : vector<8x8xf32>
    %c0_117 = arith.constant 0 : index
    %c1_118 = arith.constant 1 : index
    %c0_119 = arith.constant 0 : index
    %c0_120 = arith.constant 0 : index
    %122 = vector.load %arg5[%c0_117, %c1_118, %c0_119, %c0_120] : memref<1x8x8x8xf32, #tpu.memory_space<vmem>>, vector<1x1x8x8xf32>
    %123 = vector.shape_cast %122 : vector<1x1x8x8xf32> to vector<8x8xf32>
    %124 = vector.shape_cast %121 : vector<8x8xf32> to vector<1x1x8x8xf32>
    tpu.vector_store %arg5[%c0_117, %c1_118, %c0_119, %c0_120], %124 {strides = array<i32>} : memref<1x8x8x8xf32, #tpu.memory_space<vmem>>, vector<1x1x8x8xf32>,
    %cst_121 = arith.constant 0.000000e+00 : f32
    %125 = vector.broadcast %cst_121 : f32 to vector<8x8xf32>
    %c0_122 = arith.constant 0 : index
    %c4_123 = arith.constant 4 : index
    %c0_124 = arith.constant 0 : index
    %c0_125 = arith.constant 0 : index
    %126 = vector.load %arg1[%c0_122, %c4_123, %c0_124, %c0_125] : memref<1x18x9x4xf32, #tpu.memory_space<vmem>>, vector<1x1x8x4xf32>
    %127 = vector.shape_cast %126 : vector<1x1x8x4xf32> to vector<8x4xf32>
    %128 = arith.truncf %127 : vector<8x4xf32> to vector<8x4xbf16>
    %cst_126 = arith.constant dense<0.000000e+00> : vector<8x8xf32>
    %129 = tpu.matmul %128, %2, %cst_126 {dimension_numbers = #tpu.dot_dimension_numbers<[1], [0], [0], [1], [0, 0, 1, 1], [], []>} : vector<8x4xbf16>, vector<4x8xbf16>, vector<8x8xf32> -> vector<8x8xf32>
    %130 = arith.addf %125, %129 : vector<8x8xf32>
    %c0_127 = arith.constant 0 : index
    %c4_128 = arith.constant 4 : index
    %c0_129 = arith.constant 0 : index
    %c0_130 = arith.constant 0 : index
    %131 = vector.load %arg2[%c0_127, %c4_128, %c0_129, %c0_130] : memref<1x18x9x4xf32, #tpu.memory_space<vmem>>, vector<1x1x8x4xf32>
    %132 = vector.shape_cast %131 : vector<1x1x8x4xf32> to vector<8x4xf32>
    %133 = arith.truncf %132 : vector<8x4xf32> to vector<8x4xbf16>
    %cst_131 = arith.constant dense<0.000000e+00> : vector<8x8xf32>
    %134 = tpu.matmul %133, %4, %cst_131 {dimension_numbers = #tpu.dot_dimension_numbers<[1], [0], [0], [1], [0, 0, 1, 1], [], []>} : vector<8x4xbf16>, vector<4x8xbf16>, vector<8x8xf32> -> vector<8x8xf32>
    %135 = arith.addf %130, %134 : vector<8x8xf32>
    %c0_132 = arith.constant 0 : index
    %c4_133 = arith.constant 4 : index
    %c1_134 = arith.constant 1 : index
    %c0_135 = arith.constant 0 : index
    %136 = vector.load %arg1[%c0_132, %c4_133, %c1_134, %c0_135] : memref<1x18x9x4xf32, #tpu.memory_space<vmem>>, vector<1x1x8x4xf32>
    %137 = vector.shape_cast %136 : vector<1x1x8x4xf32> to vector<8x4xf32>
    %138 = arith.truncf %137 : vector<8x4xf32> to vector<8x4xbf16>
    %cst_136 = arith.constant dense<0.000000e+00> : vector<8x8xf32>
    %139 = tpu.matmul %138, %6, %cst_136 {dimension_numbers = #tpu.dot_dimension_numbers<[1], [0], [0], [1], [0, 0, 1, 1], [], []>} : vector<8x4xbf16>, vector<4x8xbf16>, vector<8x8xf32> -> vector<8x8xf32>
    %140 = arith.addf %135, %139 : vector<8x8xf32>
    %c0_137 = arith.constant 0 : index
    %c5_138 = arith.constant 5 : index
    %c0_139 = arith.constant 0 : index
    %c0_140 = arith.constant 0 : index
    %141 = vector.load %arg1[%c0_137, %c5_138, %c0_139, %c0_140] : memref<1x18x9x4xf32, #tpu.memory_space<vmem>>, vector<1x1x8x4xf32>
    %142 = vector.shape_cast %141 : vector<1x1x8x4xf32> to vector<8x4xf32>
    %143 = arith.truncf %142 : vector<8x4xf32> to vector<8x4xbf16>
    %cst_141 = arith.constant dense<0.000000e+00> : vector<8x8xf32>
    %144 = tpu.matmul %143, %8, %cst_141 {dimension_numbers = #tpu.dot_dimension_numbers<[1], [0], [0], [1], [0, 0, 1, 1], [], []>} : vector<8x4xbf16>, vector<4x8xbf16>, vector<8x8xf32> -> vector<8x8xf32>
    %145 = arith.addf %140, %144 : vector<8x8xf32>
    %c0_142 = arith.constant 0 : index
    %c5_143 = arith.constant 5 : index
    %c0_144 = arith.constant 0 : index
    %c0_145 = arith.constant 0 : index
    %146 = vector.load %arg2[%c0_142, %c5_143, %c0_144, %c0_145] : memref<1x18x9x4xf32, #tpu.memory_space<vmem>>, vector<1x1x8x4xf32>
    %147 = vector.shape_cast %146 : vector<1x1x8x4xf32> to vector<8x4xf32>
    %148 = arith.truncf %147 : vector<8x4xf32> to vector<8x4xbf16>
    %cst_146 = arith.constant dense<0.000000e+00> : vector<8x8xf32>
    %149 = tpu.matmul %148, %10, %cst_146 {dimension_numbers = #tpu.dot_dimension_numbers<[1], [0], [0], [1], [0, 0, 1, 1], [], []>} : vector<8x4xbf16>, vector<4x8xbf16>, vector<8x8xf32> -> vector<8x8xf32>
    %150 = arith.addf %145, %149 : vector<8x8xf32>
    %c0_147 = arith.constant 0 : index
    %c5_148 = arith.constant 5 : index
    %c1_149 = arith.constant 1 : index
    %c0_150 = arith.constant 0 : index
    %151 = vector.load %arg1[%c0_147, %c5_148, %c1_149, %c0_150] : memref<1x18x9x4xf32, #tpu.memory_space<vmem>>, vector<1x1x8x4xf32>
    %152 = vector.shape_cast %151 : vector<1x1x8x4xf32> to vector<8x4xf32>
    %153 = arith.truncf %152 : vector<8x4xf32> to vector<8x4xbf16>
    %cst_151 = arith.constant dense<0.000000e+00> : vector<8x8xf32>
    %154 = tpu.matmul %153, %12, %cst_151 {dimension_numbers = #tpu.dot_dimension_numbers<[1], [0], [0], [1], [0, 0, 1, 1], [], []>} : vector<8x4xbf16>, vector<4x8xbf16>, vector<8x8xf32> -> vector<8x8xf32>
    %155 = arith.addf %150, %154 : vector<8x8xf32>
    %c0_152 = arith.constant 0 : index
    %c6_153 = arith.constant 6 : index
    %c0_154 = arith.constant 0 : index
    %c0_155 = arith.constant 0 : index
    %156 = vector.load %arg1[%c0_152, %c6_153, %c0_154, %c0_155] : memref<1x18x9x4xf32, #tpu.memory_space<vmem>>, vector<1x1x8x4xf32>
    %157 = vector.shape_cast %156 : vector<1x1x8x4xf32> to vector<8x4xf32>
    %158 = arith.truncf %157 : vector<8x4xf32> to vector<8x4xbf16>
    %cst_156 = arith.constant dense<0.000000e+00> : vector<8x8xf32>
    %159 = tpu.matmul %158, %14, %cst_156 {dimension_numbers = #tpu.dot_dimension_numbers<[1], [0], [0], [1], [0, 0, 1, 1], [], []>} : vector<8x4xbf16>, vector<4x8xbf16>, vector<8x8xf32> -> vector<8x8xf32>
    %160 = arith.addf %155, %159 : vector<8x8xf32>
    %c0_157 = arith.constant 0 : index
    %c6_158 = arith.constant 6 : index
    %c0_159 = arith.constant 0 : index
    %c0_160 = arith.constant 0 : index
    %161 = vector.load %arg2[%c0_157, %c6_158, %c0_159, %c0_160] : memref<1x18x9x4xf32, #tpu.memory_space<vmem>>, vector<1x1x8x4xf32>
    %162 = vector.shape_cast %161 : vector<1x1x8x4xf32> to vector<8x4xf32>
    %163 = arith.truncf %162 : vector<8x4xf32> to vector<8x4xbf16>
    %cst_161 = arith.constant dense<0.000000e+00> : vector<8x8xf32>
    %164 = tpu.matmul %163, %16, %cst_161 {dimension_numbers = #tpu.dot_dimension_numbers<[1], [0], [0], [1], [0, 0, 1, 1], [], []>} : vector<8x4xbf16>, vector<4x8xbf16>, vector<8x8xf32> -> vector<8x8xf32>
    %165 = arith.addf %160, %164 : vector<8x8xf32>
    %c0_162 = arith.constant 0 : index
    %c6_163 = arith.constant 6 : index
    %c1_164 = arith.constant 1 : index
    %c0_165 = arith.constant 0 : index
    %166 = vector.load %arg1[%c0_162, %c6_163, %c1_164, %c0_165] : memref<1x18x9x4xf32, #tpu.memory_space<vmem>>, vector<1x1x8x4xf32>
    %167 = vector.shape_cast %166 : vector<1x1x8x4xf32> to vector<8x4xf32>
    %168 = arith.truncf %167 : vector<8x4xf32> to vector<8x4xbf16>
    %cst_166 = arith.constant dense<0.000000e+00> : vector<8x8xf32>
    %169 = tpu.matmul %168, %18, %cst_166 {dimension_numbers = #tpu.dot_dimension_numbers<[1], [0], [0], [1], [0, 0, 1, 1], [], []>} : vector<8x4xbf16>, vector<4x8xbf16>, vector<8x8xf32> -> vector<8x8xf32>
    %170 = arith.addf %165, %169 : vector<8x8xf32>
    %171 = vector.broadcast %0 : vector<1x8xf32> to vector<8x8xf32>
    %172 = arith.addf %170, %171 : vector<8x8xf32>
    %cst_167 = arith.constant 0.000000e+00 : f32
    %173 = vector.broadcast %cst_167 : f32 to vector<8x8xf32>
    %174 = arith.maximumf %172, %173 : vector<8x8xf32>
    %c0_168 = arith.constant 0 : index
    %c2_169 = arith.constant 2 : index
    %c0_170 = arith.constant 0 : index
    %c0_171 = arith.constant 0 : index
    %175 = vector.load %arg5[%c0_168, %c2_169, %c0_170, %c0_171] : memref<1x8x8x8xf32, #tpu.memory_space<vmem>>, vector<1x1x8x8xf32>
    %176 = vector.shape_cast %175 : vector<1x1x8x8xf32> to vector<8x8xf32>
    %177 = vector.shape_cast %174 : vector<8x8xf32> to vector<1x1x8x8xf32>
    tpu.vector_store %arg5[%c0_168, %c2_169, %c0_170, %c0_171], %177 {strides = array<i32>} : memref<1x8x8x8xf32, #tpu.memory_space<vmem>>, vector<1x1x8x8xf32>,
    %cst_172 = arith.constant 0.000000e+00 : f32
    %178 = vector.broadcast %cst_172 : f32 to vector<8x8xf32>
    %c0_173 = arith.constant 0 : index
    %c6_174 = arith.constant 6 : index
    %c0_175 = arith.constant 0 : index
    %c0_176 = arith.constant 0 : index
    %179 = vector.load %arg1[%c0_173, %c6_174, %c0_175, %c0_176] : memref<1x18x9x4xf32, #tpu.memory_space<vmem>>, vector<1x1x8x4xf32>
    %180 = vector.shape_cast %179 : vector<1x1x8x4xf32> to vector<8x4xf32>
    %181 = arith.truncf %180 : vector<8x4xf32> to vector<8x4xbf16>
    %cst_177 = arith.constant dense<0.000000e+00> : vector<8x8xf32>
    %182 = tpu.matmul %181, %2, %cst_177 {dimension_numbers = #tpu.dot_dimension_numbers<[1], [0], [0], [1], [0, 0, 1, 1], [], []>} : vector<8x4xbf16>, vector<4x8xbf16>, vector<8x8xf32> -> vector<8x8xf32>
    %183 = arith.addf %178, %182 : vector<8x8xf32>
    %c0_178 = arith.constant 0 : index
    %c6_179 = arith.constant 6 : index
    %c0_180 = arith.constant 0 : index
    %c0_181 = arith.constant 0 : index
    %184 = vector.load %arg2[%c0_178, %c6_179, %c0_180, %c0_181] : memref<1x18x9x4xf32, #tpu.memory_space<vmem>>, vector<1x1x8x4xf32>
    %185 = vector.shape_cast %184 : vector<1x1x8x4xf32> to vector<8x4xf32>
    %186 = arith.truncf %185 : vector<8x4xf32> to vector<8x4xbf16>
    %cst_182 = arith.constant dense<0.000000e+00> : vector<8x8xf32>
    %187 = tpu.matmul %186, %4, %cst_182 {dimension_numbers = #tpu.dot_dimension_numbers<[1], [0], [0], [1], [0, 0, 1, 1], [], []>} : vector<8x4xbf16>, vector<4x8xbf16>, vector<8x8xf32> -> vector<8x8xf32>
    %188 = arith.addf %183, %187 : vector<8x8xf32>
    %c0_183 = arith.constant 0 : index
    %c6_184 = arith.constant 6 : index
    %c1_185 = arith.constant 1 : index
    %c0_186 = arith.constant 0 : index
    %189 = vector.load %arg1[%c0_183, %c6_184, %c1_185, %c0_186] : memref<1x18x9x4xf32, #tpu.memory_space<vmem>>, vector<1x1x8x4xf32>
    %190 = vector.shape_cast %189 : vector<1x1x8x4xf32> to vector<8x4xf32>
    %191 = arith.truncf %190 : vector<8x4xf32> to vector<8x4xbf16>
    %cst_187 = arith.constant dense<0.000000e+00> : vector<8x8xf32>
    %192 = tpu.matmul %191, %6, %cst_187 {dimension_numbers = #tpu.dot_dimension_numbers<[1], [0], [0], [1], [0, 0, 1, 1], [], []>} : vector<8x4xbf16>, vector<4x8xbf16>, vector<8x8xf32> -> vector<8x8xf32>
    %193 = arith.addf %188, %192 : vector<8x8xf32>
    %c0_188 = arith.constant 0 : index
    %c7_189 = arith.constant 7 : index
    %c0_190 = arith.constant 0 : index
    %c0_191 = arith.constant 0 : index
    %194 = vector.load %arg1[%c0_188, %c7_189, %c0_190, %c0_191] : memref<1x18x9x4xf32, #tpu.memory_space<vmem>>, vector<1x1x8x4xf32>
    %195 = vector.shape_cast %194 : vector<1x1x8x4xf32> to vector<8x4xf32>
    %196 = arith.truncf %195 : vector<8x4xf32> to vector<8x4xbf16>
    %cst_192 = arith.constant dense<0.000000e+00> : vector<8x8xf32>
    %197 = tpu.matmul %196, %8, %cst_192 {dimension_numbers = #tpu.dot_dimension_numbers<[1], [0], [0], [1], [0, 0, 1, 1], [], []>} : vector<8x4xbf16>, vector<4x8xbf16>, vector<8x8xf32> -> vector<8x8xf32>
    %198 = arith.addf %193, %197 : vector<8x8xf32>
    %c0_193 = arith.constant 0 : index
    %c7_194 = arith.constant 7 : index
    %c0_195 = arith.constant 0 : index
    %c0_196 = arith.constant 0 : index
    %199 = vector.load %arg2[%c0_193, %c7_194, %c0_195, %c0_196] : memref<1x18x9x4xf32, #tpu.memory_space<vmem>>, vector<1x1x8x4xf32>
    %200 = vector.shape_cast %199 : vector<1x1x8x4xf32> to vector<8x4xf32>
    %201 = arith.truncf %200 : vector<8x4xf32> to vector<8x4xbf16>
    %cst_197 = arith.constant dense<0.000000e+00> : vector<8x8xf32>
    %202 = tpu.matmul %201, %10, %cst_197 {dimension_numbers = #tpu.dot_dimension_numbers<[1], [0], [0], [1], [0, 0, 1, 1], [], []>} : vector<8x4xbf16>, vector<4x8xbf16>, vector<8x8xf32> -> vector<8x8xf32>
    %203 = arith.addf %198, %202 : vector<8x8xf32>
    %c0_198 = arith.constant 0 : index
    %c7_199 = arith.constant 7 : index
    %c1_200 = arith.constant 1 : index
    %c0_201 = arith.constant 0 : index
    %204 = vector.load %arg1[%c0_198, %c7_199, %c1_200, %c0_201] : memref<1x18x9x4xf32, #tpu.memory_space<vmem>>, vector<1x1x8x4xf32>
    %205 = vector.shape_cast %204 : vector<1x1x8x4xf32> to vector<8x4xf32>
    %206 = arith.truncf %205 : vector<8x4xf32> to vector<8x4xbf16>
    %cst_202 = arith.constant dense<0.000000e+00> : vector<8x8xf32>
    %207 = tpu.matmul %206, %12, %cst_202 {dimension_numbers = #tpu.dot_dimension_numbers<[1], [0], [0], [1], [0, 0, 1, 1], [], []>} : vector<8x4xbf16>, vector<4x8xbf16>, vector<8x8xf32> -> vector<8x8xf32>
    %208 = arith.addf %203, %207 : vector<8x8xf32>
    %c0_203 = arith.constant 0 : index
    %c8_204 = arith.constant 8 : index
    %c0_205 = arith.constant 0 : index
    %c0_206 = arith.constant 0 : index
    %209 = vector.load %arg1[%c0_203, %c8_204, %c0_205, %c0_206] : memref<1x18x9x4xf32, #tpu.memory_space<vmem>>, vector<1x1x8x4xf32>
    %210 = vector.shape_cast %209 : vector<1x1x8x4xf32> to vector<8x4xf32>
    %211 = arith.truncf %210 : vector<8x4xf32> to vector<8x4xbf16>
    %cst_207 = arith.constant dense<0.000000e+00> : vector<8x8xf32>
    %212 = tpu.matmul %211, %14, %cst_207 {dimension_numbers = #tpu.dot_dimension_numbers<[1], [0], [0], [1], [0, 0, 1, 1], [], []>} : vector<8x4xbf16>, vector<4x8xbf16>, vector<8x8xf32> -> vector<8x8xf32>
    %213 = arith.addf %208, %212 : vector<8x8xf32>
    %c0_208 = arith.constant 0 : index
    %c8_209 = arith.constant 8 : index
    %c0_210 = arith.constant 0 : index
    %c0_211 = arith.constant 0 : index
    %214 = vector.load %arg2[%c0_208, %c8_209, %c0_210, %c0_211] : memref<1x18x9x4xf32, #tpu.memory_space<vmem>>, vector<1x1x8x4xf32>
    %215 = vector.shape_cast %214 : vector<1x1x8x4xf32> to vector<8x4xf32>
    %216 = arith.truncf %215 : vector<8x4xf32> to vector<8x4xbf16>
    %cst_212 = arith.constant dense<0.000000e+00> : vector<8x8xf32>
    %217 = tpu.matmul %216, %16, %cst_212 {dimension_numbers = #tpu.dot_dimension_numbers<[1], [0], [0], [1], [0, 0, 1, 1], [], []>} : vector<8x4xbf16>, vector<4x8xbf16>, vector<8x8xf32> -> vector<8x8xf32>
    %218 = arith.addf %213, %217 : vector<8x8xf32>
    %c0_213 = arith.constant 0 : index
    %c8_214 = arith.constant 8 : index
    %c1_215 = arith.constant 1 : index
    %c0_216 = arith.constant 0 : index
    %219 = vector.load %arg1[%c0_213, %c8_214, %c1_215, %c0_216] : memref<1x18x9x4xf32, #tpu.memory_space<vmem>>, vector<1x1x8x4xf32>
    %220 = vector.shape_cast %219 : vector<1x1x8x4xf32> to vector<8x4xf32>
    %221 = arith.truncf %220 : vector<8x4xf32> to vector<8x4xbf16>
    %cst_217 = arith.constant dense<0.000000e+00> : vector<8x8xf32>
    %222 = tpu.matmul %221, %18, %cst_217 {dimension_numbers = #tpu.dot_dimension_numbers<[1], [0], [0], [1], [0, 0, 1, 1], [], []>} : vector<8x4xbf16>, vector<4x8xbf16>, vector<8x8xf32> -> vector<8x8xf32>
    %223 = arith.addf %218, %222 : vector<8x8xf32>
    %224 = vector.broadcast %0 : vector<1x8xf32> to vector<8x8xf32>
    %225 = arith.addf %223, %224 : vector<8x8xf32>
    %cst_218 = arith.constant 0.000000e+00 : f32
    %226 = vector.broadcast %cst_218 : f32 to vector<8x8xf32>
    %227 = arith.maximumf %225, %226 : vector<8x8xf32>
    %c0_219 = arith.constant 0 : index
    %c3_220 = arith.constant 3 : index
    %c0_221 = arith.constant 0 : index
    %c0_222 = arith.constant 0 : index
    %228 = vector.load %arg5[%c0_219, %c3_220, %c0_221, %c0_222] : memref<1x8x8x8xf32, #tpu.memory_space<vmem>>, vector<1x1x8x8xf32>
    %229 = vector.shape_cast %228 : vector<1x1x8x8xf32> to vector<8x8xf32>
    %230 = vector.shape_cast %227 : vector<8x8xf32> to vector<1x1x8x8xf32>
    tpu.vector_store %arg5[%c0_219, %c3_220, %c0_221, %c0_222], %230 {strides = array<i32>} : memref<1x8x8x8xf32, #tpu.memory_space<vmem>>, vector<1x1x8x8xf32>,
    %cst_223 = arith.constant 0.000000e+00 : f32
    %231 = vector.broadcast %cst_223 : f32 to vector<8x8xf32>
    %c0_224 = arith.constant 0 : index
    %c8_225 = arith.constant 8 : index
    %c0_226 = arith.constant 0 : index
    %c0_227 = arith.constant 0 : index
    %232 = vector.load %arg1[%c0_224, %c8_225, %c0_226, %c0_227] : memref<1x18x9x4xf32, #tpu.memory_space<vmem>>, vector<1x1x8x4xf32>
    %233 = vector.shape_cast %232 : vector<1x1x8x4xf32> to vector<8x4xf32>
    %234 = arith.truncf %233 : vector<8x4xf32> to vector<8x4xbf16>
    %cst_228 = arith.constant dense<0.000000e+00> : vector<8x8xf32>
    %235 = tpu.matmul %234, %2, %cst_228 {dimension_numbers = #tpu.dot_dimension_numbers<[1], [0], [0], [1], [0, 0, 1, 1], [], []>} : vector<8x4xbf16>, vector<4x8xbf16>, vector<8x8xf32> -> vector<8x8xf32>
    %236 = arith.addf %231, %235 : vector<8x8xf32>
    %c0_229 = arith.constant 0 : index
    %c8_230 = arith.constant 8 : index
    %c0_231 = arith.constant 0 : index
    %c0_232 = arith.constant 0 : index
    %237 = vector.load %arg2[%c0_229, %c8_230, %c0_231, %c0_232] : memref<1x18x9x4xf32, #tpu.memory_space<vmem>>, vector<1x1x8x4xf32>
    %238 = vector.shape_cast %237 : vector<1x1x8x4xf32> to vector<8x4xf32>
    %239 = arith.truncf %238 : vector<8x4xf32> to vector<8x4xbf16>
    %cst_233 = arith.constant dense<0.000000e+00> : vector<8x8xf32>
    %240 = tpu.matmul %239, %4, %cst_233 {dimension_numbers = #tpu.dot_dimension_numbers<[1], [0], [0], [1], [0, 0, 1, 1], [], []>} : vector<8x4xbf16>, vector<4x8xbf16>, vector<8x8xf32> -> vector<8x8xf32>
    %241 = arith.addf %236, %240 : vector<8x8xf32>
    %c0_234 = arith.constant 0 : index
    %c8_235 = arith.constant 8 : index
    %c1_236 = arith.constant 1 : index
    %c0_237 = arith.constant 0 : index
    %242 = vector.load %arg1[%c0_234, %c8_235, %c1_236, %c0_237] : memref<1x18x9x4xf32, #tpu.memory_space<vmem>>, vector<1x1x8x4xf32>
    %243 = vector.shape_cast %242 : vector<1x1x8x4xf32> to vector<8x4xf32>
    %244 = arith.truncf %243 : vector<8x4xf32> to vector<8x4xbf16>
    %cst_238 = arith.constant dense<0.000000e+00> : vector<8x8xf32>
    %245 = tpu.matmul %244, %6, %cst_238 {dimension_numbers = #tpu.dot_dimension_numbers<[1], [0], [0], [1], [0, 0, 1, 1], [], []>} : vector<8x4xbf16>, vector<4x8xbf16>, vector<8x8xf32> -> vector<8x8xf32>
    %246 = arith.addf %241, %245 : vector<8x8xf32>
    %c0_239 = arith.constant 0 : index
    %c9 = arith.constant 9 : index
    %c0_240 = arith.constant 0 : index
    %c0_241 = arith.constant 0 : index
    %247 = vector.load %arg1[%c0_239, %c9, %c0_240, %c0_241] : memref<1x18x9x4xf32, #tpu.memory_space<vmem>>, vector<1x1x8x4xf32>
    %248 = vector.shape_cast %247 : vector<1x1x8x4xf32> to vector<8x4xf32>
    %249 = arith.truncf %248 : vector<8x4xf32> to vector<8x4xbf16>
    %cst_242 = arith.constant dense<0.000000e+00> : vector<8x8xf32>
    %250 = tpu.matmul %249, %8, %cst_242 {dimension_numbers = #tpu.dot_dimension_numbers<[1], [0], [0], [1], [0, 0, 1, 1], [], []>} : vector<8x4xbf16>, vector<4x8xbf16>, vector<8x8xf32> -> vector<8x8xf32>
    %251 = arith.addf %246, %250 : vector<8x8xf32>
    %c0_243 = arith.constant 0 : index
    %c9_244 = arith.constant 9 : index
    %c0_245 = arith.constant 0 : index
    %c0_246 = arith.constant 0 : index
    %252 = vector.load %arg2[%c0_243, %c9_244, %c0_245, %c0_246] : memref<1x18x9x4xf32, #tpu.memory_space<vmem>>, vector<1x1x8x4xf32>
    %253 = vector.shape_cast %252 : vector<1x1x8x4xf32> to vector<8x4xf32>
    %254 = arith.truncf %253 : vector<8x4xf32> to vector<8x4xbf16>
    %cst_247 = arith.constant dense<0.000000e+00> : vector<8x8xf32>
    %255 = tpu.matmul %254, %10, %cst_247 {dimension_numbers = #tpu.dot_dimension_numbers<[1], [0], [0], [1], [0, 0, 1, 1], [], []>} : vector<8x4xbf16>, vector<4x8xbf16>, vector<8x8xf32> -> vector<8x8xf32>
    %256 = arith.addf %251, %255 : vector<8x8xf32>
    %c0_248 = arith.constant 0 : index
    %c9_249 = arith.constant 9 : index
    %c1_250 = arith.constant 1 : index
    %c0_251 = arith.constant 0 : index
    %257 = vector.load %arg1[%c0_248, %c9_249, %c1_250, %c0_251] : memref<1x18x9x4xf32, #tpu.memory_space<vmem>>, vector<1x1x8x4xf32>
    %258 = vector.shape_cast %257 : vector<1x1x8x4xf32> to vector<8x4xf32>
    %259 = arith.truncf %258 : vector<8x4xf32> to vector<8x4xbf16>
    %cst_252 = arith.constant dense<0.000000e+00> : vector<8x8xf32>
    %260 = tpu.matmul %259, %12, %cst_252 {dimension_numbers = #tpu.dot_dimension_numbers<[1], [0], [0], [1], [0, 0, 1, 1], [], []>} : vector<8x4xbf16>, vector<4x8xbf16>, vector<8x8xf32> -> vector<8x8xf32>
    %261 = arith.addf %256, %260 : vector<8x8xf32>
    %c0_253 = arith.constant 0 : index
    %c10 = arith.constant 10 : index
    %c0_254 = arith.constant 0 : index
    %c0_255 = arith.constant 0 : index
    %262 = vector.load %arg1[%c0_253, %c10, %c0_254, %c0_255] : memref<1x18x9x4xf32, #tpu.memory_space<vmem>>, vector<1x1x8x4xf32>
    %263 = vector.shape_cast %262 : vector<1x1x8x4xf32> to vector<8x4xf32>
    %264 = arith.truncf %263 : vector<8x4xf32> to vector<8x4xbf16>
    %cst_256 = arith.constant dense<0.000000e+00> : vector<8x8xf32>
    %265 = tpu.matmul %264, %14, %cst_256 {dimension_numbers = #tpu.dot_dimension_numbers<[1], [0], [0], [1], [0, 0, 1, 1], [], []>} : vector<8x4xbf16>, vector<4x8xbf16>, vector<8x8xf32> -> vector<8x8xf32>
    %266 = arith.addf %261, %265 : vector<8x8xf32>
    %c0_257 = arith.constant 0 : index
    %c10_258 = arith.constant 10 : index
    %c0_259 = arith.constant 0 : index
    %c0_260 = arith.constant 0 : index
    %267 = vector.load %arg2[%c0_257, %c10_258, %c0_259, %c0_260] : memref<1x18x9x4xf32, #tpu.memory_space<vmem>>, vector<1x1x8x4xf32>
    %268 = vector.shape_cast %267 : vector<1x1x8x4xf32> to vector<8x4xf32>
    %269 = arith.truncf %268 : vector<8x4xf32> to vector<8x4xbf16>
    %cst_261 = arith.constant dense<0.000000e+00> : vector<8x8xf32>
    %270 = tpu.matmul %269, %16, %cst_261 {dimension_numbers = #tpu.dot_dimension_numbers<[1], [0], [0], [1], [0, 0, 1, 1], [], []>} : vector<8x4xbf16>, vector<4x8xbf16>, vector<8x8xf32> -> vector<8x8xf32>
    %271 = arith.addf %266, %270 : vector<8x8xf32>
    %c0_262 = arith.constant 0 : index
    %c10_263 = arith.constant 10 : index
    %c1_264 = arith.constant 1 : index
    %c0_265 = arith.constant 0 : index
    %272 = vector.load %arg1[%c0_262, %c10_263, %c1_264, %c0_265] : memref<1x18x9x4xf32, #tpu.memory_space<vmem>>, vector<1x1x8x4xf32>
    %273 = vector.shape_cast %272 : vector<1x1x8x4xf32> to vector<8x4xf32>
    %274 = arith.truncf %273 : vector<8x4xf32> to vector<8x4xbf16>
    %cst_266 = arith.constant dense<0.000000e+00> : vector<8x8xf32>
    %275 = tpu.matmul %274, %18, %cst_266 {dimension_numbers = #tpu.dot_dimension_numbers<[1], [0], [0], [1], [0, 0, 1, 1], [], []>} : vector<8x4xbf16>, vector<4x8xbf16>, vector<8x8xf32> -> vector<8x8xf32>
    %276 = arith.addf %271, %275 : vector<8x8xf32>
    %277 = vector.broadcast %0 : vector<1x8xf32> to vector<8x8xf32>
    %278 = arith.addf %276, %277 : vector<8x8xf32>
    %cst_267 = arith.constant 0.000000e+00 : f32
    %279 = vector.broadcast %cst_267 : f32 to vector<8x8xf32>
    %280 = arith.maximumf %278, %279 : vector<8x8xf32>
    %c0_268 = arith.constant 0 : index
    %c4_269 = arith.constant 4 : index
    %c0_270 = arith.constant 0 : index
    %c0_271 = arith.constant 0 : index
    %281 = vector.load %arg5[%c0_268, %c4_269, %c0_270, %c0_271] : memref<1x8x8x8xf32, #tpu.memory_space<vmem>>, vector<1x1x8x8xf32>
    %282 = vector.shape_cast %281 : vector<1x1x8x8xf32> to vector<8x8xf32>
    %283 = vector.shape_cast %280 : vector<8x8xf32> to vector<1x1x8x8xf32>
    tpu.vector_store %arg5[%c0_268, %c4_269, %c0_270, %c0_271], %283 {strides = array<i32>} : memref<1x8x8x8xf32, #tpu.memory_space<vmem>>, vector<1x1x8x8xf32>,
    %cst_272 = arith.constant 0.000000e+00 : f32
    %284 = vector.broadcast %cst_272 : f32 to vector<8x8xf32>
    %c0_273 = arith.constant 0 : index
    %c10_274 = arith.constant 10 : index
    %c0_275 = arith.constant 0 : index
    %c0_276 = arith.constant 0 : index
    %285 = vector.load %arg1[%c0_273, %c10_274, %c0_275, %c0_276] : memref<1x18x9x4xf32, #tpu.memory_space<vmem>>, vector<1x1x8x4xf32>
    %286 = vector.shape_cast %285 : vector<1x1x8x4xf32> to vector<8x4xf32>
    %287 = arith.truncf %286 : vector<8x4xf32> to vector<8x4xbf16>
    %cst_277 = arith.constant dense<0.000000e+00> : vector<8x8xf32>
    %288 = tpu.matmul %287, %2, %cst_277 {dimension_numbers = #tpu.dot_dimension_numbers<[1], [0], [0], [1], [0, 0, 1, 1], [], []>} : vector<8x4xbf16>, vector<4x8xbf16>, vector<8x8xf32> -> vector<8x8xf32>
    %289 = arith.addf %284, %288 : vector<8x8xf32>
    %c0_278 = arith.constant 0 : index
    %c10_279 = arith.constant 10 : index
    %c0_280 = arith.constant 0 : index
    %c0_281 = arith.constant 0 : index
    %290 = vector.load %arg2[%c0_278, %c10_279, %c0_280, %c0_281] : memref<1x18x9x4xf32, #tpu.memory_space<vmem>>, vector<1x1x8x4xf32>
    %291 = vector.shape_cast %290 : vector<1x1x8x4xf32> to vector<8x4xf32>
    %292 = arith.truncf %291 : vector<8x4xf32> to vector<8x4xbf16>
    %cst_282 = arith.constant dense<0.000000e+00> : vector<8x8xf32>
    %293 = tpu.matmul %292, %4, %cst_282 {dimension_numbers = #tpu.dot_dimension_numbers<[1], [0], [0], [1], [0, 0, 1, 1], [], []>} : vector<8x4xbf16>, vector<4x8xbf16>, vector<8x8xf32> -> vector<8x8xf32>
    %294 = arith.addf %289, %293 : vector<8x8xf32>
    %c0_283 = arith.constant 0 : index
    %c10_284 = arith.constant 10 : index
    %c1_285 = arith.constant 1 : index
    %c0_286 = arith.constant 0 : index
    %295 = vector.load %arg1[%c0_283, %c10_284, %c1_285, %c0_286] : memref<1x18x9x4xf32, #tpu.memory_space<vmem>>, vector<1x1x8x4xf32>
    %296 = vector.shape_cast %295 : vector<1x1x8x4xf32> to vector<8x4xf32>
    %297 = arith.truncf %296 : vector<8x4xf32> to vector<8x4xbf16>
    %cst_287 = arith.constant dense<0.000000e+00> : vector<8x8xf32>
    %298 = tpu.matmul %297, %6, %cst_287 {dimension_numbers = #tpu.dot_dimension_numbers<[1], [0], [0], [1], [0, 0, 1, 1], [], []>} : vector<8x4xbf16>, vector<4x8xbf16>, vector<8x8xf32> -> vector<8x8xf32>
    %299 = arith.addf %294, %298 : vector<8x8xf32>
    %c0_288 = arith.constant 0 : index
    %c11 = arith.constant 11 : index
    %c0_289 = arith.constant 0 : index
    %c0_290 = arith.constant 0 : index
    %300 = vector.load %arg1[%c0_288, %c11, %c0_289, %c0_290] : memref<1x18x9x4xf32, #tpu.memory_space<vmem>>, vector<1x1x8x4xf32>
    %301 = vector.shape_cast %300 : vector<1x1x8x4xf32> to vector<8x4xf32>
    %302 = arith.truncf %301 : vector<8x4xf32> to vector<8x4xbf16>
    %cst_291 = arith.constant dense<0.000000e+00> : vector<8x8xf32>
    %303 = tpu.matmul %302, %8, %cst_291 {dimension_numbers = #tpu.dot_dimension_numbers<[1], [0], [0], [1], [0, 0, 1, 1], [], []>} : vector<8x4xbf16>, vector<4x8xbf16>, vector<8x8xf32> -> vector<8x8xf32>
    %304 = arith.addf %299, %303 : vector<8x8xf32>
    %c0_292 = arith.constant 0 : index
    %c11_293 = arith.constant 11 : index
    %c0_294 = arith.constant 0 : index
    %c0_295 = arith.constant 0 : index
    %305 = vector.load %arg2[%c0_292, %c11_293, %c0_294, %c0_295] : memref<1x18x9x4xf32, #tpu.memory_space<vmem>>, vector<1x1x8x4xf32>
    %306 = vector.shape_cast %305 : vector<1x1x8x4xf32> to vector<8x4xf32>
    %307 = arith.truncf %306 : vector<8x4xf32> to vector<8x4xbf16>
    %cst_296 = arith.constant dense<0.000000e+00> : vector<8x8xf32>
    %308 = tpu.matmul %307, %10, %cst_296 {dimension_numbers = #tpu.dot_dimension_numbers<[1], [0], [0], [1], [0, 0, 1, 1], [], []>} : vector<8x4xbf16>, vector<4x8xbf16>, vector<8x8xf32> -> vector<8x8xf32>
    %309 = arith.addf %304, %308 : vector<8x8xf32>
    %c0_297 = arith.constant 0 : index
    %c11_298 = arith.constant 11 : index
    %c1_299 = arith.constant 1 : index
    %c0_300 = arith.constant 0 : index
    %310 = vector.load %arg1[%c0_297, %c11_298, %c1_299, %c0_300] : memref<1x18x9x4xf32, #tpu.memory_space<vmem>>, vector<1x1x8x4xf32>
    %311 = vector.shape_cast %310 : vector<1x1x8x4xf32> to vector<8x4xf32>
    %312 = arith.truncf %311 : vector<8x4xf32> to vector<8x4xbf16>
    %cst_301 = arith.constant dense<0.000000e+00> : vector<8x8xf32>
    %313 = tpu.matmul %312, %12, %cst_301 {dimension_numbers = #tpu.dot_dimension_numbers<[1], [0], [0], [1], [0, 0, 1, 1], [], []>} : vector<8x4xbf16>, vector<4x8xbf16>, vector<8x8xf32> -> vector<8x8xf32>
    %314 = arith.addf %309, %313 : vector<8x8xf32>
    %c0_302 = arith.constant 0 : index
    %c12 = arith.constant 12 : index
    %c0_303 = arith.constant 0 : index
    %c0_304 = arith.constant 0 : index
    %315 = vector.load %arg1[%c0_302, %c12, %c0_303, %c0_304] : memref<1x18x9x4xf32, #tpu.memory_space<vmem>>, vector<1x1x8x4xf32>
    %316 = vector.shape_cast %315 : vector<1x1x8x4xf32> to vector<8x4xf32>
    %317 = arith.truncf %316 : vector<8x4xf32> to vector<8x4xbf16>
    %cst_305 = arith.constant dense<0.000000e+00> : vector<8x8xf32>
    %318 = tpu.matmul %317, %14, %cst_305 {dimension_numbers = #tpu.dot_dimension_numbers<[1], [0], [0], [1], [0, 0, 1, 1], [], []>} : vector<8x4xbf16>, vector<4x8xbf16>, vector<8x8xf32> -> vector<8x8xf32>
    %319 = arith.addf %314, %318 : vector<8x8xf32>
    %c0_306 = arith.constant 0 : index
    %c12_307 = arith.constant 12 : index
    %c0_308 = arith.constant 0 : index
    %c0_309 = arith.constant 0 : index
    %320 = vector.load %arg2[%c0_306, %c12_307, %c0_308, %c0_309] : memref<1x18x9x4xf32, #tpu.memory_space<vmem>>, vector<1x1x8x4xf32>
    %321 = vector.shape_cast %320 : vector<1x1x8x4xf32> to vector<8x4xf32>
    %322 = arith.truncf %321 : vector<8x4xf32> to vector<8x4xbf16>
    %cst_310 = arith.constant dense<0.000000e+00> : vector<8x8xf32>
    %323 = tpu.matmul %322, %16, %cst_310 {dimension_numbers = #tpu.dot_dimension_numbers<[1], [0], [0], [1], [0, 0, 1, 1], [], []>} : vector<8x4xbf16>, vector<4x8xbf16>, vector<8x8xf32> -> vector<8x8xf32>
    %324 = arith.addf %319, %323 : vector<8x8xf32>
    %c0_311 = arith.constant 0 : index
    %c12_312 = arith.constant 12 : index
    %c1_313 = arith.constant 1 : index
    %c0_314 = arith.constant 0 : index
    %325 = vector.load %arg1[%c0_311, %c12_312, %c1_313, %c0_314] : memref<1x18x9x4xf32, #tpu.memory_space<vmem>>, vector<1x1x8x4xf32>
    %326 = vector.shape_cast %325 : vector<1x1x8x4xf32> to vector<8x4xf32>
    %327 = arith.truncf %326 : vector<8x4xf32> to vector<8x4xbf16>
    %cst_315 = arith.constant dense<0.000000e+00> : vector<8x8xf32>
    %328 = tpu.matmul %327, %18, %cst_315 {dimension_numbers = #tpu.dot_dimension_numbers<[1], [0], [0], [1], [0, 0, 1, 1], [], []>} : vector<8x4xbf16>, vector<4x8xbf16>, vector<8x8xf32> -> vector<8x8xf32>
    %329 = arith.addf %324, %328 : vector<8x8xf32>
    %330 = vector.broadcast %0 : vector<1x8xf32> to vector<8x8xf32>
    %331 = arith.addf %329, %330 : vector<8x8xf32>
    %cst_316 = arith.constant 0.000000e+00 : f32
    %332 = vector.broadcast %cst_316 : f32 to vector<8x8xf32>
    %333 = arith.maximumf %331, %332 : vector<8x8xf32>
    %c0_317 = arith.constant 0 : index
    %c5_318 = arith.constant 5 : index
    %c0_319 = arith.constant 0 : index
    %c0_320 = arith.constant 0 : index
    %334 = vector.load %arg5[%c0_317, %c5_318, %c0_319, %c0_320] : memref<1x8x8x8xf32, #tpu.memory_space<vmem>>, vector<1x1x8x8xf32>
    %335 = vector.shape_cast %334 : vector<1x1x8x8xf32> to vector<8x8xf32>
    %336 = vector.shape_cast %333 : vector<8x8xf32> to vector<1x1x8x8xf32>
    tpu.vector_store %arg5[%c0_317, %c5_318, %c0_319, %c0_320], %336 {strides = array<i32>} : memref<1x8x8x8xf32, #tpu.memory_space<vmem>>, vector<1x1x8x8xf32>,
    %cst_321 = arith.constant 0.000000e+00 : f32
    %337 = vector.broadcast %cst_321 : f32 to vector<8x8xf32>
    %c0_322 = arith.constant 0 : index
    %c12_323 = arith.constant 12 : index
    %c0_324 = arith.constant 0 : index
    %c0_325 = arith.constant 0 : index
    %338 = vector.load %arg1[%c0_322, %c12_323, %c0_324, %c0_325] : memref<1x18x9x4xf32, #tpu.memory_space<vmem>>, vector<1x1x8x4xf32>
    %339 = vector.shape_cast %338 : vector<1x1x8x4xf32> to vector<8x4xf32>
    %340 = arith.truncf %339 : vector<8x4xf32> to vector<8x4xbf16>
    %cst_326 = arith.constant dense<0.000000e+00> : vector<8x8xf32>
    %341 = tpu.matmul %340, %2, %cst_326 {dimension_numbers = #tpu.dot_dimension_numbers<[1], [0], [0], [1], [0, 0, 1, 1], [], []>} : vector<8x4xbf16>, vector<4x8xbf16>, vector<8x8xf32> -> vector<8x8xf32>
    %342 = arith.addf %337, %341 : vector<8x8xf32>
    %c0_327 = arith.constant 0 : index
    %c12_328 = arith.constant 12 : index
    %c0_329 = arith.constant 0 : index
    %c0_330 = arith.constant 0 : index
    %343 = vector.load %arg2[%c0_327, %c12_328, %c0_329, %c0_330] : memref<1x18x9x4xf32, #tpu.memory_space<vmem>>, vector<1x1x8x4xf32>
    %344 = vector.shape_cast %343 : vector<1x1x8x4xf32> to vector<8x4xf32>
    %345 = arith.truncf %344 : vector<8x4xf32> to vector<8x4xbf16>
    %cst_331 = arith.constant dense<0.000000e+00> : vector<8x8xf32>
    %346 = tpu.matmul %345, %4, %cst_331 {dimension_numbers = #tpu.dot_dimension_numbers<[1], [0], [0], [1], [0, 0, 1, 1], [], []>} : vector<8x4xbf16>, vector<4x8xbf16>, vector<8x8xf32> -> vector<8x8xf32>
    %347 = arith.addf %342, %346 : vector<8x8xf32>
    %c0_332 = arith.constant 0 : index
    %c12_333 = arith.constant 12 : index
    %c1_334 = arith.constant 1 : index
    %c0_335 = arith.constant 0 : index
    %348 = vector.load %arg1[%c0_332, %c12_333, %c1_334, %c0_335] : memref<1x18x9x4xf32, #tpu.memory_space<vmem>>, vector<1x1x8x4xf32>
    %349 = vector.shape_cast %348 : vector<1x1x8x4xf32> to vector<8x4xf32>
    %350 = arith.truncf %349 : vector<8x4xf32> to vector<8x4xbf16>
    %cst_336 = arith.constant dense<0.000000e+00> : vector<8x8xf32>
    %351 = tpu.matmul %350, %6, %cst_336 {dimension_numbers = #tpu.dot_dimension_numbers<[1], [0], [0], [1], [0, 0, 1, 1], [], []>} : vector<8x4xbf16>, vector<4x8xbf16>, vector<8x8xf32> -> vector<8x8xf32>
    %352 = arith.addf %347, %351 : vector<8x8xf32>
    %c0_337 = arith.constant 0 : index
    %c13 = arith.constant 13 : index
    %c0_338 = arith.constant 0 : index
    %c0_339 = arith.constant 0 : index
    %353 = vector.load %arg1[%c0_337, %c13, %c0_338, %c0_339] : memref<1x18x9x4xf32, #tpu.memory_space<vmem>>, vector<1x1x8x4xf32>
    %354 = vector.shape_cast %353 : vector<1x1x8x4xf32> to vector<8x4xf32>
    %355 = arith.truncf %354 : vector<8x4xf32> to vector<8x4xbf16>
    %cst_340 = arith.constant dense<0.000000e+00> : vector<8x8xf32>
    %356 = tpu.matmul %355, %8, %cst_340 {dimension_numbers = #tpu.dot_dimension_numbers<[1], [0], [0], [1], [0, 0, 1, 1], [], []>} : vector<8x4xbf16>, vector<4x8xbf16>, vector<8x8xf32> -> vector<8x8xf32>
    %357 = arith.addf %352, %356 : vector<8x8xf32>
    %c0_341 = arith.constant 0 : index
    %c13_342 = arith.constant 13 : index
    %c0_343 = arith.constant 0 : index
    %c0_344 = arith.constant 0 : index
    %358 = vector.load %arg2[%c0_341, %c13_342, %c0_343, %c0_344] : memref<1x18x9x4xf32, #tpu.memory_space<vmem>>, vector<1x1x8x4xf32>
    %359 = vector.shape_cast %358 : vector<1x1x8x4xf32> to vector<8x4xf32>
    %360 = arith.truncf %359 : vector<8x4xf32> to vector<8x4xbf16>
    %cst_345 = arith.constant dense<0.000000e+00> : vector<8x8xf32>
    %361 = tpu.matmul %360, %10, %cst_345 {dimension_numbers = #tpu.dot_dimension_numbers<[1], [0], [0], [1], [0, 0, 1, 1], [], []>} : vector<8x4xbf16>, vector<4x8xbf16>, vector<8x8xf32> -> vector<8x8xf32>
    %362 = arith.addf %357, %361 : vector<8x8xf32>
    %c0_346 = arith.constant 0 : index
    %c13_347 = arith.constant 13 : index
    %c1_348 = arith.constant 1 : index
    %c0_349 = arith.constant 0 : index
    %363 = vector.load %arg1[%c0_346, %c13_347, %c1_348, %c0_349] : memref<1x18x9x4xf32, #tpu.memory_space<vmem>>, vector<1x1x8x4xf32>
    %364 = vector.shape_cast %363 : vector<1x1x8x4xf32> to vector<8x4xf32>
    %365 = arith.truncf %364 : vector<8x4xf32> to vector<8x4xbf16>
    %cst_350 = arith.constant dense<0.000000e+00> : vector<8x8xf32>
    %366 = tpu.matmul %365, %12, %cst_350 {dimension_numbers = #tpu.dot_dimension_numbers<[1], [0], [0], [1], [0, 0, 1, 1], [], []>} : vector<8x4xbf16>, vector<4x8xbf16>, vector<8x8xf32> -> vector<8x8xf32>
    %367 = arith.addf %362, %366 : vector<8x8xf32>
    %c0_351 = arith.constant 0 : index
    %c14 = arith.constant 14 : index
    %c0_352 = arith.constant 0 : index
    %c0_353 = arith.constant 0 : index
    %368 = vector.load %arg1[%c0_351, %c14, %c0_352, %c0_353] : memref<1x18x9x4xf32, #tpu.memory_space<vmem>>, vector<1x1x8x4xf32>
    %369 = vector.shape_cast %368 : vector<1x1x8x4xf32> to vector<8x4xf32>
    %370 = arith.truncf %369 : vector<8x4xf32> to vector<8x4xbf16>
    %cst_354 = arith.constant dense<0.000000e+00> : vector<8x8xf32>
    %371 = tpu.matmul %370, %14, %cst_354 {dimension_numbers = #tpu.dot_dimension_numbers<[1], [0], [0], [1], [0, 0, 1, 1], [], []>} : vector<8x4xbf16>, vector<4x8xbf16>, vector<8x8xf32> -> vector<8x8xf32>
    %372 = arith.addf %367, %371 : vector<8x8xf32>
    %c0_355 = arith.constant 0 : index
    %c14_356 = arith.constant 14 : index
    %c0_357 = arith.constant 0 : index
    %c0_358 = arith.constant 0 : index
    %373 = vector.load %arg2[%c0_355, %c14_356, %c0_357, %c0_358] : memref<1x18x9x4xf32, #tpu.memory_space<vmem>>, vector<1x1x8x4xf32>
    %374 = vector.shape_cast %373 : vector<1x1x8x4xf32> to vector<8x4xf32>
    %375 = arith.truncf %374 : vector<8x4xf32> to vector<8x4xbf16>
    %cst_359 = arith.constant dense<0.000000e+00> : vector<8x8xf32>
    %376 = tpu.matmul %375, %16, %cst_359 {dimension_numbers = #tpu.dot_dimension_numbers<[1], [0], [0], [1], [0, 0, 1, 1], [], []>} : vector<8x4xbf16>, vector<4x8xbf16>, vector<8x8xf32> -> vector<8x8xf32>
    %377 = arith.addf %372, %376 : vector<8x8xf32>
    %c0_360 = arith.constant 0 : index
    %c14_361 = arith.constant 14 : index
    %c1_362 = arith.constant 1 : index
    %c0_363 = arith.constant 0 : index
    %378 = vector.load %arg1[%c0_360, %c14_361, %c1_362, %c0_363] : memref<1x18x9x4xf32, #tpu.memory_space<vmem>>, vector<1x1x8x4xf32>
    %379 = vector.shape_cast %378 : vector<1x1x8x4xf32> to vector<8x4xf32>
    %380 = arith.truncf %379 : vector<8x4xf32> to vector<8x4xbf16>
    %cst_364 = arith.constant dense<0.000000e+00> : vector<8x8xf32>
    %381 = tpu.matmul %380, %18, %cst_364 {dimension_numbers = #tpu.dot_dimension_numbers<[1], [0], [0], [1], [0, 0, 1, 1], [], []>} : vector<8x4xbf16>, vector<4x8xbf16>, vector<8x8xf32> -> vector<8x8xf32>
    %382 = arith.addf %377, %381 : vector<8x8xf32>
    %383 = vector.broadcast %0 : vector<1x8xf32> to vector<8x8xf32>
    %384 = arith.addf %382, %383 : vector<8x8xf32>
    %cst_365 = arith.constant 0.000000e+00 : f32
    %385 = vector.broadcast %cst_365 : f32 to vector<8x8xf32>
    %386 = arith.maximumf %384, %385 : vector<8x8xf32>
    %c0_366 = arith.constant 0 : index
    %c6_367 = arith.constant 6 : index
    %c0_368 = arith.constant 0 : index
    %c0_369 = arith.constant 0 : index
    %387 = vector.load %arg5[%c0_366, %c6_367, %c0_368, %c0_369] : memref<1x8x8x8xf32, #tpu.memory_space<vmem>>, vector<1x1x8x8xf32>
    %388 = vector.shape_cast %387 : vector<1x1x8x8xf32> to vector<8x8xf32>
    %389 = vector.shape_cast %386 : vector<8x8xf32> to vector<1x1x8x8xf32>
    tpu.vector_store %arg5[%c0_366, %c6_367, %c0_368, %c0_369], %389 {strides = array<i32>} : memref<1x8x8x8xf32, #tpu.memory_space<vmem>>, vector<1x1x8x8xf32>,
    %cst_370 = arith.constant 0.000000e+00 : f32
    %390 = vector.broadcast %cst_370 : f32 to vector<8x8xf32>
    %c0_371 = arith.constant 0 : index
    %c14_372 = arith.constant 14 : index
    %c0_373 = arith.constant 0 : index
    %c0_374 = arith.constant 0 : index
    %391 = vector.load %arg1[%c0_371, %c14_372, %c0_373, %c0_374] : memref<1x18x9x4xf32, #tpu.memory_space<vmem>>, vector<1x1x8x4xf32>
    %392 = vector.shape_cast %391 : vector<1x1x8x4xf32> to vector<8x4xf32>
    %393 = arith.truncf %392 : vector<8x4xf32> to vector<8x4xbf16>
    %cst_375 = arith.constant dense<0.000000e+00> : vector<8x8xf32>
    %394 = tpu.matmul %393, %2, %cst_375 {dimension_numbers = #tpu.dot_dimension_numbers<[1], [0], [0], [1], [0, 0, 1, 1], [], []>} : vector<8x4xbf16>, vector<4x8xbf16>, vector<8x8xf32> -> vector<8x8xf32>
    %395 = arith.addf %390, %394 : vector<8x8xf32>
    %c0_376 = arith.constant 0 : index
    %c14_377 = arith.constant 14 : index
    %c0_378 = arith.constant 0 : index
    %c0_379 = arith.constant 0 : index
    %396 = vector.load %arg2[%c0_376, %c14_377, %c0_378, %c0_379] : memref<1x18x9x4xf32, #tpu.memory_space<vmem>>, vector<1x1x8x4xf32>
    %397 = vector.shape_cast %396 : vector<1x1x8x4xf32> to vector<8x4xf32>
    %398 = arith.truncf %397 : vector<8x4xf32> to vector<8x4xbf16>
    %cst_380 = arith.constant dense<0.000000e+00> : vector<8x8xf32>
    %399 = tpu.matmul %398, %4, %cst_380 {dimension_numbers = #tpu.dot_dimension_numbers<[1], [0], [0], [1], [0, 0, 1, 1], [], []>} : vector<8x4xbf16>, vector<4x8xbf16>, vector<8x8xf32> -> vector<8x8xf32>
    %400 = arith.addf %395, %399 : vector<8x8xf32>
    %c0_381 = arith.constant 0 : index
    %c14_382 = arith.constant 14 : index
    %c1_383 = arith.constant 1 : index
    %c0_384 = arith.constant 0 : index
    %401 = vector.load %arg1[%c0_381, %c14_382, %c1_383, %c0_384] : memref<1x18x9x4xf32, #tpu.memory_space<vmem>>, vector<1x1x8x4xf32>
    %402 = vector.shape_cast %401 : vector<1x1x8x4xf32> to vector<8x4xf32>
    %403 = arith.truncf %402 : vector<8x4xf32> to vector<8x4xbf16>
    %cst_385 = arith.constant dense<0.000000e+00> : vector<8x8xf32>
    %404 = tpu.matmul %403, %6, %cst_385 {dimension_numbers = #tpu.dot_dimension_numbers<[1], [0], [0], [1], [0, 0, 1, 1], [], []>} : vector<8x4xbf16>, vector<4x8xbf16>, vector<8x8xf32> -> vector<8x8xf32>
    %405 = arith.addf %400, %404 : vector<8x8xf32>
    %c0_386 = arith.constant 0 : index
    %c15 = arith.constant 15 : index
    %c0_387 = arith.constant 0 : index
    %c0_388 = arith.constant 0 : index
    %406 = vector.load %arg1[%c0_386, %c15, %c0_387, %c0_388] : memref<1x18x9x4xf32, #tpu.memory_space<vmem>>, vector<1x1x8x4xf32>
    %407 = vector.shape_cast %406 : vector<1x1x8x4xf32> to vector<8x4xf32>
    %408 = arith.truncf %407 : vector<8x4xf32> to vector<8x4xbf16>
    %cst_389 = arith.constant dense<0.000000e+00> : vector<8x8xf32>
    %409 = tpu.matmul %408, %8, %cst_389 {dimension_numbers = #tpu.dot_dimension_numbers<[1], [0], [0], [1], [0, 0, 1, 1], [], []>} : vector<8x4xbf16>, vector<4x8xbf16>, vector<8x8xf32> -> vector<8x8xf32>
    %410 = arith.addf %405, %409 : vector<8x8xf32>
    %c0_390 = arith.constant 0 : index
    %c15_391 = arith.constant 15 : index
    %c0_392 = arith.constant 0 : index
    %c0_393 = arith.constant 0 : index
    %411 = vector.load %arg2[%c0_390, %c15_391, %c0_392, %c0_393] : memref<1x18x9x4xf32, #tpu.memory_space<vmem>>, vector<1x1x8x4xf32>
    %412 = vector.shape_cast %411 : vector<1x1x8x4xf32> to vector<8x4xf32>
    %413 = arith.truncf %412 : vector<8x4xf32> to vector<8x4xbf16>
    %cst_394 = arith.constant dense<0.000000e+00> : vector<8x8xf32>
    %414 = tpu.matmul %413, %10, %cst_394 {dimension_numbers = #tpu.dot_dimension_numbers<[1], [0], [0], [1], [0, 0, 1, 1], [], []>} : vector<8x4xbf16>, vector<4x8xbf16>, vector<8x8xf32> -> vector<8x8xf32>
    %415 = arith.addf %410, %414 : vector<8x8xf32>
    %c0_395 = arith.constant 0 : index
    %c15_396 = arith.constant 15 : index
    %c1_397 = arith.constant 1 : index
    %c0_398 = arith.constant 0 : index
    %416 = vector.load %arg1[%c0_395, %c15_396, %c1_397, %c0_398] : memref<1x18x9x4xf32, #tpu.memory_space<vmem>>, vector<1x1x8x4xf32>
    %417 = vector.shape_cast %416 : vector<1x1x8x4xf32> to vector<8x4xf32>
    %418 = arith.truncf %417 : vector<8x4xf32> to vector<8x4xbf16>
    %cst_399 = arith.constant dense<0.000000e+00> : vector<8x8xf32>
    %419 = tpu.matmul %418, %12, %cst_399 {dimension_numbers = #tpu.dot_dimension_numbers<[1], [0], [0], [1], [0, 0, 1, 1], [], []>} : vector<8x4xbf16>, vector<4x8xbf16>, vector<8x8xf32> -> vector<8x8xf32>
    %420 = arith.addf %415, %419 : vector<8x8xf32>
    %c0_400 = arith.constant 0 : index
    %c16 = arith.constant 16 : index
    %c0_401 = arith.constant 0 : index
    %c0_402 = arith.constant 0 : index
    %421 = vector.load %arg1[%c0_400, %c16, %c0_401, %c0_402] : memref<1x18x9x4xf32, #tpu.memory_space<vmem>>, vector<1x1x8x4xf32>
    %422 = vector.shape_cast %421 : vector<1x1x8x4xf32> to vector<8x4xf32>
    %423 = arith.truncf %422 : vector<8x4xf32> to vector<8x4xbf16>
    %cst_403 = arith.constant dense<0.000000e+00> : vector<8x8xf32>
    %424 = tpu.matmul %423, %14, %cst_403 {dimension_numbers = #tpu.dot_dimension_numbers<[1], [0], [0], [1], [0, 0, 1, 1], [], []>} : vector<8x4xbf16>, vector<4x8xbf16>, vector<8x8xf32> -> vector<8x8xf32>
    %425 = arith.addf %420, %424 : vector<8x8xf32>
    %c0_404 = arith.constant 0 : index
    %c16_405 = arith.constant 16 : index
    %c0_406 = arith.constant 0 : index
    %c0_407 = arith.constant 0 : index
    %426 = vector.load %arg2[%c0_404, %c16_405, %c0_406, %c0_407] : memref<1x18x9x4xf32, #tpu.memory_space<vmem>>, vector<1x1x8x4xf32>
    %427 = vector.shape_cast %426 : vector<1x1x8x4xf32> to vector<8x4xf32>
    %428 = arith.truncf %427 : vector<8x4xf32> to vector<8x4xbf16>
    %cst_408 = arith.constant dense<0.000000e+00> : vector<8x8xf32>
    %429 = tpu.matmul %428, %16, %cst_408 {dimension_numbers = #tpu.dot_dimension_numbers<[1], [0], [0], [1], [0, 0, 1, 1], [], []>} : vector<8x4xbf16>, vector<4x8xbf16>, vector<8x8xf32> -> vector<8x8xf32>
    %430 = arith.addf %425, %429 : vector<8x8xf32>
    %c0_409 = arith.constant 0 : index
    %c16_410 = arith.constant 16 : index
    %c1_411 = arith.constant 1 : index
    %c0_412 = arith.constant 0 : index
    %431 = vector.load %arg1[%c0_409, %c16_410, %c1_411, %c0_412] : memref<1x18x9x4xf32, #tpu.memory_space<vmem>>, vector<1x1x8x4xf32>
    %432 = vector.shape_cast %431 : vector<1x1x8x4xf32> to vector<8x4xf32>
    %433 = arith.truncf %432 : vector<8x4xf32> to vector<8x4xbf16>
    %cst_413 = arith.constant dense<0.000000e+00> : vector<8x8xf32>
    %434 = tpu.matmul %433, %18, %cst_413 {dimension_numbers = #tpu.dot_dimension_numbers<[1], [0], [0], [1], [0, 0, 1, 1], [], []>} : vector<8x4xbf16>, vector<4x8xbf16>, vector<8x8xf32> -> vector<8x8xf32>
    %435 = arith.addf %430, %434 : vector<8x8xf32>
    %436 = vector.broadcast %0 : vector<1x8xf32> to vector<8x8xf32>
    %437 = arith.addf %435, %436 : vector<8x8xf32>
    %cst_414 = arith.constant 0.000000e+00 : f32
    %438 = vector.broadcast %cst_414 : f32 to vector<8x8xf32>
    %439 = arith.maximumf %437, %438 : vector<8x8xf32>
    %c0_415 = arith.constant 0 : index
    %c7_416 = arith.constant 7 : index
    %c0_417 = arith.constant 0 : index
    %c0_418 = arith.constant 0 : index
    %440 = vector.load %arg5[%c0_415, %c7_416, %c0_417, %c0_418] : memref<1x8x8x8xf32, #tpu.memory_space<vmem>>, vector<1x1x8x8xf32>
    %441 = vector.shape_cast %440 : vector<1x1x8x8xf32> to vector<8x8xf32>
    %442 = vector.shape_cast %439 : vector<8x8xf32> to vector<1x1x8x8xf32>
    tpu.vector_store %arg5[%c0_415, %c7_416, %c0_417, %c0_418], %442 {strides = array<i32>} : memref<1x8x8x8xf32, #tpu.memory_space<vmem>>, vector<1x1x8x8xf32>,
    return
  }
  func.func @transform_0(%arg0: i32) -> (i32, i32, i32, i32) {
    %c0_i32 = arith.constant 0 : i32
    %c0_i32_0 = arith.constant 0 : i32
    %c0_i32_1 = arith.constant 0 : i32
    %c0_i32_2 = arith.constant 0 : i32
    return %arg0, %c0_i32, %c0_i32_0, %c0_i32_1 : i32, i32, i32, i32
  }
  func.func @transform_1(%arg0: i32) -> (i32, i32, i32, i32) {
    %c0_i32 = arith.constant 0 : i32
    %c0_i32_0 = arith.constant 0 : i32
    %c0_i32_1 = arith.constant 0 : i32
    %c0_i32_2 = arith.constant 0 : i32
    return %arg0, %c0_i32, %c0_i32_0, %c0_i32_1 : i32, i32, i32, i32
  }
  func.func @transform_2(%arg0: i32) -> (i32, i32, i32) {
    %c0_i32 = arith.constant 0 : i32
    %c0_i32_0 = arith.constant 0 : i32
    %c0_i32_1 = arith.constant 0 : i32
    %c0_i32_2 = arith.constant 0 : i32
    return %c0_i32, %c0_i32_0, %c0_i32_1 : i32, i32, i32
  }
  func.func @transform_3(%arg0: i32) -> (i32, i32) {
    %c0_i32 = arith.constant 0 : i32
    %c0_i32_0 = arith.constant 0 : i32
    %c0_i32_1 = arith.constant 0 : i32
    return %c0_i32, %c0_i32_0 : i32, i32
  }
  func.func @transform_4(%arg0: i32) -> (i32, i32, i32, i32) {
    %c0_i32 = arith.constant 0 : i32
    %c0_i32_0 = arith.constant 0 : i32
    %c0_i32_1 = arith.constant 0 : i32
    %c0_i32_2 = arith.constant 0 : i32
    return %arg0, %c0_i32, %c0_i32_0, %c0_i32_1 : i32, i32, i32, i32
  }
}

module attributes {stable_mosaic.version = 11 : i64} {
  func.func @_conv3x3_s2_relu_kernel(%arg0: i32, %arg1: memref<1x10x5x8xf32, #tpu.memory_space<vmem>>, %arg2: memref<1x10x5x8xf32, #tpu.memory_space<vmem>>, %arg3: memref<9x8x16xbf16, #tpu.memory_space<vmem>>, %arg4: memref<1x16xf32, #tpu.memory_space<vmem>>, %arg5: memref<1x4x4x16xf32, #tpu.memory_space<vmem>>) attributes {dimension_semantics = [#tpu.dimension_semantics<parallel>], iteration_bounds = array<i64: 2>, scalar_prefetch = 0 : i64, scratch_operands = 0 : i64, tpu.core_type = #tpu.core_type<tc>, window_params = [{transform_indices = @transform_0, window_bounds = array<i64: 1, 10, 5, 8>}, {transform_indices = @transform_1, window_bounds = array<i64: 1, 10, 5, 8>}, {pipeline_mode = #tpu.pipeline_mode<synchronous>, transform_indices = @transform_2, window_bounds = array<i64: 9, 8, 16>}, {pipeline_mode = #tpu.pipeline_mode<synchronous>, transform_indices = @transform_3, window_bounds = array<i64: 1, 16>}, {transform_indices = @transform_4, window_bounds = array<i64: 1, 4, 4, 16>}]} {
    %c0 = arith.constant 0 : index
    %c0_0 = arith.constant 0 : index
    %0 = vector.load %arg4[%c0, %c0_0] : memref<1x16xf32, #tpu.memory_space<vmem>>, vector<1x16xf32>
    %c0_1 = arith.constant 0 : index
    %c0_2 = arith.constant 0 : index
    %c0_3 = arith.constant 0 : index
    %1 = vector.load %arg3[%c0_1, %c0_2, %c0_3] : memref<9x8x16xbf16, #tpu.memory_space<vmem>>, vector<1x8x16xbf16>
    %2 = vector.shape_cast %1 : vector<1x8x16xbf16> to vector<8x16xbf16>
    %c1 = arith.constant 1 : index
    %c0_4 = arith.constant 0 : index
    %c0_5 = arith.constant 0 : index
    %3 = vector.load %arg3[%c1, %c0_4, %c0_5] : memref<9x8x16xbf16, #tpu.memory_space<vmem>>, vector<1x8x16xbf16>
    %4 = vector.shape_cast %3 : vector<1x8x16xbf16> to vector<8x16xbf16>
    %c2 = arith.constant 2 : index
    %c0_6 = arith.constant 0 : index
    %c0_7 = arith.constant 0 : index
    %5 = vector.load %arg3[%c2, %c0_6, %c0_7] : memref<9x8x16xbf16, #tpu.memory_space<vmem>>, vector<1x8x16xbf16>
    %6 = vector.shape_cast %5 : vector<1x8x16xbf16> to vector<8x16xbf16>
    %c3 = arith.constant 3 : index
    %c0_8 = arith.constant 0 : index
    %c0_9 = arith.constant 0 : index
    %7 = vector.load %arg3[%c3, %c0_8, %c0_9] : memref<9x8x16xbf16, #tpu.memory_space<vmem>>, vector<1x8x16xbf16>
    %8 = vector.shape_cast %7 : vector<1x8x16xbf16> to vector<8x16xbf16>
    %c4 = arith.constant 4 : index
    %c0_10 = arith.constant 0 : index
    %c0_11 = arith.constant 0 : index
    %9 = vector.load %arg3[%c4, %c0_10, %c0_11] : memref<9x8x16xbf16, #tpu.memory_space<vmem>>, vector<1x8x16xbf16>
    %10 = vector.shape_cast %9 : vector<1x8x16xbf16> to vector<8x16xbf16>
    %c5 = arith.constant 5 : index
    %c0_12 = arith.constant 0 : index
    %c0_13 = arith.constant 0 : index
    %11 = vector.load %arg3[%c5, %c0_12, %c0_13] : memref<9x8x16xbf16, #tpu.memory_space<vmem>>, vector<1x8x16xbf16>
    %12 = vector.shape_cast %11 : vector<1x8x16xbf16> to vector<8x16xbf16>
    %c6 = arith.constant 6 : index
    %c0_14 = arith.constant 0 : index
    %c0_15 = arith.constant 0 : index
    %13 = vector.load %arg3[%c6, %c0_14, %c0_15] : memref<9x8x16xbf16, #tpu.memory_space<vmem>>, vector<1x8x16xbf16>
    %14 = vector.shape_cast %13 : vector<1x8x16xbf16> to vector<8x16xbf16>
    %c7 = arith.constant 7 : index
    %c0_16 = arith.constant 0 : index
    %c0_17 = arith.constant 0 : index
    %15 = vector.load %arg3[%c7, %c0_16, %c0_17] : memref<9x8x16xbf16, #tpu.memory_space<vmem>>, vector<1x8x16xbf16>
    %16 = vector.shape_cast %15 : vector<1x8x16xbf16> to vector<8x16xbf16>
    %c8 = arith.constant 8 : index
    %c0_18 = arith.constant 0 : index
    %c0_19 = arith.constant 0 : index
    %17 = vector.load %arg3[%c8, %c0_18, %c0_19] : memref<9x8x16xbf16, #tpu.memory_space<vmem>>, vector<1x8x16xbf16>
    %18 = vector.shape_cast %17 : vector<1x8x16xbf16> to vector<8x16xbf16>
    %cst = arith.constant 0.000000e+00 : f32
    %19 = vector.broadcast %cst : f32 to vector<4x16xf32>
    %c0_20 = arith.constant 0 : index
    %c0_21 = arith.constant 0 : index
    %c0_22 = arith.constant 0 : index
    %c0_23 = arith.constant 0 : index
    %20 = vector.load %arg1[%c0_20, %c0_21, %c0_22, %c0_23] : memref<1x10x5x8xf32, #tpu.memory_space<vmem>>, vector<1x1x4x8xf32>
    %21 = vector.shape_cast %20 : vector<1x1x4x8xf32> to vector<4x8xf32>
    %22 = arith.truncf %21 : vector<4x8xf32> to vector<4x8xbf16>
    %cst_24 = arith.constant dense<0.000000e+00> : vector<4x16xf32>
    %23 = tpu.matmul %22, %2, %cst_24 {dimension_numbers = #tpu.dot_dimension_numbers<[1], [0], [0], [1], [0, 0, 1, 1], [], []>} : vector<4x8xbf16>, vector<8x16xbf16>, vector<4x16xf32> -> vector<4x16xf32>
    %24 = arith.addf %19, %23 : vector<4x16xf32>
    %c0_25 = arith.constant 0 : index
    %c0_26 = arith.constant 0 : index
    %c0_27 = arith.constant 0 : index
    %c0_28 = arith.constant 0 : index
    %25 = vector.load %arg2[%c0_25, %c0_26, %c0_27, %c0_28] : memref<1x10x5x8xf32, #tpu.memory_space<vmem>>, vector<1x1x4x8xf32>
    %26 = vector.shape_cast %25 : vector<1x1x4x8xf32> to vector<4x8xf32>
    %27 = arith.truncf %26 : vector<4x8xf32> to vector<4x8xbf16>
    %cst_29 = arith.constant dense<0.000000e+00> : vector<4x16xf32>
    %28 = tpu.matmul %27, %4, %cst_29 {dimension_numbers = #tpu.dot_dimension_numbers<[1], [0], [0], [1], [0, 0, 1, 1], [], []>} : vector<4x8xbf16>, vector<8x16xbf16>, vector<4x16xf32> -> vector<4x16xf32>
    %29 = arith.addf %24, %28 : vector<4x16xf32>
    %c0_30 = arith.constant 0 : index
    %c0_31 = arith.constant 0 : index
    %c1_32 = arith.constant 1 : index
    %c0_33 = arith.constant 0 : index
    %30 = vector.load %arg1[%c0_30, %c0_31, %c1_32, %c0_33] : memref<1x10x5x8xf32, #tpu.memory_space<vmem>>, vector<1x1x4x8xf32>
    %31 = vector.shape_cast %30 : vector<1x1x4x8xf32> to vector<4x8xf32>
    %32 = arith.truncf %31 : vector<4x8xf32> to vector<4x8xbf16>
    %cst_34 = arith.constant dense<0.000000e+00> : vector<4x16xf32>
    %33 = tpu.matmul %32, %6, %cst_34 {dimension_numbers = #tpu.dot_dimension_numbers<[1], [0], [0], [1], [0, 0, 1, 1], [], []>} : vector<4x8xbf16>, vector<8x16xbf16>, vector<4x16xf32> -> vector<4x16xf32>
    %34 = arith.addf %29, %33 : vector<4x16xf32>
    %c0_35 = arith.constant 0 : index
    %c1_36 = arith.constant 1 : index
    %c0_37 = arith.constant 0 : index
    %c0_38 = arith.constant 0 : index
    %35 = vector.load %arg1[%c0_35, %c1_36, %c0_37, %c0_38] : memref<1x10x5x8xf32, #tpu.memory_space<vmem>>, vector<1x1x4x8xf32>
    %36 = vector.shape_cast %35 : vector<1x1x4x8xf32> to vector<4x8xf32>
    %37 = arith.truncf %36 : vector<4x8xf32> to vector<4x8xbf16>
    %cst_39 = arith.constant dense<0.000000e+00> : vector<4x16xf32>
    %38 = tpu.matmul %37, %8, %cst_39 {dimension_numbers = #tpu.dot_dimension_numbers<[1], [0], [0], [1], [0, 0, 1, 1], [], []>} : vector<4x8xbf16>, vector<8x16xbf16>, vector<4x16xf32> -> vector<4x16xf32>
    %39 = arith.addf %34, %38 : vector<4x16xf32>
    %c0_40 = arith.constant 0 : index
    %c1_41 = arith.constant 1 : index
    %c0_42 = arith.constant 0 : index
    %c0_43 = arith.constant 0 : index
    %40 = vector.load %arg2[%c0_40, %c1_41, %c0_42, %c0_43] : memref<1x10x5x8xf32, #tpu.memory_space<vmem>>, vector<1x1x4x8xf32>
    %41 = vector.shape_cast %40 : vector<1x1x4x8xf32> to vector<4x8xf32>
    %42 = arith.truncf %41 : vector<4x8xf32> to vector<4x8xbf16>
    %cst_44 = arith.constant dense<0.000000e+00> : vector<4x16xf32>
    %43 = tpu.matmul %42, %10, %cst_44 {dimension_numbers = #tpu.dot_dimension_numbers<[1], [0], [0], [1], [0, 0, 1, 1], [], []>} : vector<4x8xbf16>, vector<8x16xbf16>, vector<4x16xf32> -> vector<4x16xf32>
    %44 = arith.addf %39, %43 : vector<4x16xf32>
    %c0_45 = arith.constant 0 : index
    %c1_46 = arith.constant 1 : index
    %c1_47 = arith.constant 1 : index
    %c0_48 = arith.constant 0 : index
    %45 = vector.load %arg1[%c0_45, %c1_46, %c1_47, %c0_48] : memref<1x10x5x8xf32, #tpu.memory_space<vmem>>, vector<1x1x4x8xf32>
    %46 = vector.shape_cast %45 : vector<1x1x4x8xf32> to vector<4x8xf32>
    %47 = arith.truncf %46 : vector<4x8xf32> to vector<4x8xbf16>
    %cst_49 = arith.constant dense<0.000000e+00> : vector<4x16xf32>
    %48 = tpu.matmul %47, %12, %cst_49 {dimension_numbers = #tpu.dot_dimension_numbers<[1], [0], [0], [1], [0, 0, 1, 1], [], []>} : vector<4x8xbf16>, vector<8x16xbf16>, vector<4x16xf32> -> vector<4x16xf32>
    %49 = arith.addf %44, %48 : vector<4x16xf32>
    %c0_50 = arith.constant 0 : index
    %c2_51 = arith.constant 2 : index
    %c0_52 = arith.constant 0 : index
    %c0_53 = arith.constant 0 : index
    %50 = vector.load %arg1[%c0_50, %c2_51, %c0_52, %c0_53] : memref<1x10x5x8xf32, #tpu.memory_space<vmem>>, vector<1x1x4x8xf32>
    %51 = vector.shape_cast %50 : vector<1x1x4x8xf32> to vector<4x8xf32>
    %52 = arith.truncf %51 : vector<4x8xf32> to vector<4x8xbf16>
    %cst_54 = arith.constant dense<0.000000e+00> : vector<4x16xf32>
    %53 = tpu.matmul %52, %14, %cst_54 {dimension_numbers = #tpu.dot_dimension_numbers<[1], [0], [0], [1], [0, 0, 1, 1], [], []>} : vector<4x8xbf16>, vector<8x16xbf16>, vector<4x16xf32> -> vector<4x16xf32>
    %54 = arith.addf %49, %53 : vector<4x16xf32>
    %c0_55 = arith.constant 0 : index
    %c2_56 = arith.constant 2 : index
    %c0_57 = arith.constant 0 : index
    %c0_58 = arith.constant 0 : index
    %55 = vector.load %arg2[%c0_55, %c2_56, %c0_57, %c0_58] : memref<1x10x5x8xf32, #tpu.memory_space<vmem>>, vector<1x1x4x8xf32>
    %56 = vector.shape_cast %55 : vector<1x1x4x8xf32> to vector<4x8xf32>
    %57 = arith.truncf %56 : vector<4x8xf32> to vector<4x8xbf16>
    %cst_59 = arith.constant dense<0.000000e+00> : vector<4x16xf32>
    %58 = tpu.matmul %57, %16, %cst_59 {dimension_numbers = #tpu.dot_dimension_numbers<[1], [0], [0], [1], [0, 0, 1, 1], [], []>} : vector<4x8xbf16>, vector<8x16xbf16>, vector<4x16xf32> -> vector<4x16xf32>
    %59 = arith.addf %54, %58 : vector<4x16xf32>
    %c0_60 = arith.constant 0 : index
    %c2_61 = arith.constant 2 : index
    %c1_62 = arith.constant 1 : index
    %c0_63 = arith.constant 0 : index
    %60 = vector.load %arg1[%c0_60, %c2_61, %c1_62, %c0_63] : memref<1x10x5x8xf32, #tpu.memory_space<vmem>>, vector<1x1x4x8xf32>
    %61 = vector.shape_cast %60 : vector<1x1x4x8xf32> to vector<4x8xf32>
    %62 = arith.truncf %61 : vector<4x8xf32> to vector<4x8xbf16>
    %cst_64 = arith.constant dense<0.000000e+00> : vector<4x16xf32>
    %63 = tpu.matmul %62, %18, %cst_64 {dimension_numbers = #tpu.dot_dimension_numbers<[1], [0], [0], [1], [0, 0, 1, 1], [], []>} : vector<4x8xbf16>, vector<8x16xbf16>, vector<4x16xf32> -> vector<4x16xf32>
    %64 = arith.addf %59, %63 : vector<4x16xf32>
    %65 = vector.broadcast %0 : vector<1x16xf32> to vector<4x16xf32>
    %66 = arith.addf %64, %65 : vector<4x16xf32>
    %cst_65 = arith.constant 0.000000e+00 : f32
    %67 = vector.broadcast %cst_65 : f32 to vector<4x16xf32>
    %68 = arith.maximumf %66, %67 : vector<4x16xf32>
    %c0_66 = arith.constant 0 : index
    %c0_67 = arith.constant 0 : index
    %c0_68 = arith.constant 0 : index
    %c0_69 = arith.constant 0 : index
    %69 = vector.load %arg5[%c0_66, %c0_67, %c0_68, %c0_69] : memref<1x4x4x16xf32, #tpu.memory_space<vmem>>, vector<1x1x4x16xf32>
    %70 = vector.shape_cast %69 : vector<1x1x4x16xf32> to vector<4x16xf32>
    %71 = vector.shape_cast %68 : vector<4x16xf32> to vector<1x1x4x16xf32>
    tpu.vector_store %arg5[%c0_66, %c0_67, %c0_68, %c0_69], %71 {strides = array<i32>} : memref<1x4x4x16xf32, #tpu.memory_space<vmem>>, vector<1x1x4x16xf32>,
    %cst_70 = arith.constant 0.000000e+00 : f32
    %72 = vector.broadcast %cst_70 : f32 to vector<4x16xf32>
    %c0_71 = arith.constant 0 : index
    %c2_72 = arith.constant 2 : index
    %c0_73 = arith.constant 0 : index
    %c0_74 = arith.constant 0 : index
    %73 = vector.load %arg1[%c0_71, %c2_72, %c0_73, %c0_74] : memref<1x10x5x8xf32, #tpu.memory_space<vmem>>, vector<1x1x4x8xf32>
    %74 = vector.shape_cast %73 : vector<1x1x4x8xf32> to vector<4x8xf32>
    %75 = arith.truncf %74 : vector<4x8xf32> to vector<4x8xbf16>
    %cst_75 = arith.constant dense<0.000000e+00> : vector<4x16xf32>
    %76 = tpu.matmul %75, %2, %cst_75 {dimension_numbers = #tpu.dot_dimension_numbers<[1], [0], [0], [1], [0, 0, 1, 1], [], []>} : vector<4x8xbf16>, vector<8x16xbf16>, vector<4x16xf32> -> vector<4x16xf32>
    %77 = arith.addf %72, %76 : vector<4x16xf32>
    %c0_76 = arith.constant 0 : index
    %c2_77 = arith.constant 2 : index
    %c0_78 = arith.constant 0 : index
    %c0_79 = arith.constant 0 : index
    %78 = vector.load %arg2[%c0_76, %c2_77, %c0_78, %c0_79] : memref<1x10x5x8xf32, #tpu.memory_space<vmem>>, vector<1x1x4x8xf32>
    %79 = vector.shape_cast %78 : vector<1x1x4x8xf32> to vector<4x8xf32>
    %80 = arith.truncf %79 : vector<4x8xf32> to vector<4x8xbf16>
    %cst_80 = arith.constant dense<0.000000e+00> : vector<4x16xf32>
    %81 = tpu.matmul %80, %4, %cst_80 {dimension_numbers = #tpu.dot_dimension_numbers<[1], [0], [0], [1], [0, 0, 1, 1], [], []>} : vector<4x8xbf16>, vector<8x16xbf16>, vector<4x16xf32> -> vector<4x16xf32>
    %82 = arith.addf %77, %81 : vector<4x16xf32>
    %c0_81 = arith.constant 0 : index
    %c2_82 = arith.constant 2 : index
    %c1_83 = arith.constant 1 : index
    %c0_84 = arith.constant 0 : index
    %83 = vector.load %arg1[%c0_81, %c2_82, %c1_83, %c0_84] : memref<1x10x5x8xf32, #tpu.memory_space<vmem>>, vector<1x1x4x8xf32>
    %84 = vector.shape_cast %83 : vector<1x1x4x8xf32> to vector<4x8xf32>
    %85 = arith.truncf %84 : vector<4x8xf32> to vector<4x8xbf16>
    %cst_85 = arith.constant dense<0.000000e+00> : vector<4x16xf32>
    %86 = tpu.matmul %85, %6, %cst_85 {dimension_numbers = #tpu.dot_dimension_numbers<[1], [0], [0], [1], [0, 0, 1, 1], [], []>} : vector<4x8xbf16>, vector<8x16xbf16>, vector<4x16xf32> -> vector<4x16xf32>
    %87 = arith.addf %82, %86 : vector<4x16xf32>
    %c0_86 = arith.constant 0 : index
    %c3_87 = arith.constant 3 : index
    %c0_88 = arith.constant 0 : index
    %c0_89 = arith.constant 0 : index
    %88 = vector.load %arg1[%c0_86, %c3_87, %c0_88, %c0_89] : memref<1x10x5x8xf32, #tpu.memory_space<vmem>>, vector<1x1x4x8xf32>
    %89 = vector.shape_cast %88 : vector<1x1x4x8xf32> to vector<4x8xf32>
    %90 = arith.truncf %89 : vector<4x8xf32> to vector<4x8xbf16>
    %cst_90 = arith.constant dense<0.000000e+00> : vector<4x16xf32>
    %91 = tpu.matmul %90, %8, %cst_90 {dimension_numbers = #tpu.dot_dimension_numbers<[1], [0], [0], [1], [0, 0, 1, 1], [], []>} : vector<4x8xbf16>, vector<8x16xbf16>, vector<4x16xf32> -> vector<4x16xf32>
    %92 = arith.addf %87, %91 : vector<4x16xf32>
    %c0_91 = arith.constant 0 : index
    %c3_92 = arith.constant 3 : index
    %c0_93 = arith.constant 0 : index
    %c0_94 = arith.constant 0 : index
    %93 = vector.load %arg2[%c0_91, %c3_92, %c0_93, %c0_94] : memref<1x10x5x8xf32, #tpu.memory_space<vmem>>, vector<1x1x4x8xf32>
    %94 = vector.shape_cast %93 : vector<1x1x4x8xf32> to vector<4x8xf32>
    %95 = arith.truncf %94 : vector<4x8xf32> to vector<4x8xbf16>
    %cst_95 = arith.constant dense<0.000000e+00> : vector<4x16xf32>
    %96 = tpu.matmul %95, %10, %cst_95 {dimension_numbers = #tpu.dot_dimension_numbers<[1], [0], [0], [1], [0, 0, 1, 1], [], []>} : vector<4x8xbf16>, vector<8x16xbf16>, vector<4x16xf32> -> vector<4x16xf32>
    %97 = arith.addf %92, %96 : vector<4x16xf32>
    %c0_96 = arith.constant 0 : index
    %c3_97 = arith.constant 3 : index
    %c1_98 = arith.constant 1 : index
    %c0_99 = arith.constant 0 : index
    %98 = vector.load %arg1[%c0_96, %c3_97, %c1_98, %c0_99] : memref<1x10x5x8xf32, #tpu.memory_space<vmem>>, vector<1x1x4x8xf32>
    %99 = vector.shape_cast %98 : vector<1x1x4x8xf32> to vector<4x8xf32>
    %100 = arith.truncf %99 : vector<4x8xf32> to vector<4x8xbf16>
    %cst_100 = arith.constant dense<0.000000e+00> : vector<4x16xf32>
    %101 = tpu.matmul %100, %12, %cst_100 {dimension_numbers = #tpu.dot_dimension_numbers<[1], [0], [0], [1], [0, 0, 1, 1], [], []>} : vector<4x8xbf16>, vector<8x16xbf16>, vector<4x16xf32> -> vector<4x16xf32>
    %102 = arith.addf %97, %101 : vector<4x16xf32>
    %c0_101 = arith.constant 0 : index
    %c4_102 = arith.constant 4 : index
    %c0_103 = arith.constant 0 : index
    %c0_104 = arith.constant 0 : index
    %103 = vector.load %arg1[%c0_101, %c4_102, %c0_103, %c0_104] : memref<1x10x5x8xf32, #tpu.memory_space<vmem>>, vector<1x1x4x8xf32>
    %104 = vector.shape_cast %103 : vector<1x1x4x8xf32> to vector<4x8xf32>
    %105 = arith.truncf %104 : vector<4x8xf32> to vector<4x8xbf16>
    %cst_105 = arith.constant dense<0.000000e+00> : vector<4x16xf32>
    %106 = tpu.matmul %105, %14, %cst_105 {dimension_numbers = #tpu.dot_dimension_numbers<[1], [0], [0], [1], [0, 0, 1, 1], [], []>} : vector<4x8xbf16>, vector<8x16xbf16>, vector<4x16xf32> -> vector<4x16xf32>
    %107 = arith.addf %102, %106 : vector<4x16xf32>
    %c0_106 = arith.constant 0 : index
    %c4_107 = arith.constant 4 : index
    %c0_108 = arith.constant 0 : index
    %c0_109 = arith.constant 0 : index
    %108 = vector.load %arg2[%c0_106, %c4_107, %c0_108, %c0_109] : memref<1x10x5x8xf32, #tpu.memory_space<vmem>>, vector<1x1x4x8xf32>
    %109 = vector.shape_cast %108 : vector<1x1x4x8xf32> to vector<4x8xf32>
    %110 = arith.truncf %109 : vector<4x8xf32> to vector<4x8xbf16>
    %cst_110 = arith.constant dense<0.000000e+00> : vector<4x16xf32>
    %111 = tpu.matmul %110, %16, %cst_110 {dimension_numbers = #tpu.dot_dimension_numbers<[1], [0], [0], [1], [0, 0, 1, 1], [], []>} : vector<4x8xbf16>, vector<8x16xbf16>, vector<4x16xf32> -> vector<4x16xf32>
    %112 = arith.addf %107, %111 : vector<4x16xf32>
    %c0_111 = arith.constant 0 : index
    %c4_112 = arith.constant 4 : index
    %c1_113 = arith.constant 1 : index
    %c0_114 = arith.constant 0 : index
    %113 = vector.load %arg1[%c0_111, %c4_112, %c1_113, %c0_114] : memref<1x10x5x8xf32, #tpu.memory_space<vmem>>, vector<1x1x4x8xf32>
    %114 = vector.shape_cast %113 : vector<1x1x4x8xf32> to vector<4x8xf32>
    %115 = arith.truncf %114 : vector<4x8xf32> to vector<4x8xbf16>
    %cst_115 = arith.constant dense<0.000000e+00> : vector<4x16xf32>
    %116 = tpu.matmul %115, %18, %cst_115 {dimension_numbers = #tpu.dot_dimension_numbers<[1], [0], [0], [1], [0, 0, 1, 1], [], []>} : vector<4x8xbf16>, vector<8x16xbf16>, vector<4x16xf32> -> vector<4x16xf32>
    %117 = arith.addf %112, %116 : vector<4x16xf32>
    %118 = vector.broadcast %0 : vector<1x16xf32> to vector<4x16xf32>
    %119 = arith.addf %117, %118 : vector<4x16xf32>
    %cst_116 = arith.constant 0.000000e+00 : f32
    %120 = vector.broadcast %cst_116 : f32 to vector<4x16xf32>
    %121 = arith.maximumf %119, %120 : vector<4x16xf32>
    %c0_117 = arith.constant 0 : index
    %c1_118 = arith.constant 1 : index
    %c0_119 = arith.constant 0 : index
    %c0_120 = arith.constant 0 : index
    %122 = vector.load %arg5[%c0_117, %c1_118, %c0_119, %c0_120] : memref<1x4x4x16xf32, #tpu.memory_space<vmem>>, vector<1x1x4x16xf32>
    %123 = vector.shape_cast %122 : vector<1x1x4x16xf32> to vector<4x16xf32>
    %124 = vector.shape_cast %121 : vector<4x16xf32> to vector<1x1x4x16xf32>
    tpu.vector_store %arg5[%c0_117, %c1_118, %c0_119, %c0_120], %124 {strides = array<i32>} : memref<1x4x4x16xf32, #tpu.memory_space<vmem>>, vector<1x1x4x16xf32>,
    %cst_121 = arith.constant 0.000000e+00 : f32
    %125 = vector.broadcast %cst_121 : f32 to vector<4x16xf32>
    %c0_122 = arith.constant 0 : index
    %c4_123 = arith.constant 4 : index
    %c0_124 = arith.constant 0 : index
    %c0_125 = arith.constant 0 : index
    %126 = vector.load %arg1[%c0_122, %c4_123, %c0_124, %c0_125] : memref<1x10x5x8xf32, #tpu.memory_space<vmem>>, vector<1x1x4x8xf32>
    %127 = vector.shape_cast %126 : vector<1x1x4x8xf32> to vector<4x8xf32>
    %128 = arith.truncf %127 : vector<4x8xf32> to vector<4x8xbf16>
    %cst_126 = arith.constant dense<0.000000e+00> : vector<4x16xf32>
    %129 = tpu.matmul %128, %2, %cst_126 {dimension_numbers = #tpu.dot_dimension_numbers<[1], [0], [0], [1], [0, 0, 1, 1], [], []>} : vector<4x8xbf16>, vector<8x16xbf16>, vector<4x16xf32> -> vector<4x16xf32>
    %130 = arith.addf %125, %129 : vector<4x16xf32>
    %c0_127 = arith.constant 0 : index
    %c4_128 = arith.constant 4 : index
    %c0_129 = arith.constant 0 : index
    %c0_130 = arith.constant 0 : index
    %131 = vector.load %arg2[%c0_127, %c4_128, %c0_129, %c0_130] : memref<1x10x5x8xf32, #tpu.memory_space<vmem>>, vector<1x1x4x8xf32>
    %132 = vector.shape_cast %131 : vector<1x1x4x8xf32> to vector<4x8xf32>
    %133 = arith.truncf %132 : vector<4x8xf32> to vector<4x8xbf16>
    %cst_131 = arith.constant dense<0.000000e+00> : vector<4x16xf32>
    %134 = tpu.matmul %133, %4, %cst_131 {dimension_numbers = #tpu.dot_dimension_numbers<[1], [0], [0], [1], [0, 0, 1, 1], [], []>} : vector<4x8xbf16>, vector<8x16xbf16>, vector<4x16xf32> -> vector<4x16xf32>
    %135 = arith.addf %130, %134 : vector<4x16xf32>
    %c0_132 = arith.constant 0 : index
    %c4_133 = arith.constant 4 : index
    %c1_134 = arith.constant 1 : index
    %c0_135 = arith.constant 0 : index
    %136 = vector.load %arg1[%c0_132, %c4_133, %c1_134, %c0_135] : memref<1x10x5x8xf32, #tpu.memory_space<vmem>>, vector<1x1x4x8xf32>
    %137 = vector.shape_cast %136 : vector<1x1x4x8xf32> to vector<4x8xf32>
    %138 = arith.truncf %137 : vector<4x8xf32> to vector<4x8xbf16>
    %cst_136 = arith.constant dense<0.000000e+00> : vector<4x16xf32>
    %139 = tpu.matmul %138, %6, %cst_136 {dimension_numbers = #tpu.dot_dimension_numbers<[1], [0], [0], [1], [0, 0, 1, 1], [], []>} : vector<4x8xbf16>, vector<8x16xbf16>, vector<4x16xf32> -> vector<4x16xf32>
    %140 = arith.addf %135, %139 : vector<4x16xf32>
    %c0_137 = arith.constant 0 : index
    %c5_138 = arith.constant 5 : index
    %c0_139 = arith.constant 0 : index
    %c0_140 = arith.constant 0 : index
    %141 = vector.load %arg1[%c0_137, %c5_138, %c0_139, %c0_140] : memref<1x10x5x8xf32, #tpu.memory_space<vmem>>, vector<1x1x4x8xf32>
    %142 = vector.shape_cast %141 : vector<1x1x4x8xf32> to vector<4x8xf32>
    %143 = arith.truncf %142 : vector<4x8xf32> to vector<4x8xbf16>
    %cst_141 = arith.constant dense<0.000000e+00> : vector<4x16xf32>
    %144 = tpu.matmul %143, %8, %cst_141 {dimension_numbers = #tpu.dot_dimension_numbers<[1], [0], [0], [1], [0, 0, 1, 1], [], []>} : vector<4x8xbf16>, vector<8x16xbf16>, vector<4x16xf32> -> vector<4x16xf32>
    %145 = arith.addf %140, %144 : vector<4x16xf32>
    %c0_142 = arith.constant 0 : index
    %c5_143 = arith.constant 5 : index
    %c0_144 = arith.constant 0 : index
    %c0_145 = arith.constant 0 : index
    %146 = vector.load %arg2[%c0_142, %c5_143, %c0_144, %c0_145] : memref<1x10x5x8xf32, #tpu.memory_space<vmem>>, vector<1x1x4x8xf32>
    %147 = vector.shape_cast %146 : vector<1x1x4x8xf32> to vector<4x8xf32>
    %148 = arith.truncf %147 : vector<4x8xf32> to vector<4x8xbf16>
    %cst_146 = arith.constant dense<0.000000e+00> : vector<4x16xf32>
    %149 = tpu.matmul %148, %10, %cst_146 {dimension_numbers = #tpu.dot_dimension_numbers<[1], [0], [0], [1], [0, 0, 1, 1], [], []>} : vector<4x8xbf16>, vector<8x16xbf16>, vector<4x16xf32> -> vector<4x16xf32>
    %150 = arith.addf %145, %149 : vector<4x16xf32>
    %c0_147 = arith.constant 0 : index
    %c5_148 = arith.constant 5 : index
    %c1_149 = arith.constant 1 : index
    %c0_150 = arith.constant 0 : index
    %151 = vector.load %arg1[%c0_147, %c5_148, %c1_149, %c0_150] : memref<1x10x5x8xf32, #tpu.memory_space<vmem>>, vector<1x1x4x8xf32>
    %152 = vector.shape_cast %151 : vector<1x1x4x8xf32> to vector<4x8xf32>
    %153 = arith.truncf %152 : vector<4x8xf32> to vector<4x8xbf16>
    %cst_151 = arith.constant dense<0.000000e+00> : vector<4x16xf32>
    %154 = tpu.matmul %153, %12, %cst_151 {dimension_numbers = #tpu.dot_dimension_numbers<[1], [0], [0], [1], [0, 0, 1, 1], [], []>} : vector<4x8xbf16>, vector<8x16xbf16>, vector<4x16xf32> -> vector<4x16xf32>
    %155 = arith.addf %150, %154 : vector<4x16xf32>
    %c0_152 = arith.constant 0 : index
    %c6_153 = arith.constant 6 : index
    %c0_154 = arith.constant 0 : index
    %c0_155 = arith.constant 0 : index
    %156 = vector.load %arg1[%c0_152, %c6_153, %c0_154, %c0_155] : memref<1x10x5x8xf32, #tpu.memory_space<vmem>>, vector<1x1x4x8xf32>
    %157 = vector.shape_cast %156 : vector<1x1x4x8xf32> to vector<4x8xf32>
    %158 = arith.truncf %157 : vector<4x8xf32> to vector<4x8xbf16>
    %cst_156 = arith.constant dense<0.000000e+00> : vector<4x16xf32>
    %159 = tpu.matmul %158, %14, %cst_156 {dimension_numbers = #tpu.dot_dimension_numbers<[1], [0], [0], [1], [0, 0, 1, 1], [], []>} : vector<4x8xbf16>, vector<8x16xbf16>, vector<4x16xf32> -> vector<4x16xf32>
    %160 = arith.addf %155, %159 : vector<4x16xf32>
    %c0_157 = arith.constant 0 : index
    %c6_158 = arith.constant 6 : index
    %c0_159 = arith.constant 0 : index
    %c0_160 = arith.constant 0 : index
    %161 = vector.load %arg2[%c0_157, %c6_158, %c0_159, %c0_160] : memref<1x10x5x8xf32, #tpu.memory_space<vmem>>, vector<1x1x4x8xf32>
    %162 = vector.shape_cast %161 : vector<1x1x4x8xf32> to vector<4x8xf32>
    %163 = arith.truncf %162 : vector<4x8xf32> to vector<4x8xbf16>
    %cst_161 = arith.constant dense<0.000000e+00> : vector<4x16xf32>
    %164 = tpu.matmul %163, %16, %cst_161 {dimension_numbers = #tpu.dot_dimension_numbers<[1], [0], [0], [1], [0, 0, 1, 1], [], []>} : vector<4x8xbf16>, vector<8x16xbf16>, vector<4x16xf32> -> vector<4x16xf32>
    %165 = arith.addf %160, %164 : vector<4x16xf32>
    %c0_162 = arith.constant 0 : index
    %c6_163 = arith.constant 6 : index
    %c1_164 = arith.constant 1 : index
    %c0_165 = arith.constant 0 : index
    %166 = vector.load %arg1[%c0_162, %c6_163, %c1_164, %c0_165] : memref<1x10x5x8xf32, #tpu.memory_space<vmem>>, vector<1x1x4x8xf32>
    %167 = vector.shape_cast %166 : vector<1x1x4x8xf32> to vector<4x8xf32>
    %168 = arith.truncf %167 : vector<4x8xf32> to vector<4x8xbf16>
    %cst_166 = arith.constant dense<0.000000e+00> : vector<4x16xf32>
    %169 = tpu.matmul %168, %18, %cst_166 {dimension_numbers = #tpu.dot_dimension_numbers<[1], [0], [0], [1], [0, 0, 1, 1], [], []>} : vector<4x8xbf16>, vector<8x16xbf16>, vector<4x16xf32> -> vector<4x16xf32>
    %170 = arith.addf %165, %169 : vector<4x16xf32>
    %171 = vector.broadcast %0 : vector<1x16xf32> to vector<4x16xf32>
    %172 = arith.addf %170, %171 : vector<4x16xf32>
    %cst_167 = arith.constant 0.000000e+00 : f32
    %173 = vector.broadcast %cst_167 : f32 to vector<4x16xf32>
    %174 = arith.maximumf %172, %173 : vector<4x16xf32>
    %c0_168 = arith.constant 0 : index
    %c2_169 = arith.constant 2 : index
    %c0_170 = arith.constant 0 : index
    %c0_171 = arith.constant 0 : index
    %175 = vector.load %arg5[%c0_168, %c2_169, %c0_170, %c0_171] : memref<1x4x4x16xf32, #tpu.memory_space<vmem>>, vector<1x1x4x16xf32>
    %176 = vector.shape_cast %175 : vector<1x1x4x16xf32> to vector<4x16xf32>
    %177 = vector.shape_cast %174 : vector<4x16xf32> to vector<1x1x4x16xf32>
    tpu.vector_store %arg5[%c0_168, %c2_169, %c0_170, %c0_171], %177 {strides = array<i32>} : memref<1x4x4x16xf32, #tpu.memory_space<vmem>>, vector<1x1x4x16xf32>,
    %cst_172 = arith.constant 0.000000e+00 : f32
    %178 = vector.broadcast %cst_172 : f32 to vector<4x16xf32>
    %c0_173 = arith.constant 0 : index
    %c6_174 = arith.constant 6 : index
    %c0_175 = arith.constant 0 : index
    %c0_176 = arith.constant 0 : index
    %179 = vector.load %arg1[%c0_173, %c6_174, %c0_175, %c0_176] : memref<1x10x5x8xf32, #tpu.memory_space<vmem>>, vector<1x1x4x8xf32>
    %180 = vector.shape_cast %179 : vector<1x1x4x8xf32> to vector<4x8xf32>
    %181 = arith.truncf %180 : vector<4x8xf32> to vector<4x8xbf16>
    %cst_177 = arith.constant dense<0.000000e+00> : vector<4x16xf32>
    %182 = tpu.matmul %181, %2, %cst_177 {dimension_numbers = #tpu.dot_dimension_numbers<[1], [0], [0], [1], [0, 0, 1, 1], [], []>} : vector<4x8xbf16>, vector<8x16xbf16>, vector<4x16xf32> -> vector<4x16xf32>
    %183 = arith.addf %178, %182 : vector<4x16xf32>
    %c0_178 = arith.constant 0 : index
    %c6_179 = arith.constant 6 : index
    %c0_180 = arith.constant 0 : index
    %c0_181 = arith.constant 0 : index
    %184 = vector.load %arg2[%c0_178, %c6_179, %c0_180, %c0_181] : memref<1x10x5x8xf32, #tpu.memory_space<vmem>>, vector<1x1x4x8xf32>
    %185 = vector.shape_cast %184 : vector<1x1x4x8xf32> to vector<4x8xf32>
    %186 = arith.truncf %185 : vector<4x8xf32> to vector<4x8xbf16>
    %cst_182 = arith.constant dense<0.000000e+00> : vector<4x16xf32>
    %187 = tpu.matmul %186, %4, %cst_182 {dimension_numbers = #tpu.dot_dimension_numbers<[1], [0], [0], [1], [0, 0, 1, 1], [], []>} : vector<4x8xbf16>, vector<8x16xbf16>, vector<4x16xf32> -> vector<4x16xf32>
    %188 = arith.addf %183, %187 : vector<4x16xf32>
    %c0_183 = arith.constant 0 : index
    %c6_184 = arith.constant 6 : index
    %c1_185 = arith.constant 1 : index
    %c0_186 = arith.constant 0 : index
    %189 = vector.load %arg1[%c0_183, %c6_184, %c1_185, %c0_186] : memref<1x10x5x8xf32, #tpu.memory_space<vmem>>, vector<1x1x4x8xf32>
    %190 = vector.shape_cast %189 : vector<1x1x4x8xf32> to vector<4x8xf32>
    %191 = arith.truncf %190 : vector<4x8xf32> to vector<4x8xbf16>
    %cst_187 = arith.constant dense<0.000000e+00> : vector<4x16xf32>
    %192 = tpu.matmul %191, %6, %cst_187 {dimension_numbers = #tpu.dot_dimension_numbers<[1], [0], [0], [1], [0, 0, 1, 1], [], []>} : vector<4x8xbf16>, vector<8x16xbf16>, vector<4x16xf32> -> vector<4x16xf32>
    %193 = arith.addf %188, %192 : vector<4x16xf32>
    %c0_188 = arith.constant 0 : index
    %c7_189 = arith.constant 7 : index
    %c0_190 = arith.constant 0 : index
    %c0_191 = arith.constant 0 : index
    %194 = vector.load %arg1[%c0_188, %c7_189, %c0_190, %c0_191] : memref<1x10x5x8xf32, #tpu.memory_space<vmem>>, vector<1x1x4x8xf32>
    %195 = vector.shape_cast %194 : vector<1x1x4x8xf32> to vector<4x8xf32>
    %196 = arith.truncf %195 : vector<4x8xf32> to vector<4x8xbf16>
    %cst_192 = arith.constant dense<0.000000e+00> : vector<4x16xf32>
    %197 = tpu.matmul %196, %8, %cst_192 {dimension_numbers = #tpu.dot_dimension_numbers<[1], [0], [0], [1], [0, 0, 1, 1], [], []>} : vector<4x8xbf16>, vector<8x16xbf16>, vector<4x16xf32> -> vector<4x16xf32>
    %198 = arith.addf %193, %197 : vector<4x16xf32>
    %c0_193 = arith.constant 0 : index
    %c7_194 = arith.constant 7 : index
    %c0_195 = arith.constant 0 : index
    %c0_196 = arith.constant 0 : index
    %199 = vector.load %arg2[%c0_193, %c7_194, %c0_195, %c0_196] : memref<1x10x5x8xf32, #tpu.memory_space<vmem>>, vector<1x1x4x8xf32>
    %200 = vector.shape_cast %199 : vector<1x1x4x8xf32> to vector<4x8xf32>
    %201 = arith.truncf %200 : vector<4x8xf32> to vector<4x8xbf16>
    %cst_197 = arith.constant dense<0.000000e+00> : vector<4x16xf32>
    %202 = tpu.matmul %201, %10, %cst_197 {dimension_numbers = #tpu.dot_dimension_numbers<[1], [0], [0], [1], [0, 0, 1, 1], [], []>} : vector<4x8xbf16>, vector<8x16xbf16>, vector<4x16xf32> -> vector<4x16xf32>
    %203 = arith.addf %198, %202 : vector<4x16xf32>
    %c0_198 = arith.constant 0 : index
    %c7_199 = arith.constant 7 : index
    %c1_200 = arith.constant 1 : index
    %c0_201 = arith.constant 0 : index
    %204 = vector.load %arg1[%c0_198, %c7_199, %c1_200, %c0_201] : memref<1x10x5x8xf32, #tpu.memory_space<vmem>>, vector<1x1x4x8xf32>
    %205 = vector.shape_cast %204 : vector<1x1x4x8xf32> to vector<4x8xf32>
    %206 = arith.truncf %205 : vector<4x8xf32> to vector<4x8xbf16>
    %cst_202 = arith.constant dense<0.000000e+00> : vector<4x16xf32>
    %207 = tpu.matmul %206, %12, %cst_202 {dimension_numbers = #tpu.dot_dimension_numbers<[1], [0], [0], [1], [0, 0, 1, 1], [], []>} : vector<4x8xbf16>, vector<8x16xbf16>, vector<4x16xf32> -> vector<4x16xf32>
    %208 = arith.addf %203, %207 : vector<4x16xf32>
    %c0_203 = arith.constant 0 : index
    %c8_204 = arith.constant 8 : index
    %c0_205 = arith.constant 0 : index
    %c0_206 = arith.constant 0 : index
    %209 = vector.load %arg1[%c0_203, %c8_204, %c0_205, %c0_206] : memref<1x10x5x8xf32, #tpu.memory_space<vmem>>, vector<1x1x4x8xf32>
    %210 = vector.shape_cast %209 : vector<1x1x4x8xf32> to vector<4x8xf32>
    %211 = arith.truncf %210 : vector<4x8xf32> to vector<4x8xbf16>
    %cst_207 = arith.constant dense<0.000000e+00> : vector<4x16xf32>
    %212 = tpu.matmul %211, %14, %cst_207 {dimension_numbers = #tpu.dot_dimension_numbers<[1], [0], [0], [1], [0, 0, 1, 1], [], []>} : vector<4x8xbf16>, vector<8x16xbf16>, vector<4x16xf32> -> vector<4x16xf32>
    %213 = arith.addf %208, %212 : vector<4x16xf32>
    %c0_208 = arith.constant 0 : index
    %c8_209 = arith.constant 8 : index
    %c0_210 = arith.constant 0 : index
    %c0_211 = arith.constant 0 : index
    %214 = vector.load %arg2[%c0_208, %c8_209, %c0_210, %c0_211] : memref<1x10x5x8xf32, #tpu.memory_space<vmem>>, vector<1x1x4x8xf32>
    %215 = vector.shape_cast %214 : vector<1x1x4x8xf32> to vector<4x8xf32>
    %216 = arith.truncf %215 : vector<4x8xf32> to vector<4x8xbf16>
    %cst_212 = arith.constant dense<0.000000e+00> : vector<4x16xf32>
    %217 = tpu.matmul %216, %16, %cst_212 {dimension_numbers = #tpu.dot_dimension_numbers<[1], [0], [0], [1], [0, 0, 1, 1], [], []>} : vector<4x8xbf16>, vector<8x16xbf16>, vector<4x16xf32> -> vector<4x16xf32>
    %218 = arith.addf %213, %217 : vector<4x16xf32>
    %c0_213 = arith.constant 0 : index
    %c8_214 = arith.constant 8 : index
    %c1_215 = arith.constant 1 : index
    %c0_216 = arith.constant 0 : index
    %219 = vector.load %arg1[%c0_213, %c8_214, %c1_215, %c0_216] : memref<1x10x5x8xf32, #tpu.memory_space<vmem>>, vector<1x1x4x8xf32>
    %220 = vector.shape_cast %219 : vector<1x1x4x8xf32> to vector<4x8xf32>
    %221 = arith.truncf %220 : vector<4x8xf32> to vector<4x8xbf16>
    %cst_217 = arith.constant dense<0.000000e+00> : vector<4x16xf32>
    %222 = tpu.matmul %221, %18, %cst_217 {dimension_numbers = #tpu.dot_dimension_numbers<[1], [0], [0], [1], [0, 0, 1, 1], [], []>} : vector<4x8xbf16>, vector<8x16xbf16>, vector<4x16xf32> -> vector<4x16xf32>
    %223 = arith.addf %218, %222 : vector<4x16xf32>
    %224 = vector.broadcast %0 : vector<1x16xf32> to vector<4x16xf32>
    %225 = arith.addf %223, %224 : vector<4x16xf32>
    %cst_218 = arith.constant 0.000000e+00 : f32
    %226 = vector.broadcast %cst_218 : f32 to vector<4x16xf32>
    %227 = arith.maximumf %225, %226 : vector<4x16xf32>
    %c0_219 = arith.constant 0 : index
    %c3_220 = arith.constant 3 : index
    %c0_221 = arith.constant 0 : index
    %c0_222 = arith.constant 0 : index
    %228 = vector.load %arg5[%c0_219, %c3_220, %c0_221, %c0_222] : memref<1x4x4x16xf32, #tpu.memory_space<vmem>>, vector<1x1x4x16xf32>
    %229 = vector.shape_cast %228 : vector<1x1x4x16xf32> to vector<4x16xf32>
    %230 = vector.shape_cast %227 : vector<4x16xf32> to vector<1x1x4x16xf32>
    tpu.vector_store %arg5[%c0_219, %c3_220, %c0_221, %c0_222], %230 {strides = array<i32>} : memref<1x4x4x16xf32, #tpu.memory_space<vmem>>, vector<1x1x4x16xf32>,
    return
  }
  func.func @transform_0(%arg0: i32) -> (i32, i32, i32, i32) {
    %c0_i32 = arith.constant 0 : i32
    %c0_i32_0 = arith.constant 0 : i32
    %c0_i32_1 = arith.constant 0 : i32
    %c0_i32_2 = arith.constant 0 : i32
    return %arg0, %c0_i32, %c0_i32_0, %c0_i32_1 : i32, i32, i32, i32
  }
  func.func @transform_1(%arg0: i32) -> (i32, i32, i32, i32) {
    %c0_i32 = arith.constant 0 : i32
    %c0_i32_0 = arith.constant 0 : i32
    %c0_i32_1 = arith.constant 0 : i32
    %c0_i32_2 = arith.constant 0 : i32
    return %arg0, %c0_i32, %c0_i32_0, %c0_i32_1 : i32, i32, i32, i32
  }
  func.func @transform_2(%arg0: i32) -> (i32, i32, i32) {
    %c0_i32 = arith.constant 0 : i32
    %c0_i32_0 = arith.constant 0 : i32
    %c0_i32_1 = arith.constant 0 : i32
    %c0_i32_2 = arith.constant 0 : i32
    return %c0_i32, %c0_i32_0, %c0_i32_1 : i32, i32, i32
  }
  func.func @transform_3(%arg0: i32) -> (i32, i32) {
    %c0_i32 = arith.constant 0 : i32
    %c0_i32_0 = arith.constant 0 : i32
    %c0_i32_1 = arith.constant 0 : i32
    return %c0_i32, %c0_i32_0 : i32, i32
  }
  func.func @transform_4(%arg0: i32) -> (i32, i32, i32, i32) {
    %c0_i32 = arith.constant 0 : i32
    %c0_i32_0 = arith.constant 0 : i32
    %c0_i32_1 = arith.constant 0 : i32
    %c0_i32_2 = arith.constant 0 : i32
    return %arg0, %c0_i32, %c0_i32_0, %c0_i32_1 : i32, i32, i32, i32
  }
}

module attributes {stable_mosaic.version = 11 : i64} {
  func.func @_conv3x3_s2_relu_kernel(%arg0: i32, %arg1: memref<1x6x3x16xf32, #tpu.memory_space<vmem>>, %arg2: memref<1x6x3x16xf32, #tpu.memory_space<vmem>>, %arg3: memref<9x16x32xbf16, #tpu.memory_space<vmem>>, %arg4: memref<1x32xf32, #tpu.memory_space<vmem>>, %arg5: memref<1x2x2x32xf32, #tpu.memory_space<vmem>>) attributes {dimension_semantics = [#tpu.dimension_semantics<parallel>], iteration_bounds = array<i64: 2>, scalar_prefetch = 0 : i64, scratch_operands = 0 : i64, tpu.core_type = #tpu.core_type<tc>, window_params = [{transform_indices = @transform_0, window_bounds = array<i64: 1, 6, 3, 16>}, {transform_indices = @transform_1, window_bounds = array<i64: 1, 6, 3, 16>}, {pipeline_mode = #tpu.pipeline_mode<synchronous>, transform_indices = @transform_2, window_bounds = array<i64: 9, 16, 32>}, {pipeline_mode = #tpu.pipeline_mode<synchronous>, transform_indices = @transform_3, window_bounds = array<i64: 1, 32>}, {transform_indices = @transform_4, window_bounds = array<i64: 1, 2, 2, 32>}]} {
    %c0 = arith.constant 0 : index
    %c0_0 = arith.constant 0 : index
    %0 = vector.load %arg4[%c0, %c0_0] : memref<1x32xf32, #tpu.memory_space<vmem>>, vector<1x32xf32>
    %c0_1 = arith.constant 0 : index
    %c0_2 = arith.constant 0 : index
    %c0_3 = arith.constant 0 : index
    %1 = vector.load %arg3[%c0_1, %c0_2, %c0_3] : memref<9x16x32xbf16, #tpu.memory_space<vmem>>, vector<1x16x32xbf16>
    %2 = vector.shape_cast %1 : vector<1x16x32xbf16> to vector<16x32xbf16>
    %c1 = arith.constant 1 : index
    %c0_4 = arith.constant 0 : index
    %c0_5 = arith.constant 0 : index
    %3 = vector.load %arg3[%c1, %c0_4, %c0_5] : memref<9x16x32xbf16, #tpu.memory_space<vmem>>, vector<1x16x32xbf16>
    %4 = vector.shape_cast %3 : vector<1x16x32xbf16> to vector<16x32xbf16>
    %c2 = arith.constant 2 : index
    %c0_6 = arith.constant 0 : index
    %c0_7 = arith.constant 0 : index
    %5 = vector.load %arg3[%c2, %c0_6, %c0_7] : memref<9x16x32xbf16, #tpu.memory_space<vmem>>, vector<1x16x32xbf16>
    %6 = vector.shape_cast %5 : vector<1x16x32xbf16> to vector<16x32xbf16>
    %c3 = arith.constant 3 : index
    %c0_8 = arith.constant 0 : index
    %c0_9 = arith.constant 0 : index
    %7 = vector.load %arg3[%c3, %c0_8, %c0_9] : memref<9x16x32xbf16, #tpu.memory_space<vmem>>, vector<1x16x32xbf16>
    %8 = vector.shape_cast %7 : vector<1x16x32xbf16> to vector<16x32xbf16>
    %c4 = arith.constant 4 : index
    %c0_10 = arith.constant 0 : index
    %c0_11 = arith.constant 0 : index
    %9 = vector.load %arg3[%c4, %c0_10, %c0_11] : memref<9x16x32xbf16, #tpu.memory_space<vmem>>, vector<1x16x32xbf16>
    %10 = vector.shape_cast %9 : vector<1x16x32xbf16> to vector<16x32xbf16>
    %c5 = arith.constant 5 : index
    %c0_12 = arith.constant 0 : index
    %c0_13 = arith.constant 0 : index
    %11 = vector.load %arg3[%c5, %c0_12, %c0_13] : memref<9x16x32xbf16, #tpu.memory_space<vmem>>, vector<1x16x32xbf16>
    %12 = vector.shape_cast %11 : vector<1x16x32xbf16> to vector<16x32xbf16>
    %c6 = arith.constant 6 : index
    %c0_14 = arith.constant 0 : index
    %c0_15 = arith.constant 0 : index
    %13 = vector.load %arg3[%c6, %c0_14, %c0_15] : memref<9x16x32xbf16, #tpu.memory_space<vmem>>, vector<1x16x32xbf16>
    %14 = vector.shape_cast %13 : vector<1x16x32xbf16> to vector<16x32xbf16>
    %c7 = arith.constant 7 : index
    %c0_16 = arith.constant 0 : index
    %c0_17 = arith.constant 0 : index
    %15 = vector.load %arg3[%c7, %c0_16, %c0_17] : memref<9x16x32xbf16, #tpu.memory_space<vmem>>, vector<1x16x32xbf16>
    %16 = vector.shape_cast %15 : vector<1x16x32xbf16> to vector<16x32xbf16>
    %c8 = arith.constant 8 : index
    %c0_18 = arith.constant 0 : index
    %c0_19 = arith.constant 0 : index
    %17 = vector.load %arg3[%c8, %c0_18, %c0_19] : memref<9x16x32xbf16, #tpu.memory_space<vmem>>, vector<1x16x32xbf16>
    %18 = vector.shape_cast %17 : vector<1x16x32xbf16> to vector<16x32xbf16>
    %cst = arith.constant 0.000000e+00 : f32
    %19 = vector.broadcast %cst : f32 to vector<2x32xf32>
    %c0_20 = arith.constant 0 : index
    %c0_21 = arith.constant 0 : index
    %c0_22 = arith.constant 0 : index
    %c0_23 = arith.constant 0 : index
    %20 = vector.load %arg1[%c0_20, %c0_21, %c0_22, %c0_23] : memref<1x6x3x16xf32, #tpu.memory_space<vmem>>, vector<1x1x2x16xf32>
    %21 = vector.shape_cast %20 : vector<1x1x2x16xf32> to vector<2x16xf32>
    %22 = arith.truncf %21 : vector<2x16xf32> to vector<2x16xbf16>
    %cst_24 = arith.constant dense<0.000000e+00> : vector<2x32xf32>
    %23 = tpu.matmul %22, %2, %cst_24 {dimension_numbers = #tpu.dot_dimension_numbers<[1], [0], [0], [1], [0, 0, 1, 1], [], []>} : vector<2x16xbf16>, vector<16x32xbf16>, vector<2x32xf32> -> vector<2x32xf32>
    %24 = arith.addf %19, %23 : vector<2x32xf32>
    %c0_25 = arith.constant 0 : index
    %c0_26 = arith.constant 0 : index
    %c0_27 = arith.constant 0 : index
    %c0_28 = arith.constant 0 : index
    %25 = vector.load %arg2[%c0_25, %c0_26, %c0_27, %c0_28] : memref<1x6x3x16xf32, #tpu.memory_space<vmem>>, vector<1x1x2x16xf32>
    %26 = vector.shape_cast %25 : vector<1x1x2x16xf32> to vector<2x16xf32>
    %27 = arith.truncf %26 : vector<2x16xf32> to vector<2x16xbf16>
    %cst_29 = arith.constant dense<0.000000e+00> : vector<2x32xf32>
    %28 = tpu.matmul %27, %4, %cst_29 {dimension_numbers = #tpu.dot_dimension_numbers<[1], [0], [0], [1], [0, 0, 1, 1], [], []>} : vector<2x16xbf16>, vector<16x32xbf16>, vector<2x32xf32> -> vector<2x32xf32>
    %29 = arith.addf %24, %28 : vector<2x32xf32>
    %c0_30 = arith.constant 0 : index
    %c0_31 = arith.constant 0 : index
    %c1_32 = arith.constant 1 : index
    %c0_33 = arith.constant 0 : index
    %30 = vector.load %arg1[%c0_30, %c0_31, %c1_32, %c0_33] : memref<1x6x3x16xf32, #tpu.memory_space<vmem>>, vector<1x1x2x16xf32>
    %31 = vector.shape_cast %30 : vector<1x1x2x16xf32> to vector<2x16xf32>
    %32 = arith.truncf %31 : vector<2x16xf32> to vector<2x16xbf16>
    %cst_34 = arith.constant dense<0.000000e+00> : vector<2x32xf32>
    %33 = tpu.matmul %32, %6, %cst_34 {dimension_numbers = #tpu.dot_dimension_numbers<[1], [0], [0], [1], [0, 0, 1, 1], [], []>} : vector<2x16xbf16>, vector<16x32xbf16>, vector<2x32xf32> -> vector<2x32xf32>
    %34 = arith.addf %29, %33 : vector<2x32xf32>
    %c0_35 = arith.constant 0 : index
    %c1_36 = arith.constant 1 : index
    %c0_37 = arith.constant 0 : index
    %c0_38 = arith.constant 0 : index
    %35 = vector.load %arg1[%c0_35, %c1_36, %c0_37, %c0_38] : memref<1x6x3x16xf32, #tpu.memory_space<vmem>>, vector<1x1x2x16xf32>
    %36 = vector.shape_cast %35 : vector<1x1x2x16xf32> to vector<2x16xf32>
    %37 = arith.truncf %36 : vector<2x16xf32> to vector<2x16xbf16>
    %cst_39 = arith.constant dense<0.000000e+00> : vector<2x32xf32>
    %38 = tpu.matmul %37, %8, %cst_39 {dimension_numbers = #tpu.dot_dimension_numbers<[1], [0], [0], [1], [0, 0, 1, 1], [], []>} : vector<2x16xbf16>, vector<16x32xbf16>, vector<2x32xf32> -> vector<2x32xf32>
    %39 = arith.addf %34, %38 : vector<2x32xf32>
    %c0_40 = arith.constant 0 : index
    %c1_41 = arith.constant 1 : index
    %c0_42 = arith.constant 0 : index
    %c0_43 = arith.constant 0 : index
    %40 = vector.load %arg2[%c0_40, %c1_41, %c0_42, %c0_43] : memref<1x6x3x16xf32, #tpu.memory_space<vmem>>, vector<1x1x2x16xf32>
    %41 = vector.shape_cast %40 : vector<1x1x2x16xf32> to vector<2x16xf32>
    %42 = arith.truncf %41 : vector<2x16xf32> to vector<2x16xbf16>
    %cst_44 = arith.constant dense<0.000000e+00> : vector<2x32xf32>
    %43 = tpu.matmul %42, %10, %cst_44 {dimension_numbers = #tpu.dot_dimension_numbers<[1], [0], [0], [1], [0, 0, 1, 1], [], []>} : vector<2x16xbf16>, vector<16x32xbf16>, vector<2x32xf32> -> vector<2x32xf32>
    %44 = arith.addf %39, %43 : vector<2x32xf32>
    %c0_45 = arith.constant 0 : index
    %c1_46 = arith.constant 1 : index
    %c1_47 = arith.constant 1 : index
    %c0_48 = arith.constant 0 : index
    %45 = vector.load %arg1[%c0_45, %c1_46, %c1_47, %c0_48] : memref<1x6x3x16xf32, #tpu.memory_space<vmem>>, vector<1x1x2x16xf32>
    %46 = vector.shape_cast %45 : vector<1x1x2x16xf32> to vector<2x16xf32>
    %47 = arith.truncf %46 : vector<2x16xf32> to vector<2x16xbf16>
    %cst_49 = arith.constant dense<0.000000e+00> : vector<2x32xf32>
    %48 = tpu.matmul %47, %12, %cst_49 {dimension_numbers = #tpu.dot_dimension_numbers<[1], [0], [0], [1], [0, 0, 1, 1], [], []>} : vector<2x16xbf16>, vector<16x32xbf16>, vector<2x32xf32> -> vector<2x32xf32>
    %49 = arith.addf %44, %48 : vector<2x32xf32>
    %c0_50 = arith.constant 0 : index
    %c2_51 = arith.constant 2 : index
    %c0_52 = arith.constant 0 : index
    %c0_53 = arith.constant 0 : index
    %50 = vector.load %arg1[%c0_50, %c2_51, %c0_52, %c0_53] : memref<1x6x3x16xf32, #tpu.memory_space<vmem>>, vector<1x1x2x16xf32>
    %51 = vector.shape_cast %50 : vector<1x1x2x16xf32> to vector<2x16xf32>
    %52 = arith.truncf %51 : vector<2x16xf32> to vector<2x16xbf16>
    %cst_54 = arith.constant dense<0.000000e+00> : vector<2x32xf32>
    %53 = tpu.matmul %52, %14, %cst_54 {dimension_numbers = #tpu.dot_dimension_numbers<[1], [0], [0], [1], [0, 0, 1, 1], [], []>} : vector<2x16xbf16>, vector<16x32xbf16>, vector<2x32xf32> -> vector<2x32xf32>
    %54 = arith.addf %49, %53 : vector<2x32xf32>
    %c0_55 = arith.constant 0 : index
    %c2_56 = arith.constant 2 : index
    %c0_57 = arith.constant 0 : index
    %c0_58 = arith.constant 0 : index
    %55 = vector.load %arg2[%c0_55, %c2_56, %c0_57, %c0_58] : memref<1x6x3x16xf32, #tpu.memory_space<vmem>>, vector<1x1x2x16xf32>
    %56 = vector.shape_cast %55 : vector<1x1x2x16xf32> to vector<2x16xf32>
    %57 = arith.truncf %56 : vector<2x16xf32> to vector<2x16xbf16>
    %cst_59 = arith.constant dense<0.000000e+00> : vector<2x32xf32>
    %58 = tpu.matmul %57, %16, %cst_59 {dimension_numbers = #tpu.dot_dimension_numbers<[1], [0], [0], [1], [0, 0, 1, 1], [], []>} : vector<2x16xbf16>, vector<16x32xbf16>, vector<2x32xf32> -> vector<2x32xf32>
    %59 = arith.addf %54, %58 : vector<2x32xf32>
    %c0_60 = arith.constant 0 : index
    %c2_61 = arith.constant 2 : index
    %c1_62 = arith.constant 1 : index
    %c0_63 = arith.constant 0 : index
    %60 = vector.load %arg1[%c0_60, %c2_61, %c1_62, %c0_63] : memref<1x6x3x16xf32, #tpu.memory_space<vmem>>, vector<1x1x2x16xf32>
    %61 = vector.shape_cast %60 : vector<1x1x2x16xf32> to vector<2x16xf32>
    %62 = arith.truncf %61 : vector<2x16xf32> to vector<2x16xbf16>
    %cst_64 = arith.constant dense<0.000000e+00> : vector<2x32xf32>
    %63 = tpu.matmul %62, %18, %cst_64 {dimension_numbers = #tpu.dot_dimension_numbers<[1], [0], [0], [1], [0, 0, 1, 1], [], []>} : vector<2x16xbf16>, vector<16x32xbf16>, vector<2x32xf32> -> vector<2x32xf32>
    %64 = arith.addf %59, %63 : vector<2x32xf32>
    %65 = vector.broadcast %0 : vector<1x32xf32> to vector<2x32xf32>
    %66 = arith.addf %64, %65 : vector<2x32xf32>
    %cst_65 = arith.constant 0.000000e+00 : f32
    %67 = vector.broadcast %cst_65 : f32 to vector<2x32xf32>
    %68 = arith.maximumf %66, %67 : vector<2x32xf32>
    %c0_66 = arith.constant 0 : index
    %c0_67 = arith.constant 0 : index
    %c0_68 = arith.constant 0 : index
    %c0_69 = arith.constant 0 : index
    %69 = vector.load %arg5[%c0_66, %c0_67, %c0_68, %c0_69] : memref<1x2x2x32xf32, #tpu.memory_space<vmem>>, vector<1x1x2x32xf32>
    %70 = vector.shape_cast %69 : vector<1x1x2x32xf32> to vector<2x32xf32>
    %71 = vector.shape_cast %68 : vector<2x32xf32> to vector<1x1x2x32xf32>
    tpu.vector_store %arg5[%c0_66, %c0_67, %c0_68, %c0_69], %71 {strides = array<i32>} : memref<1x2x2x32xf32, #tpu.memory_space<vmem>>, vector<1x1x2x32xf32>,
    %cst_70 = arith.constant 0.000000e+00 : f32
    %72 = vector.broadcast %cst_70 : f32 to vector<2x32xf32>
    %c0_71 = arith.constant 0 : index
    %c2_72 = arith.constant 2 : index
    %c0_73 = arith.constant 0 : index
    %c0_74 = arith.constant 0 : index
    %73 = vector.load %arg1[%c0_71, %c2_72, %c0_73, %c0_74] : memref<1x6x3x16xf32, #tpu.memory_space<vmem>>, vector<1x1x2x16xf32>
    %74 = vector.shape_cast %73 : vector<1x1x2x16xf32> to vector<2x16xf32>
    %75 = arith.truncf %74 : vector<2x16xf32> to vector<2x16xbf16>
    %cst_75 = arith.constant dense<0.000000e+00> : vector<2x32xf32>
    %76 = tpu.matmul %75, %2, %cst_75 {dimension_numbers = #tpu.dot_dimension_numbers<[1], [0], [0], [1], [0, 0, 1, 1], [], []>} : vector<2x16xbf16>, vector<16x32xbf16>, vector<2x32xf32> -> vector<2x32xf32>
    %77 = arith.addf %72, %76 : vector<2x32xf32>
    %c0_76 = arith.constant 0 : index
    %c2_77 = arith.constant 2 : index
    %c0_78 = arith.constant 0 : index
    %c0_79 = arith.constant 0 : index
    %78 = vector.load %arg2[%c0_76, %c2_77, %c0_78, %c0_79] : memref<1x6x3x16xf32, #tpu.memory_space<vmem>>, vector<1x1x2x16xf32>
    %79 = vector.shape_cast %78 : vector<1x1x2x16xf32> to vector<2x16xf32>
    %80 = arith.truncf %79 : vector<2x16xf32> to vector<2x16xbf16>
    %cst_80 = arith.constant dense<0.000000e+00> : vector<2x32xf32>
    %81 = tpu.matmul %80, %4, %cst_80 {dimension_numbers = #tpu.dot_dimension_numbers<[1], [0], [0], [1], [0, 0, 1, 1], [], []>} : vector<2x16xbf16>, vector<16x32xbf16>, vector<2x32xf32> -> vector<2x32xf32>
    %82 = arith.addf %77, %81 : vector<2x32xf32>
    %c0_81 = arith.constant 0 : index
    %c2_82 = arith.constant 2 : index
    %c1_83 = arith.constant 1 : index
    %c0_84 = arith.constant 0 : index
    %83 = vector.load %arg1[%c0_81, %c2_82, %c1_83, %c0_84] : memref<1x6x3x16xf32, #tpu.memory_space<vmem>>, vector<1x1x2x16xf32>
    %84 = vector.shape_cast %83 : vector<1x1x2x16xf32> to vector<2x16xf32>
    %85 = arith.truncf %84 : vector<2x16xf32> to vector<2x16xbf16>
    %cst_85 = arith.constant dense<0.000000e+00> : vector<2x32xf32>
    %86 = tpu.matmul %85, %6, %cst_85 {dimension_numbers = #tpu.dot_dimension_numbers<[1], [0], [0], [1], [0, 0, 1, 1], [], []>} : vector<2x16xbf16>, vector<16x32xbf16>, vector<2x32xf32> -> vector<2x32xf32>
    %87 = arith.addf %82, %86 : vector<2x32xf32>
    %c0_86 = arith.constant 0 : index
    %c3_87 = arith.constant 3 : index
    %c0_88 = arith.constant 0 : index
    %c0_89 = arith.constant 0 : index
    %88 = vector.load %arg1[%c0_86, %c3_87, %c0_88, %c0_89] : memref<1x6x3x16xf32, #tpu.memory_space<vmem>>, vector<1x1x2x16xf32>
    %89 = vector.shape_cast %88 : vector<1x1x2x16xf32> to vector<2x16xf32>
    %90 = arith.truncf %89 : vector<2x16xf32> to vector<2x16xbf16>
    %cst_90 = arith.constant dense<0.000000e+00> : vector<2x32xf32>
    %91 = tpu.matmul %90, %8, %cst_90 {dimension_numbers = #tpu.dot_dimension_numbers<[1], [0], [0], [1], [0, 0, 1, 1], [], []>} : vector<2x16xbf16>, vector<16x32xbf16>, vector<2x32xf32> -> vector<2x32xf32>
    %92 = arith.addf %87, %91 : vector<2x32xf32>
    %c0_91 = arith.constant 0 : index
    %c3_92 = arith.constant 3 : index
    %c0_93 = arith.constant 0 : index
    %c0_94 = arith.constant 0 : index
    %93 = vector.load %arg2[%c0_91, %c3_92, %c0_93, %c0_94] : memref<1x6x3x16xf32, #tpu.memory_space<vmem>>, vector<1x1x2x16xf32>
    %94 = vector.shape_cast %93 : vector<1x1x2x16xf32> to vector<2x16xf32>
    %95 = arith.truncf %94 : vector<2x16xf32> to vector<2x16xbf16>
    %cst_95 = arith.constant dense<0.000000e+00> : vector<2x32xf32>
    %96 = tpu.matmul %95, %10, %cst_95 {dimension_numbers = #tpu.dot_dimension_numbers<[1], [0], [0], [1], [0, 0, 1, 1], [], []>} : vector<2x16xbf16>, vector<16x32xbf16>, vector<2x32xf32> -> vector<2x32xf32>
    %97 = arith.addf %92, %96 : vector<2x32xf32>
    %c0_96 = arith.constant 0 : index
    %c3_97 = arith.constant 3 : index
    %c1_98 = arith.constant 1 : index
    %c0_99 = arith.constant 0 : index
    %98 = vector.load %arg1[%c0_96, %c3_97, %c1_98, %c0_99] : memref<1x6x3x16xf32, #tpu.memory_space<vmem>>, vector<1x1x2x16xf32>
    %99 = vector.shape_cast %98 : vector<1x1x2x16xf32> to vector<2x16xf32>
    %100 = arith.truncf %99 : vector<2x16xf32> to vector<2x16xbf16>
    %cst_100 = arith.constant dense<0.000000e+00> : vector<2x32xf32>
    %101 = tpu.matmul %100, %12, %cst_100 {dimension_numbers = #tpu.dot_dimension_numbers<[1], [0], [0], [1], [0, 0, 1, 1], [], []>} : vector<2x16xbf16>, vector<16x32xbf16>, vector<2x32xf32> -> vector<2x32xf32>
    %102 = arith.addf %97, %101 : vector<2x32xf32>
    %c0_101 = arith.constant 0 : index
    %c4_102 = arith.constant 4 : index
    %c0_103 = arith.constant 0 : index
    %c0_104 = arith.constant 0 : index
    %103 = vector.load %arg1[%c0_101, %c4_102, %c0_103, %c0_104] : memref<1x6x3x16xf32, #tpu.memory_space<vmem>>, vector<1x1x2x16xf32>
    %104 = vector.shape_cast %103 : vector<1x1x2x16xf32> to vector<2x16xf32>
    %105 = arith.truncf %104 : vector<2x16xf32> to vector<2x16xbf16>
    %cst_105 = arith.constant dense<0.000000e+00> : vector<2x32xf32>
    %106 = tpu.matmul %105, %14, %cst_105 {dimension_numbers = #tpu.dot_dimension_numbers<[1], [0], [0], [1], [0, 0, 1, 1], [], []>} : vector<2x16xbf16>, vector<16x32xbf16>, vector<2x32xf32> -> vector<2x32xf32>
    %107 = arith.addf %102, %106 : vector<2x32xf32>
    %c0_106 = arith.constant 0 : index
    %c4_107 = arith.constant 4 : index
    %c0_108 = arith.constant 0 : index
    %c0_109 = arith.constant 0 : index
    %108 = vector.load %arg2[%c0_106, %c4_107, %c0_108, %c0_109] : memref<1x6x3x16xf32, #tpu.memory_space<vmem>>, vector<1x1x2x16xf32>
    %109 = vector.shape_cast %108 : vector<1x1x2x16xf32> to vector<2x16xf32>
    %110 = arith.truncf %109 : vector<2x16xf32> to vector<2x16xbf16>
    %cst_110 = arith.constant dense<0.000000e+00> : vector<2x32xf32>
    %111 = tpu.matmul %110, %16, %cst_110 {dimension_numbers = #tpu.dot_dimension_numbers<[1], [0], [0], [1], [0, 0, 1, 1], [], []>} : vector<2x16xbf16>, vector<16x32xbf16>, vector<2x32xf32> -> vector<2x32xf32>
    %112 = arith.addf %107, %111 : vector<2x32xf32>
    %c0_111 = arith.constant 0 : index
    %c4_112 = arith.constant 4 : index
    %c1_113 = arith.constant 1 : index
    %c0_114 = arith.constant 0 : index
    %113 = vector.load %arg1[%c0_111, %c4_112, %c1_113, %c0_114] : memref<1x6x3x16xf32, #tpu.memory_space<vmem>>, vector<1x1x2x16xf32>
    %114 = vector.shape_cast %113 : vector<1x1x2x16xf32> to vector<2x16xf32>
    %115 = arith.truncf %114 : vector<2x16xf32> to vector<2x16xbf16>
    %cst_115 = arith.constant dense<0.000000e+00> : vector<2x32xf32>
    %116 = tpu.matmul %115, %18, %cst_115 {dimension_numbers = #tpu.dot_dimension_numbers<[1], [0], [0], [1], [0, 0, 1, 1], [], []>} : vector<2x16xbf16>, vector<16x32xbf16>, vector<2x32xf32> -> vector<2x32xf32>
    %117 = arith.addf %112, %116 : vector<2x32xf32>
    %118 = vector.broadcast %0 : vector<1x32xf32> to vector<2x32xf32>
    %119 = arith.addf %117, %118 : vector<2x32xf32>
    %cst_116 = arith.constant 0.000000e+00 : f32
    %120 = vector.broadcast %cst_116 : f32 to vector<2x32xf32>
    %121 = arith.maximumf %119, %120 : vector<2x32xf32>
    %c0_117 = arith.constant 0 : index
    %c1_118 = arith.constant 1 : index
    %c0_119 = arith.constant 0 : index
    %c0_120 = arith.constant 0 : index
    %122 = vector.load %arg5[%c0_117, %c1_118, %c0_119, %c0_120] : memref<1x2x2x32xf32, #tpu.memory_space<vmem>>, vector<1x1x2x32xf32>
    %123 = vector.shape_cast %122 : vector<1x1x2x32xf32> to vector<2x32xf32>
    %124 = vector.shape_cast %121 : vector<2x32xf32> to vector<1x1x2x32xf32>
    tpu.vector_store %arg5[%c0_117, %c1_118, %c0_119, %c0_120], %124 {strides = array<i32>} : memref<1x2x2x32xf32, #tpu.memory_space<vmem>>, vector<1x1x2x32xf32>,
    return
  }
  func.func @transform_0(%arg0: i32) -> (i32, i32, i32, i32) {
    %c0_i32 = arith.constant 0 : i32
    %c0_i32_0 = arith.constant 0 : i32
    %c0_i32_1 = arith.constant 0 : i32
    %c0_i32_2 = arith.constant 0 : i32
    return %arg0, %c0_i32, %c0_i32_0, %c0_i32_1 : i32, i32, i32, i32
  }
  func.func @transform_1(%arg0: i32) -> (i32, i32, i32, i32) {
    %c0_i32 = arith.constant 0 : i32
    %c0_i32_0 = arith.constant 0 : i32
    %c0_i32_1 = arith.constant 0 : i32
    %c0_i32_2 = arith.constant 0 : i32
    return %arg0, %c0_i32, %c0_i32_0, %c0_i32_1 : i32, i32, i32, i32
  }
  func.func @transform_2(%arg0: i32) -> (i32, i32, i32) {
    %c0_i32 = arith.constant 0 : i32
    %c0_i32_0 = arith.constant 0 : i32
    %c0_i32_1 = arith.constant 0 : i32
    %c0_i32_2 = arith.constant 0 : i32
    return %c0_i32, %c0_i32_0, %c0_i32_1 : i32, i32, i32
  }
  func.func @transform_3(%arg0: i32) -> (i32, i32) {
    %c0_i32 = arith.constant 0 : i32
    %c0_i32_0 = arith.constant 0 : i32
    %c0_i32_1 = arith.constant 0 : i32
    return %c0_i32, %c0_i32_0 : i32, i32
  }
  func.func @transform_4(%arg0: i32) -> (i32, i32, i32, i32) {
    %c0_i32 = arith.constant 0 : i32
    %c0_i32_0 = arith.constant 0 : i32
    %c0_i32_1 = arith.constant 0 : i32
    %c0_i32_2 = arith.constant 0 : i32
    return %arg0, %c0_i32, %c0_i32_0, %c0_i32_1 : i32, i32, i32, i32
  }
}

</mosaic_0001>

<bundles_post_ra>
// kernel: _lambda_.5
= control target key start
LH: loop header
LB: loop body
LE: loop exit
PB: predicated region body
PF: predicated region fallthrough
CT: control target
= control target key end

     0   :  { %9 = vsyncpa [#allocation3], 0  ;;  %s1855_s0 = inlined_call_operand.vmem [shape: f32[2,6,3,16], index: 0, kind: input, shape index: {}]   ;;  %s1856_s1 = inlined_call_operand.vmem [shape: f32[2,6,3,16], index: 1, kind: input, shape index: {}]   ;;  %s1857_s2 = inlined_call_operand.vmem [shape: bf16[9,16,32], index: 2, kind: input, shape index: {}]   ;;  %s1858_s3 = inlined_call_operand.vmem [shape: f32[1,32], index: 3, kind: input, shape index: {}]   ;;  %s1859_s4 = inlined_call_operand.hbm [shape: f32[2,2,2,32], index: 4, kind: output, shape index: {}]  }
   0x1   :  { %11 = vsyncpa [#allocation3 + $0x1], 0  ;;  %s1595_s15 = smov 0   ;;  %s1597_s16 = smov 0  }
   0x2   :  { %s1599_s17 = smov 0   ;;  %s1601_s18 = smov 0  }
   0x3 LB: > { %s1616_s19 = sadd.s32 4294967295, %s1563_s18   ;;  %s1233_s20 = sadd.s32 4294967294, %s1563_s18   ;;  %s1563_s18 = sphi %s1601_s18, %s1865_s18   ;;  %s1559_s17 = sphi %s1599_s17, %s1864_s17   ;;  %s1555_s16 = sphi %s1597_s16, %s1863_s16   ;;  %s1551_s15 = sphi %s1595_s15, %s1862_s15  }
   0x4   : > { %s1620_s21 = sadd.s32 1, %s1563_s18   ;;  %s118_s22 = sadd.s32 1, %s1559_s17 }
   0x5   : > { %s115_s23 = ssub.s32 %s1563_s18, %s1620_s21  ;;  %p128_p0 = scmp.ne.s32.totalorder %s1559_s17, %s1555_s16 }
   0x6   : > { %p116_p1 = scmp.eq.s32.totalorder %s115_s23, 0  ;;  %p129_p2 = scmp.eq.s32.totalorder %s1616_s19, 1 }
   0x7   : > { %p134_p3 = scmp.ne.s32.totalorder %s1555_s16, %s1551_s15  ;;  %p135_p4 = scmp.eq.s32.totalorder %s1233_s20, 1 }
   0x8   : > { %s1631_s24 = scalar_select %p116_p1, %s1559_s17, %s118_s22  }
   0x9   : > { %p1633_p5 = por %p129_p2, %p128_p0  ;;  %p1637_p6 = por %p135_p4, %p134_p3 }
   0xa   : > { %p1236_p7 = scmp.ge.s32.totalorder %s1563_s18, 1  ;;  %p175_p8 = scmp.lt.s32.totalorder %s1563_s18, 3 }
   0xc   : > { %p176_p9 = pnand %p1236_p7, %p175_p8 }
   0xd   : > { %p206_p10 = scmp.lt.s32.totalorder (!%p176_p9), %s1616_s19, 1  ;;  %s1305_s20 = sshll.u32 (!%p176_p9), %s1616_s19, 6 }
   0xe   : > { %179 = sbr.rel (%p176_p9) target bundleno = 306 (0x132), region = 36  ;;  %s1807_s28 = scalar_lea.hbm (!%p176_p9), %s1859_s4, %s1305_s20 }
   0xf   : > { %s1567_s30 = smov (!%p176_p9), [#allocation2]  }
  0x13   : > { %v1646_v0 = vld [vmem:[%s1857_s2 + $0x8] sm:$0xff]   ;;  %v1565_v1 = vmov 0.0   ;;  %v1653_v2 = vld [vmem:[%s1857_s2] sm:$0xff]   ;;  %vm1566_vm0 = vmmov 0   ;;  %s207_s5 = scalar_select %p206_p10, %s1616_s19, 1  ;;  %v1496_v3 = vld [vmem:[%s1857_s2 + $0x10] sm:$0xff]  }
  0x14   : > { %1342 = vmatprep.subr.bf16.mxu0 %v1565_v1  ;;  %1348 = vmatprep.subr.bf16.mxu1 %v1565_v1  ;;  %vm254_vm1 = vcmask 130048   ;;  %v1683_v6 = vld [vmem:[%s1857_s2 + $0x18] sm:$0xff]   ;;  %v1498_v13 = vld [vmem:[%s1857_s2 + $0x20] sm:$0xff]   ;;  %v1702_v14 = vld [vmem:[%s1857_s2 + $0x28] sm:$0xff]   ;;  %vm723_vm2 = vcmask 254976  }
  0x15   : > { %1343 = vmatpush3.bf16.msra.mxu0 %v1646_v0  ;;  %1344 = vmatprep.mubr.msk.bf16.mxu0 %vm1566_vm0, %v1565_v1  ;;  %s1450_s6 = smul.u32 24, %s207_s5  ;;  %v1500_v19 = vld [vmem:[%s1857_s2 + $0x30] sm:$0xff]   ;;  %v1721_v20 = vld [vmem:[%s1857_s2 + $0x38] sm:$0xff]   ;;  %v1502_v25 = vld [vmem:[%s1857_s2 + $0x40] sm:$0xff]   ;;  %s1507_s5 = sshll.u32 %s1567_s30, 4  ;;  %s1508_s5 = int_to_ptr.vmem [resolvable:$false] %s1507_s5 }
  0x16   : > { %1349 = vmatpush3.bf16.msra.mxu1 %v1653_v2  ;;  %1350 = vmatprep.mubr.msk.bf16.mxu1 %vm1566_vm0, %v1565_v1 }
  0x17   : > { %1354 = vmatprep.subr.bf16.mxu0 %v1565_v1  ;;  %1360 = vmatprep.subr.bf16.mxu1 %v1565_v1  ;;  %s1668_s9 = scalar_lea.vmem %s1855_s0, %s1450_s6  ;;  %s1673_s12 = scalar_lea.vmem %s1856_s1, %s1450_s6 }
  0x18   : > { %v246_v4 = vld [vmem:[%s1673_s12] sm:$0x3]  ;;  %v1262_v10 = vld [vmem:[%s1668_s9 + $0x4] sm:$0x3]  ;;  %v1271_v21 = vld [vmem:[%s1668_s9 + $0x8] sm:$0x3] }
  0x19   : > { %v244_v5 = vld [vmem:[%s1668_s9] sm:$0x3]  ;;  %v247_v7 = vpack.c.bf16 %v246_v4, %v246_v4  ;;  %v401_v12 = vpack.c.bf16 %v1262_v10, %v1262_v10  ;;  %v1265_v15 = vld [vmem:[%s1673_s12 + $0x4] sm:$0x3]  ;;  %v1274_v22 = vld [vmem:[%s1673_s12 + $0x8] sm:$0x3]  ;;  %v559_v23 = vpack.c.bf16 %v1271_v21, %v1271_v21 }
  0x1a   : > { %v245_v8 = vpack.c.bf16 %v244_v5, %v244_v5  ;;  %v347_v9 = vld [vmem:[%s1668_s9 + $0x1] sm:$0x3]  ;;  %v1268_v16 = vld [vmem:[%s1668_s9 + $0x5] sm:$0x3]  ;;  %v454_v17 = vpack.c.bf16 %v1265_v15, %v1265_v15  ;;  %v612_v24 = vpack.c.bf16 %v1274_v22, %v1274_v22  ;;  %v1277_v26 = vld [vmem:[%s1668_s9 + $0x9] sm:$0x3] }
  0x1b   : > { %1345 = vmatmul.mubr.msk.bf16.vlgmr.msra.gmra.mxu0 %vm254_vm1, %v247_v7  ;;  %v348_v11 = vpack.c.bf16 %v347_v9, %v347_v9  ;;  %v506_v18 = vpack.c.bf16 %v1268_v16, %v1268_v16  ;;  %v1282_v27 = vld [vmem:[%s1673_s12 + $0x8] sm:$0x3]  ;;  %v664_v28 = vpack.c.bf16 %v1277_v26, %v1277_v26  ;;  %v1287_v34 = vld [vmem:[%s1668_s9 + $0xc] sm:$0x3]  ;;  %v1293_v39 = vld [vmem:[%s1668_s9 + $0x10] sm:$0x3] }
  0x1c   : > { %1351 = vmatmul.mubr.msk.bf16.vlgmr.msra.gmra.mxu1 %vm254_vm1, %v245_v8  ;;  %1355 = vmatpush3.bf16.msra.mxu0 %v1496_v3  ;;  %v728_v29 = vpack.c.bf16 %v1282_v27, %v1282_v27  ;;  %v1281_v30 = vld [vmem:[%s1668_s9 + $0x8] sm:$0x3]  ;;  %v1289_v35 = vld [vmem:[%s1673_s12 + $0xc] sm:$0x3]  ;;  %v863_v36 = vpack.c.bf16 %v1287_v34, %v1287_v34  ;;  %v1003_v41 = vpack.c.bf16 %v1293_v39, %v1293_v39  ;;  %v1295_v42 = vld [vmem:[%s1673_s12 + $0x10] sm:$0x3] }
  0x1d   : > { %1361 = vmatpush3.bf16.msra.mxu1 %v1683_v6  ;;  %1356 = vmatprep.mubr.msk.bf16.mxu0 %vm1566_vm0, %v1565_v1  ;;  %v1285_v31 = vld [vmem:[%s1668_s9 + $0x9] sm:$0x3]  ;;  %v726_v32 = vpack.c.bf16 %v1281_v30, %v1281_v30  ;;  %v910_v37 = vpack.c.bf16 %v1289_v35, %v1289_v35  ;;  %v1291_v38 = vld [vmem:[%s1668_s9 + $0xd] sm:$0x3]  ;;  %v1297_v43 = vld [vmem:[%s1668_s9 + $0x11] sm:$0x3]  ;;  %v1050_v44 = vpack.c.bf16 %v1295_v42, %v1295_v42 }
  0x1e   : > { %1362 = vmatprep.mubr.msk.bf16.mxu1 %vm1566_vm0, %v1565_v1  ;;  %1366 = vmatprep.subr.bf16.mxu0 %v1565_v1  ;;  %v816_v33 = vpack.c.bf16 %v1285_v31, %v1285_v31  ;;  %v956_v40 = vpack.c.bf16 %v1291_v38, %v1291_v38  ;;  %v1096_v45 = vpack.c.bf16 %v1297_v43, %v1297_v43  ;;  %s203_s9 = sand.u32 1, %s1555_s16   ;;  %v1280_v21 = vld [vmem:[%s1858_s3] ss:$0 sm:$0xff]  ;;  %s1509_s6 = scalar_lea.vmem %s1508_s5, 128 }
  0x1f   : > { %1372 = vmatprep.subr.bf16.mxu1 %v1565_v1  ;;  %s1237_s13 = sshll.u32 %s203_s9, 2  ;;  %s1815_s19 = scalar_lea.sflag [#allocation3], %s203_s9 }
  0x20   : > { %s1798_s14 = scalar_lea.vmem [#allocation2], %s1237_s13 }
  0x21   : > { %s1159_s22 = sshll.u32 %s1798_s14, 4  ;;  %s1809_s22 = int_to_ptr.vmem [resolvable:$true] %s1159_s22 }
  0x22   : > { %s1503_s29 = scalar_lea.vmem %s1809_s22, 64  ;;  %p1510_p0 = scmp.lt.s32.totalorder %s1809_s22, %s1508_s5 }
  0x23   : > { %1357 = vmatmul.mubr.msk.bf16.vlgmr.msra.gmra.mxu0 %vm254_vm1, %v348_v11  ;;  %p1504_p11 = scmp.ne.s32.totalorder %s1809_s22, %s1503_s29  ;;  %p1511_p1 = scmp.lt.s32.totalorder %s1509_s6, %s1503_s29 }
  0x24   : > { %1363 = vmatmul.mubr.msk.bf16.vlgmr.msra.gmra.mxu1 %vm254_vm1, %v401_v12  ;;  %1367 = vmatpush3.bf16.msra.mxu0 %v1498_v13 }
  0x25   : > { %1373 = vmatpush3.bf16.msra.mxu1 %v1702_v14  ;;  %1368 = vmatprep.mubr.msk.bf16.mxu0 %vm1566_vm0, %v1565_v1  ;;  %p1505_p12 = pnand %p1504_p11, %p1633_p5  ;;  %p1512_p2 = por %p1511_p1, %p1510_p0 }
  0x26   : > { %1374 = vmatprep.mubr.msk.bf16.mxu1 %vm1566_vm0, %v1565_v1  ;;  %1378 = vmatprep.subr.bf16.mxu0 %v1565_v1 }
  0x27   : > { %1384 = vmatprep.subr.bf16.mxu1 %v1565_v1  ;;  %p1506_p13 = pneg %p1505_p12 }
  0x29   : > { %p1513_p3 = pnand %p1512_p2, %p1506_p13 }
  0x2b   : > { %1369 = vmatmul.mubr.msk.bf16.vlgmr.msra.gmra.mxu0 %vm254_vm1, %v454_v17 }
  0x2c   : > { %1375 = vmatmul.mubr.msk.bf16.vlgmr.msra.gmra.mxu1 %vm254_vm1, %v506_v18  ;;  %1379 = vmatpush3.bf16.msra.mxu0 %v1500_v19 }
  0x2d   : > { %1385 = vmatpush3.bf16.msra.mxu1 %v1721_v20  ;;  %1380 = vmatprep.mubr.msk.bf16.mxu0 %vm1566_vm0, %v1565_v1 }
  0x2e   : > { %1386 = vmatprep.mubr.msk.bf16.mxu1 %vm1566_vm0, %v1565_v1  ;;  %1390 = vmatprep.subr.bf16.mxu0 %v1565_v1 }
  0x2f   : > { %1396 = vmatprep.subr.bf16.mxu1 %v1565_v1 }
  0x33   : > { %1381 = vmatmul.mubr.msk.bf16.vlgmr.msra.gmra.mxu0 %vm254_vm1, %v559_v23 }
  0x34   : > { %1387 = vmatmul.mubr.msk.bf16.vlgmr.msra.gmra.mxu1 %vm254_vm1, %v612_v24  ;;  %1391 = vmatpush3.bf16.msra.mxu0 %v1502_v25 }
  0x35   : > { %1397 = vmatpush3.bf16.msra.mxu1 %v1646_v0  ;;  %1392 = vmatprep.mubr.msk.bf16.mxu0 %vm1566_vm0, %v1565_v1 }
  0x36   : > { %1398 = vmatprep.mubr.msk.bf16.mxu1 %vm1566_vm0, %v1565_v1  ;;  %1402 = vmatprep.subr.bf16.mxu0 %v1565_v1 }
  0x37   : > { %1408 = vmatprep.subr.bf16.mxu1 %v1565_v1 }
  0x3b   : > { %1393 = vmatmul.mubr.msk.bf16.vlgmr.msra.gmra.mxu0 %vm254_vm1, %v664_v28 }
  0x3c   : > { %1399 = vmatmul.mubr.msk.bf16.vlgmr.msra.gmra.mxu1 %vm254_vm1, %v728_v29  ;;  %1403 = vmatpush3.bf16.msra.mxu0 %v1653_v2 }
  0x3d   : > { %1409 = vmatpush3.bf16.msra.mxu1 %v1496_v3  ;;  %1404 = vmatprep.mubr.msk.bf16.mxu0 %vm1566_vm0, %v1565_v1 }
  0x3e   : > { %1410 = vmatprep.mubr.msk.bf16.mxu1 %vm1566_vm0, %v1565_v1  ;;  %1414 = vmatprep.subr.bf16.mxu0 %v1565_v1 }
  0x3f   : > { %1420 = vmatprep.subr.bf16.mxu1 %v1565_v1 }
  0x43   : > { %1405 = vmatmul.mubr.msk.bf16.vlgmr.msra.gmra.mxu0 %vm254_vm1, %v726_v32 }
  0x44   : > { %1411 = vmatmul.mubr.msk.bf16.vlgmr.msra.gmra.mxu1 %vm254_vm1, %v816_v33  ;;  %1415 = vmatpush3.bf16.msra.mxu0 %v1683_v6 }
  0x45   : > { %1421 = vmatpush3.bf16.msra.mxu1 %v1498_v13  ;;  %1416 = vmatprep.mubr.msk.bf16.mxu0 %vm1566_vm0, %v1565_v1 }
  0x46   : > { %1422 = vmatprep.mubr.msk.bf16.mxu1 %vm1566_vm0, %v1565_v1  ;;  %1426 = vmatprep.subr.bf16.mxu0 %v1565_v1 }
  0x47   : > { %1432 = vmatprep.subr.bf16.mxu1 %v1565_v1 }
  0x4b   : > { %1417 = vmatmul.mubr.msk.bf16.vlgmr.msra.gmra.mxu0 %vm254_vm1, %v863_v36 }
  0x4c   : > { %1423 = vmatmul.mubr.msk.bf16.vlgmr.msra.gmra.mxu1 %vm254_vm1, %v910_v37  ;;  %1427 = vmatpush3.bf16.msra.mxu0 %v1702_v14 }
  0x4d   : > { %1433 = vmatpush3.bf16.msra.mxu1 %v1500_v19  ;;  %1428 = vmatprep.mubr.msk.bf16.mxu0 %vm1566_vm0, %v1565_v1 }
  0x4e   : > { %1434 = vmatprep.mubr.msk.bf16.mxu1 %vm1566_vm0, %v1565_v1  ;;  %1438 = vmatprep.subr.bf16.mxu0 %v1565_v1 }
  0x4f   : > { %1444 = vmatprep.subr.bf16.mxu1 %v1565_v1 }
  0x53   : > { %1429 = vmatmul.mubr.msk.bf16.vlgmr.msra.gmra.mxu0 %vm254_vm1, %v956_v40 }
  0x54   : > { %1435 = vmatmul.mubr.msk.bf16.vlgmr.msra.gmra.mxu1 %vm254_vm1, %v1003_v41  ;;  %1439 = vmatpush3.bf16.msra.mxu0 %v1721_v20 }
  0x55   : > { %1445 = vmatpush3.bf16.msra.mxu1 %v1502_v25  ;;  %1440 = vmatprep.mubr.msk.bf16.mxu0 %vm1566_vm0, %v1565_v1 }
  0x56   : > { %1446 = vmatprep.mubr.msk.bf16.mxu1 %vm1566_vm0, %v1565_v1 }
  0x5b   : > { %1441 = vmatmul.mubr.msk.bf16.vlgmr.msra.gmra.mxu0 %vm254_vm1, %v1050_v44 }
  0x5c   : > { %1447 = vmatmul.mubr.msk.bf16.vlgmr.msra.gmra.mxu1 %vm254_vm1, %v1096_v45 }
  0xdb   : > { %v292_v46 = vpop.f32.mrf.mxu0 }
  0xdc   : > { %v341_v47 = vpop.f32.mrf.mxu1 }
  0xdd   : > { %v1346_v48 = vpop.f32.mrf.mxu0  ;;  %v342_v60 = vadd.f32 %v341_v47, %v292_v46 }
  0xde   : > { %v1352_v49 = vpop.f32.mrf.mxu1 }
  0xdf   : > { %v295_v50 = vpop.f32.mrf.mxu0 }
  0xe0   : > { %v344_v51 = vpop.f32.mrf.mxu1 }
  0xe1   : > { %v1347_v52 = vpop.f32.mrf.mxu0 }
  0xe2   : > { %v1353_v53 = vpop.f32.mrf.mxu1 }
  0xe3   : > { %v392_v54 = vpop.f32.mrf.mxu0 }
  0xe4   : > { %v445_v55 = vpop.f32.mrf.mxu1  ;;  %v398_v63 = vadd.f32 %v392_v54, %v342_v60 }
  0xe5   : > { %v1358_v56 = vpop.f32.mrf.mxu0 }
  0xe6   : > { %v1364_v57 = vpop.f32.mrf.mxu1  ;;  %v451_v4 = vadd.f32 %v445_v55, %v398_v63 }
  0xe7   : > { %v395_v58 = vpop.f32.mrf.mxu0 }
  0xe8   : > { %v448_v59 = vpop.f32.mrf.mxu1 }
  0xe9   : > { %v1359_v61 = vpop.f32.mrf.mxu0 }
  0xea   : > { %v1365_v62 = vpop.f32.mrf.mxu1 }
  0xeb   : > { %v498_v0 = vpop.f32.mrf.mxu0 }
  0xec   : > { %v550_v1 = vpop.f32.mrf.mxu1  ;;  %v504_v7 = vadd.f32 %v498_v0, %v451_v4 }
  0xed   : > { %v1370_v2 = vpop.f32.mrf.mxu0 }
  0xee   : > { %v1376_v3 = vpop.f32.mrf.mxu1  ;;  %v556_v12 = vadd.f32 %v550_v1, %v504_v7 }
  0xef   : > { %v501_v5 = vpop.f32.mrf.mxu0 }
  0xf0   : > { %v553_v6 = vpop.f32.mrf.mxu1 }
  0xf1   : > { %v1371_v8 = vpop.f32.mrf.mxu0 }
  0xf2   : > { %v1377_v9 = vpop.f32.mrf.mxu1 }
  0xf3   : > { %v603_v10 = vpop.f32.mrf.mxu0 }
  0xf4   : > { %v656_v11 = vpop.f32.mrf.mxu1  ;;  %v609_v15 = vadd.f32 %v603_v10, %v556_v12 }
  0xf5   : > { %v1382_v13 = vpop.f32.mrf.mxu0 }
  0xf6   : > { %v1388_v14 = vpop.f32.mrf.mxu1  ;;  %v662_v20 = vadd.f32 %v656_v11, %v609_v15 }
  0xf7   : > { %v606_v16 = vpop.f32.mrf.mxu0 }
  0xf8   : > { %v659_v17 = vpop.f32.mrf.mxu1 }
  0xf9   : > { %v1383_v18 = vpop.f32.mrf.mxu0 }
  0xfa   : > { %v1389_v19 = vpop.f32.mrf.mxu1 }
  0xfb   : > { %v708_v22 = vpop.f32.mrf.mxu0 }
  0xfc   : > { %v766_v23 = vpop.f32.mrf.mxu1  ;;  %v714_v24 = vadd.f32 %v708_v22, %v662_v20 }
  0xfd   : > { %v1394_v25 = vpop.f32.mrf.mxu0 }
  0xfe   : > { %v1400_v26 = vpop.f32.mrf.mxu1  ;;  %v721_v27 = vadd.f32 %v1280_v21, %v714_v24 }
  0xff   : > { %v711_v28 = vpop.f32.mrf.mxu0 }
 0x100   : > { %v769_v29 = vpop.f32.mrf.mxu1  ;;  %v722_v30 = vmax.f32 %v721_v27, 0.0 }
 0x101   : > { %v1395_v31 = vpop.f32.mrf.mxu0 }
 0x102   : > { %v1401_v32 = vpop.f32.mrf.mxu1  ;;  %724 = vst.msk [vmem:[%s1798_s14] sm:$0x3] %vm723_vm2, %v722_v30 }
 0x103   : > { %v809_v33 = vpop.f32.mrf.mxu0 }
 0x104   : > { %v854_v34 = vpop.f32.mrf.mxu1  ;;  %v810_v41 = vadd.f32 %v809_v33, %v766_v23 }
 0x105   : > { %v1406_v35 = vpop.f32.mrf.mxu0 }
 0x106   : > { %v1412_v36 = vpop.f32.mrf.mxu1  ;;  %v860_v46 = vadd.f32 %v854_v34, %v810_v41 }
 0x107   : > { %v812_v37 = vpop.f32.mrf.mxu0 }
 0x108   : > { %v857_v38 = vpop.f32.mrf.mxu1 }
 0x109   : > { %v1407_v39 = vpop.f32.mrf.mxu0 }
 0x10a   : > { %v1413_v40 = vpop.f32.mrf.mxu1 }
 0x10b   : > { %v901_v42 = vpop.f32.mrf.mxu0 }
 0x10c   : > { %v948_v43 = vpop.f32.mrf.mxu1  ;;  %v907_v49 = vadd.f32 %v901_v42, %v860_v46 }
 0x10d   : > { %v1418_v44 = vpop.f32.mrf.mxu0 }
 0x10e   : > { %v1424_v45 = vpop.f32.mrf.mxu1  ;;  %v954_v54 = vadd.f32 %v948_v43, %v907_v49 }
 0x10f   : > { %v904_v47 = vpop.f32.mrf.mxu0 }
 0x110   : > { %v951_v48 = vpop.f32.mrf.mxu1 }
 0x111   : > { %v1419_v50 = vpop.f32.mrf.mxu0 }
 0x112   : > { %v1425_v51 = vpop.f32.mrf.mxu1 }
 0x113   : > { %v994_v52 = vpop.f32.mrf.mxu0 }
 0x114   : > { %v1041_v53 = vpop.f32.mrf.mxu1  ;;  %v1000_v57 = vadd.f32 %v994_v52, %v954_v54 }
 0x115   : > { %v1430_v55 = vpop.f32.mrf.mxu0 }
 0x116   : > { %v1436_v56 = vpop.f32.mrf.mxu1  ;;  %v1047_v62 = vadd.f32 %v1041_v53, %v1000_v57 }
 0x117   : > { %v997_v58 = vpop.f32.mrf.mxu0 }
 0x118   : > { %v1044_v59 = vpop.f32.mrf.mxu1 }
 0x119   : > { %v1431_v60 = vpop.f32.mrf.mxu0 }
 0x11a   : > { %v1437_v61 = vpop.f32.mrf.mxu1 }
 0x11b   : > { %v1088_v63 = vpop.f32.mrf.mxu0 }
 0x11c   : > { %v1134_v0 = vpop.f32.mrf.mxu1  ;;  %v1094_v1 = vadd.f32 %v1088_v63, %v1047_v62 }
 0x11d   : > { %v1442_v2 = vpop.f32.mrf.mxu0 }
 0x11e   : > { %v1448_v3 = vpop.f32.mrf.mxu1  ;;  %v1140_v4 = vadd.f32 %v1134_v0, %v1094_v1 }
 0x11f   : > { %v1091_v5 = vpop.f32.mrf.mxu0 }
 0x120   : > { %v1137_v6 = vpop.f32.mrf.mxu1  ;;  %v1141_v7 = vadd.f32 %v1280_v21, %v1140_v4 }
 0x121   : > { %v1443_v8 = vpop.f32.mrf.mxu0 }
 0x122   : > { %v1449_v9 = vpop.f32.mrf.mxu1  ;;  %v1142_v10 = vmax.f32 %v1141_v7, 0.0 }
 0x124   : > { %1299 = vst.msk [vmem:[%s1798_s14 + $0x2] sm:$0x3] %vm723_vm2, %v1142_v10 }
 0x125   : > { %1516 = shalt.err (!%p1513_p3)
}
 0x126   : > { %s1517_s7 = scalar_lea.hbm %s1807_s28, 64  ;;  %s1521_s9 = scalar_lea.hbm %s1859_s4, 128 }
 0x127   : > { %p1518_p4 = scmp.ne.s32.totalorder %s1807_s28, %s1517_s7  ;;  %p1522_p9 = scmp.lt.s32.totalorder %s1807_s28, %s1859_s4 }
 0x128   : > { %p1523_p10 = scmp.lt.s32.totalorder %s1521_s9, %s1517_s7 }
 0x129   : > { %p1519_p7 = pnand %p1518_p4, %p1633_p5 }
 0x12a   : > { %p1524_p11 = por %p1523_p10, %p1522_p9 }
 0x12b   : > { %p1520_p8 = pneg %p1519_p7 }
 0x12d   : > { %p1525_p12 = pnand %p1524_p11, %p1520_p8 }
 0x12f   : > { %1528 = shalt.err (!%p1525_p12)
}
 0x130   : > { %s1568_s13 = smov 32   ;;  %s1569_s14 = smov 2  }
 0x131   : > { %1451 = dma.vmem_to_hbm [thread:$0]  (%p1633_p5), %s1809_s22, 64, %s1807_s28, %s1815_s19, %s1568_s13, %s1568_s13, %s1569_s14  }
 0x132 PF: > { %p1457_p13 = scmp.ge.s32.totalorder %s1563_s18, 2  ;;  %s1174_s20 = sand.u32 1, %s1551_s15  }
 0x133   : > { %s1175_s23 = scalar_lea.sflag [#allocation3], %s1174_s20 }
 0x134   : > { %p1454_p0 = pnand %p1457_p13, %p1637_p6 }
 0x136   : > { %p1455_p1 = pneg %p1454_p0 }
 0x138   : > { %1546 = dma.done.wait (%p1455_p1), %s1175_s23, 64  }
 0x139   : > { %1548 = vsyncadd (%p1455_p1), %s1175_s23, 4294967232  ;;  %p14_p2 = scmp.ge.s32.totalorder %s1620_s21, 4   ;;  %s1862_s15 = smov %s1555_s16 }
 0x13a   : > { %s1863_s16 = smov %s1559_s17  ;;  %s1864_s17 = smov %s1631_s24 }
 0x13b   : > { %s1865_s18 = smov %s1620_s21  ;;  %16 = sbr.rel (!%p14_p2) target bundleno = 3 (0x3), region = 91 }
 0x140   :  { %1180 = vsyncpa [#allocation3], 1 }
 0x141   :  { %1182 = vsyncpa [#allocation3 + $0x1], 1 }

// kernel: _lambda_.4
= control target key start
LH: loop header
LB: loop body
LE: loop exit
PB: predicated region body
PF: predicated region fallthrough
CT: control target
= control target key end

     0   :  { %s2446_s15 = smov 0   ;;  %s2763_s0 = inlined_call_operand.vmem [shape: f32[2,10,5,8], index: 0, kind: input, shape index: {}]   ;;  %s2764_s1 = inlined_call_operand.vmem [shape: f32[2,10,5,8], index: 1, kind: input, shape index: {}]   ;;  %s2765_s2 = inlined_call_operand.vmem [shape: bf16[9,8,16], index: 2, kind: input, shape index: {}]   ;;  %s2766_s3 = inlined_call_operand.vmem [shape: f32[1,16], index: 3, kind: input, shape index: {}]   ;;  %s2767_s4 = inlined_call_operand.vmem [shape: f32[2,4,4,16], index: 4, kind: output, shape index: {}]  }
   0x1 LB: > { %s2019_s16 = sadd.s32 4294967295, %s2417_s15   ;;  %p2023_p0 = scmp.ge.s32.totalorder %s2417_s15, 1  ;;  %s2417_s15 = sphi %s2446_s15, %s14_s15  }
   0x2   : > { %p172_p1 = scmp.lt.s32.totalorder %s2417_s15, 3 }
   0x4   : > { %p173_p2 = pnand %p2023_p0, %p172_p1 }
   0x5   : > { %p203_p3 = scmp.lt.s32.totalorder (!%p173_p2), %s2019_s16, 1 }
   0x6   : > { %176 = sbr.rel (%p173_p2) target bundleno = 357 (0x165), region = 36 }
   0xb   : > { %v2028_v0 = vld [vmem:[%s2765_s2 + $0x4] sm:$0xf]  ;;  %vm245_vm0 = vcmask 1043456   ;;  %v220_v1 = vld [vmem:[%s2765_s2] sm:$0xf]  ;;  %v2419_v2 = vmov 0.0  }
   0xc   : > { %2184 = vmatprep.subr.bf16.mxu0 %v2419_v2  ;;  %v2462_v3 = vsel %vm245_vm0, %v2028_v0, 0  ;;  %2190 = vmatprep.subr.bf16.mxu1 %v2419_v2  ;;  %v2466_v4 = vsel %vm245_vm0, %v220_v1, 0  ;;  %vm2420_vm1 = vmmov 0   ;;  %s2769_s16 = smov (!%p203_p3, %s2019_s16), 1  ;;  %v2029_v5 = vld [vmem:[%s2765_s2 + $0x8] sm:$0xf] }
   0xd   : > { %2185 = vmatpush3.bf16.msra.mxu0 %v2462_v3  ;;  %2191 = vmatpush3.bf16.msra.mxu1 %v2466_v4  ;;  %s2400_s21 = smul.u32 80, %s2769_s16  ;;  %v2030_v6 = vld [vmem:[%s2765_s2 + $0xc] sm:$0xf]  ;;  %vm241_vm2 = vcmask 64512   ;;  %v2498_v11 = vsel %vm245_vm0, %v2029_v5, 0  ;;  %s2111_s20 = sshll.u32 %s2769_s16, 4 }
   0xe   : > { %2186 = vmatprep.mubr.msk.bf16.mxu0 %vm2420_vm1, %v2419_v2  ;;  %2192 = vmatprep.mubr.msk.bf16.mxu1 %vm2420_vm1, %v2419_v2  ;;  %v2501_v12 = vsel %vm245_vm0, %v2030_v6, 0  ;;  %v2031_v15 = vld [vmem:[%s2765_s2 + $0x10] sm:$0xf]  ;;  %v2032_v16 = vld [vmem:[%s2765_s2 + $0x14] sm:$0xf]  ;;  %s2747_s23 = scalar_lea.vmem %s2767_s4, %s2111_s20  ;;  %vm690_vm3 = vcmask 125952  }
   0xf   : > { %2196 = vmatprep.subr.bf16.mxu0 %v2419_v2  ;;  %2202 = vmatprep.subr.bf16.mxu1 %v2419_v2  ;;  %s2488_s28 = scalar_lea.vmem %s2763_s0, %s2400_s21  ;;  %s2493_s5 = scalar_lea.vmem %s2764_s1, %s2400_s21  ;;  %v2522_v19 = vsel %vm245_vm0, %v2031_v15, 0  ;;  %v2525_v20 = vsel %vm245_vm0, %v2032_v16, 0  ;;  %v2033_v23 = vld [vmem:[%s2765_s2 + $0x18] sm:$0xf]  ;;  %v2034_v24 = vld [vmem:[%s2765_s2 + $0x1c] sm:$0xf] }
  0x10   : > { %v239_v7 = vld [vmem:[%s2493_s5] sm:$0xf]  ;;  %v2039_v14 = vld [vmem:[%s2488_s28 + $0x8] sm:$0xf]  ;;  %v2546_v27 = vsel %vm245_vm0, %v2033_v23, 0  ;;  %v2549_v28 = vsel %vm245_vm0, %v2034_v24, 0 }
  0x11   : > { %v237_v8 = vld [vmem:[%s2488_s28] sm:$0xf]  ;;  %v240_v9 = vpack.c.bf16 %v239_v7, %v239_v7  ;;  %v386_v18 = vpack.c.bf16 %v2039_v14, %v2039_v14  ;;  %v2041_v21 = vld [vmem:[%s2493_s5 + $0x8] sm:$0xf]  ;;  %v2045_v29 = vld [vmem:[%s2488_s28 + $0x10] sm:$0xf] }
  0x12   : > { %v238_v10 = vpack.c.bf16 %v237_v8, %v237_v8  ;;  %v335_v13 = vld [vmem:[%s2488_s28 + $0x1] sm:$0xf]  ;;  %v2043_v22 = vld [vmem:[%s2488_s28 + $0x9] sm:$0xf]  ;;  %v436_v25 = vpack.c.bf16 %v2041_v21, %v2041_v21  ;;  %v2047_v30 = vld [vmem:[%s2493_s5 + $0x10] sm:$0xf]  ;;  %v535_v32 = vpack.c.bf16 %v2045_v29, %v2045_v29 }
  0x13   : > { %2187 = vmatmul.mubr.msk.bf16.vlgmr.msra.gmra.mxu0 %vm241_vm2, %v240_v9  ;;  %v336_v17 = vpack.c.bf16 %v335_v13, %v335_v13  ;;  %v485_v26 = vpack.c.bf16 %v2043_v22, %v2043_v22  ;;  %v2035_v31 = vld [vmem:[%s2765_s2 + $0x20] sm:$0xf]  ;;  %v585_v33 = vpack.c.bf16 %v2047_v30, %v2047_v30  ;;  %v2049_v35 = vld [vmem:[%s2488_s28 + $0x11] sm:$0xf]  ;;  %v2058_v43 = vld [vmem:[%s2488_s28 + $0x18] sm:$0xf] }
  0x14   : > { %2193 = vmatmul.mubr.msk.bf16.vlgmr.msra.gmra.mxu1 %vm241_vm2, %v238_v10  ;;  %2197 = vmatpush3.bf16.msra.mxu0 %v2498_v11  ;;  %v2567_v34 = vsel %vm245_vm0, %v2035_v31, 0  ;;  %v2053_v36 = vld [vmem:[%s2493_s5 + $0x10] sm:$0xf]  ;;  %v634_v37 = vpack.c.bf16 %v2049_v35, %v2049_v35  ;;  %v2060_v44 = vld [vmem:[%s2493_s5 + $0x18] sm:$0xf]  ;;  %v830_v45 = vpack.c.bf16 %v2058_v43, %v2058_v43 }
  0x15   : > { %2203 = vmatpush3.bf16.msra.mxu1 %v2501_v12  ;;  %2198 = vmatprep.mubr.msk.bf16.mxu0 %vm2420_vm1, %v2419_v2  ;;  %v695_v38 = vpack.c.bf16 %v2053_v36, %v2053_v36  ;;  %v2052_v39 = vld [vmem:[%s2488_s28 + $0x10] sm:$0xf]  ;;  %v877_v46 = vpack.c.bf16 %v2060_v44, %v2060_v44  ;;  %v2062_v47 = vld [vmem:[%s2488_s28 + $0x19] sm:$0xf]  ;;  %v2064_v48 = vld [vmem:[%s2488_s28 + $0x20] sm:$0xf] }
  0x16   : > { %2204 = vmatprep.mubr.msk.bf16.mxu1 %vm2420_vm1, %v2419_v2  ;;  %2208 = vmatprep.subr.bf16.mxu0 %v2419_v2  ;;  %v2056_v40 = vld [vmem:[%s2488_s28 + $0x11] sm:$0xf]  ;;  %v693_v41 = vpack.c.bf16 %v2052_v39, %v2052_v39  ;;  %v923_v49 = vpack.c.bf16 %v2062_v47, %v2062_v47  ;;  %v970_v50 = vpack.c.bf16 %v2064_v48, %v2064_v48  ;;  %v2066_v51 = vld [vmem:[%s2493_s5 + $0x20] sm:$0xf]  ;;  %v2077_v60 = vld [vmem:[%s2488_s28 + $0x28] sm:$0xf] }
  0x17   : > { %2214 = vmatprep.subr.bf16.mxu1 %v2419_v2  ;;  %v783_v42 = vpack.c.bf16 %v2056_v40, %v2056_v40  ;;  %v2068_v52 = vld [vmem:[%s2488_s28 + $0x21] sm:$0xf]  ;;  %v1017_v53 = vpack.c.bf16 %v2066_v51, %v2066_v51  ;;  %v1250_v62 = vpack.c.bf16 %v2077_v60, %v2077_v60  ;;  %v2079_v63 = vld [vmem:[%s2493_s5 + $0x28] sm:$0xf]  ;;  %v2083_v6 = vld [vmem:[%s2488_s28 + $0x30] sm:$0xf] }
  0x18   : > { %v1063_v54 = vpack.c.bf16 %v2068_v52, %v2068_v52  ;;  %v2072_v55 = vld [vmem:[%s2493_s5 + $0x20] sm:$0xf]  ;;  %v2081_v0 = vld [vmem:[%s2488_s28 + $0x29] sm:$0xf]  ;;  %v1297_v1 = vpack.c.bf16 %v2079_v63, %v2079_v63  ;;  %v2085_v7 = vld [vmem:[%s2493_s5 + $0x30] sm:$0xf]  ;;  %v1390_v8 = vpack.c.bf16 %v2083_v6, %v2083_v6 }
  0x19   : > { %v2071_v56 = vld [vmem:[%s2488_s28 + $0x20] sm:$0xf]  ;;  %v1115_v57 = vpack.c.bf16 %v2072_v55, %v2072_v55  ;;  %v1343_v5 = vpack.c.bf16 %v2081_v0, %v2081_v0  ;;  %v1437_v9 = vpack.c.bf16 %v2085_v7, %v2085_v7  ;;  %v2087_v10 = vld [vmem:[%s2488_s28 + $0x31] sm:$0xf] }
  0x1a   : > { %v1113_v58 = vpack.c.bf16 %v2071_v56, %v2071_v56  ;;  %v2075_v59 = vld [vmem:[%s2488_s28 + $0x21] sm:$0xf]  ;;  %v2091_v13 = vld [vmem:[%s2493_s5 + $0x30] sm:$0xf]  ;;  %v1483_v14 = vpack.c.bf16 %v2087_v10, %v2087_v10 }
  0x1b   : > { %2199 = vmatmul.mubr.msk.bf16.vlgmr.msra.gmra.mxu0 %vm241_vm2, %v336_v17  ;;  %v1203_v61 = vpack.c.bf16 %v2075_v59, %v2075_v59  ;;  %v1535_v15 = vpack.c.bf16 %v2091_v13, %v2091_v13  ;;  %v2094_v16 = vld [vmem:[%s2488_s28 + $0x31] sm:$0xf] }
  0x1c   : > { %2205 = vmatmul.mubr.msk.bf16.vlgmr.msra.gmra.mxu1 %vm241_vm2, %v386_v18  ;;  %2209 = vmatpush3.bf16.msra.mxu0 %v2522_v19  ;;  %v1623_v18 = vpack.c.bf16 %v2094_v16, %v2094_v16 }
  0x1d   : > { %2215 = vmatpush3.bf16.msra.mxu1 %v2525_v20  ;;  %2210 = vmatprep.mubr.msk.bf16.mxu0 %vm2420_vm1, %v2419_v2 }
  0x1e   : > { %2216 = vmatprep.mubr.msk.bf16.mxu1 %vm2420_vm1, %v2419_v2  ;;  %2220 = vmatprep.subr.bf16.mxu0 %v2419_v2 }
  0x1f   : > { %2226 = vmatprep.subr.bf16.mxu1 %v2419_v2 }
  0x23   : > { %2211 = vmatmul.mubr.msk.bf16.vlgmr.msra.gmra.mxu0 %vm241_vm2, %v436_v25  ;;  %v2106_v25 = vld [vmem:[%s2488_s28 + $0x41] sm:$0xf] }
  0x24   : > { %2217 = vmatmul.mubr.msk.bf16.vlgmr.msra.gmra.mxu1 %vm241_vm2, %v485_v26  ;;  %2221 = vmatpush3.bf16.msra.mxu0 %v2546_v27 }
  0x25   : > { %2227 = vmatpush3.bf16.msra.mxu1 %v2549_v28  ;;  %2222 = vmatprep.mubr.msk.bf16.mxu0 %vm2420_vm1, %v2419_v2 }
  0x26   : > { %2228 = vmatprep.mubr.msk.bf16.mxu1 %vm2420_vm1, %v2419_v2  ;;  %2232 = vmatprep.subr.bf16.mxu0 %v2419_v2 }
  0x27   : > { %2238 = vmatprep.subr.bf16.mxu1 %v2419_v2 }
  0x2b   : > { %2223 = vmatmul.mubr.msk.bf16.vlgmr.msra.gmra.mxu0 %vm241_vm2, %v535_v32 }
  0x2c   : > { %2229 = vmatmul.mubr.msk.bf16.vlgmr.msra.gmra.mxu1 %vm241_vm2, %v585_v33  ;;  %2233 = vmatpush3.bf16.msra.mxu0 %v2567_v34 }
  0x2d   : > { %2239 = vmatpush3.bf16.msra.mxu1 %v2462_v3  ;;  %2234 = vmatprep.mubr.msk.bf16.mxu0 %vm2420_vm1, %v2419_v2 }
  0x2e   : > { %2240 = vmatprep.mubr.msk.bf16.mxu1 %vm2420_vm1, %v2419_v2  ;;  %2244 = vmatprep.subr.bf16.mxu0 %v2419_v2 }
  0x2f   : > { %2250 = vmatprep.subr.bf16.mxu1 %v2419_v2 }
  0x33   : > { %2235 = vmatmul.mubr.msk.bf16.vlgmr.msra.gmra.mxu0 %vm241_vm2, %v634_v37 }
  0x34   : > { %2241 = vmatmul.mubr.msk.bf16.vlgmr.msra.gmra.mxu1 %vm241_vm2, %v695_v38  ;;  %2245 = vmatpush3.bf16.msra.mxu0 %v2466_v4 }
  0x35   : > { %2251 = vmatpush3.bf16.msra.mxu1 %v2498_v11  ;;  %2246 = vmatprep.mubr.msk.bf16.mxu0 %vm2420_vm1, %v2419_v2 }
  0x36   : > { %2252 = vmatprep.mubr.msk.bf16.mxu1 %vm2420_vm1, %v2419_v2  ;;  %2256 = vmatprep.subr.bf16.mxu0 %v2419_v2 }
  0x37   : > { %2262 = vmatprep.subr.bf16.mxu1 %v2419_v2 }
  0x3b   : > { %2247 = vmatmul.mubr.msk.bf16.vlgmr.msra.gmra.mxu0 %vm241_vm2, %v693_v41 }
  0x3c   : > { %2253 = vmatmul.mubr.msk.bf16.vlgmr.msra.gmra.mxu1 %vm241_vm2, %v783_v42  ;;  %2257 = vmatpush3.bf16.msra.mxu0 %v2501_v12 }
  0x3d   : > { %2263 = vmatpush3.bf16.msra.mxu1 %v2522_v19  ;;  %2258 = vmatprep.mubr.msk.bf16.mxu0 %vm2420_vm1, %v2419_v2 }
  0x3e   : > { %2264 = vmatprep.mubr.msk.bf16.mxu1 %vm2420_vm1, %v2419_v2  ;;  %2268 = vmatprep.subr.bf16.mxu0 %v2419_v2 }
  0x3f   : > { %2274 = vmatprep.subr.bf16.mxu1 %v2419_v2 }
  0x43   : > { %2259 = vmatmul.mubr.msk.bf16.vlgmr.msra.gmra.mxu0 %vm241_vm2, %v830_v45 }
  0x44   : > { %2265 = vmatmul.mubr.msk.bf16.vlgmr.msra.gmra.mxu1 %vm241_vm2, %v877_v46  ;;  %2269 = vmatpush3.bf16.msra.mxu0 %v2525_v20 }
  0x45   : > { %2275 = vmatpush3.bf16.msra.mxu1 %v2546_v27  ;;  %2270 = vmatprep.mubr.msk.bf16.mxu0 %vm2420_vm1, %v2419_v2 }
  0x46   : > { %2276 = vmatprep.mubr.msk.bf16.mxu1 %vm2420_vm1, %v2419_v2  ;;  %2280 = vmatprep.subr.bf16.mxu0 %v2419_v2 }
  0x47   : > { %2286 = vmatprep.subr.bf16.mxu1 %v2419_v2 }
  0x4b   : > { %2271 = vmatmul.mubr.msk.bf16.vlgmr.msra.gmra.mxu0 %vm241_vm2, %v923_v49 }
  0x4c   : > { %2277 = vmatmul.mubr.msk.bf16.vlgmr.msra.gmra.mxu1 %vm241_vm2, %v970_v50  ;;  %2281 = vmatpush3.bf16.msra.mxu0 %v2549_v28 }
  0x4d   : > { %2287 = vmatpush3.bf16.msra.mxu1 %v2567_v34  ;;  %2282 = vmatprep.mubr.msk.bf16.mxu0 %vm2420_vm1, %v2419_v2 }
  0x4e   : > { %2288 = vmatprep.mubr.msk.bf16.mxu1 %vm2420_vm1, %v2419_v2  ;;  %2292 = vmatprep.subr.bf16.mxu0 %v2419_v2 }
  0x4f   : > { %2298 = vmatprep.subr.bf16.mxu1 %v2419_v2 }
  0x53   : > { %2283 = vmatmul.mubr.msk.bf16.vlgmr.msra.gmra.mxu0 %vm241_vm2, %v1017_v53 }
  0x54   : > { %2289 = vmatmul.mubr.msk.bf16.vlgmr.msra.gmra.mxu1 %vm241_vm2, %v1063_v54  ;;  %2293 = vmatpush3.bf16.msra.mxu0 %v2462_v3 }
  0x55   : > { %2299 = vmatpush3.bf16.msra.mxu1 %v2466_v4  ;;  %2294 = vmatprep.mubr.msk.bf16.mxu0 %vm2420_vm1, %v2419_v2 }
  0x56   : > { %2300 = vmatprep.mubr.msk.bf16.mxu1 %vm2420_vm1, %v2419_v2  ;;  %2304 = vmatprep.subr.bf16.mxu0 %v2419_v2 }
  0x57   : > { %2310 = vmatprep.subr.bf16.mxu1 %v2419_v2 }
  0x5b   : > { %2295 = vmatmul.mubr.msk.bf16.vlgmr.msra.gmra.mxu0 %vm241_vm2, %v1115_v57 }
  0x5c   : > { %2301 = vmatmul.mubr.msk.bf16.vlgmr.msra.gmra.mxu1 %vm241_vm2, %v1113_v58  ;;  %2305 = vmatpush3.bf16.msra.mxu0 %v2498_v11 }
  0x5d   : > { %2311 = vmatpush3.bf16.msra.mxu1 %v2501_v12  ;;  %2306 = vmatprep.mubr.msk.bf16.mxu0 %vm2420_vm1, %v2419_v2 }
  0x5e   : > { %2312 = vmatprep.mubr.msk.bf16.mxu1 %vm2420_vm1, %v2419_v2  ;;  %2316 = vmatprep.subr.bf16.mxu0 %v2419_v2 }
  0x5f   : > { %2322 = vmatprep.subr.bf16.mxu1 %v2419_v2 }
  0x63   : > { %2307 = vmatmul.mubr.msk.bf16.vlgmr.msra.gmra.mxu0 %vm241_vm2, %v1203_v61 }
  0x64   : > { %2313 = vmatmul.mubr.msk.bf16.vlgmr.msra.gmra.mxu1 %vm241_vm2, %v1250_v62  ;;  %2317 = vmatpush3.bf16.msra.mxu0 %v2522_v19 }
  0x65   : > { %2323 = vmatpush3.bf16.msra.mxu1 %v2525_v20  ;;  %2318 = vmatprep.mubr.msk.bf16.mxu0 %vm2420_vm1, %v2419_v2 }
  0x66   : > { %2324 = vmatprep.mubr.msk.bf16.mxu1 %vm2420_vm1, %v2419_v2  ;;  %2328 = vmatprep.subr.bf16.mxu0 %v2419_v2 }
  0x67   : > { %2334 = vmatprep.subr.bf16.mxu1 %v2419_v2 }
  0x6b   : > { %2319 = vmatmul.mubr.msk.bf16.vlgmr.msra.gmra.mxu0 %vm241_vm2, %v1297_v1 }
  0x6c   : > { %2325 = vmatmul.mubr.msk.bf16.vlgmr.msra.gmra.mxu1 %vm241_vm2, %v1343_v5  ;;  %2329 = vmatpush3.bf16.msra.mxu0 %v2546_v27  ;;  %v2740_v5 = vld [vmem:[%s2766_s3] ss:$0 sm:$0xff] }
  0x6d   : > { %2335 = vmatpush3.bf16.msra.mxu1 %v2549_v28  ;;  %2330 = vmatprep.mubr.msk.bf16.mxu0 %vm2420_vm1, %v2419_v2 }
  0x6e   : > { %2336 = vmatprep.mubr.msk.bf16.mxu1 %vm2420_vm1, %v2419_v2  ;;  %2340 = vmatprep.subr.bf16.mxu0 %v2419_v2 }
  0x6f   : > { %2346 = vmatprep.subr.bf16.mxu1 %v2419_v2 }
  0x73   : > { %2331 = vmatmul.mubr.msk.bf16.vlgmr.msra.gmra.mxu0 %vm241_vm2, %v1390_v8 }
  0x74   : > { %2337 = vmatmul.mubr.msk.bf16.vlgmr.msra.gmra.mxu1 %vm241_vm2, %v1437_v9  ;;  %2341 = vmatpush3.bf16.msra.mxu0 %v2567_v34 }
  0x75   : > { %2347 = vmatpush3.bf16.msra.mxu1 %v2462_v3  ;;  %2342 = vmatprep.mubr.msk.bf16.mxu0 %vm2420_vm1, %v2419_v2  ;;  %v2090_v3 = vld [vmem:[%s2488_s28 + $0x30] sm:$0xf] }
  0x76   : > { %2348 = vmatprep.mubr.msk.bf16.mxu1 %vm2420_vm1, %v2419_v2  ;;  %2352 = vmatprep.subr.bf16.mxu0 %v2419_v2  ;;  %v1533_v17 = vpack.c.bf16 %v2090_v3, %v2090_v3 }
  0x77   : > { %2358 = vmatprep.subr.bf16.mxu1 %v2419_v2 }
  0x7b   : > { %2343 = vmatmul.mubr.msk.bf16.vlgmr.msra.gmra.mxu0 %vm241_vm2, %v1483_v14 }
  0x7c   : > { %2349 = vmatmul.mubr.msk.bf16.vlgmr.msra.gmra.mxu1 %vm241_vm2, %v1535_v15  ;;  %2353 = vmatpush3.bf16.msra.mxu0 %v2466_v4  ;;  %v2096_v4 = vld [vmem:[%s2488_s28 + $0x38] sm:$0xf] }
  0x7d   : > { %2359 = vmatpush3.bf16.msra.mxu1 %v2498_v11  ;;  %2354 = vmatprep.mubr.msk.bf16.mxu0 %vm2420_vm1, %v2419_v2  ;;  %v2098_v11 = vld [vmem:[%s2493_s5 + $0x38] sm:$0xf]  ;;  %v1670_v21 = vpack.c.bf16 %v2096_v4, %v2096_v4 }
  0x7e   : > { %2360 = vmatprep.mubr.msk.bf16.mxu1 %vm2420_vm1, %v2419_v2  ;;  %2364 = vmatprep.subr.bf16.mxu0 %v2419_v2  ;;  %v1717_v22 = vpack.c.bf16 %v2098_v11, %v2098_v11 }
  0x7f   : > { %2370 = vmatprep.subr.bf16.mxu1 %v2419_v2 }
  0x83   : > { %2355 = vmatmul.mubr.msk.bf16.vlgmr.msra.gmra.mxu0 %vm241_vm2, %v1533_v17 }
  0x84   : > { %2361 = vmatmul.mubr.msk.bf16.vlgmr.msra.gmra.mxu1 %vm241_vm2, %v1623_v18  ;;  %2365 = vmatpush3.bf16.msra.mxu0 %v2501_v12  ;;  %v2100_v12 = vld [vmem:[%s2488_s28 + $0x39] sm:$0xf] }
  0x85   : > { %2371 = vmatpush3.bf16.msra.mxu1 %v2522_v19  ;;  %2366 = vmatprep.mubr.msk.bf16.mxu0 %vm2420_vm1, %v2419_v2  ;;  %v2102_v19 = vld [vmem:[%s2488_s28 + $0x40] sm:$0xf]  ;;  %v1763_v23 = vpack.c.bf16 %v2100_v12, %v2100_v12 }
  0x86   : > { %2372 = vmatprep.mubr.msk.bf16.mxu1 %vm2420_vm1, %v2419_v2  ;;  %2376 = vmatprep.subr.bf16.mxu0 %v2419_v2  ;;  %v1810_v24 = vpack.c.bf16 %v2102_v19, %v2102_v19 }
  0x87   : > { %2382 = vmatprep.subr.bf16.mxu1 %v2419_v2 }
  0x8b   : > { %2367 = vmatmul.mubr.msk.bf16.vlgmr.msra.gmra.mxu0 %vm241_vm2, %v1670_v21 }
  0x8c   : > { %2373 = vmatmul.mubr.msk.bf16.vlgmr.msra.gmra.mxu1 %vm241_vm2, %v1717_v22  ;;  %2377 = vmatpush3.bf16.msra.mxu0 %v2525_v20  ;;  %v2104_v20 = vld [vmem:[%s2493_s5 + $0x40] sm:$0xf] }
  0x8d   : > { %2383 = vmatpush3.bf16.msra.mxu1 %v2546_v27  ;;  %2378 = vmatprep.mubr.msk.bf16.mxu0 %vm2420_vm1, %v2419_v2  ;;  %v1857_v26 = vpack.c.bf16 %v2104_v20, %v2104_v20  ;;  %v1903_v27 = vpack.c.bf16 %v2106_v25, %v2106_v25 }
  0x8e   : > { %2384 = vmatprep.mubr.msk.bf16.mxu1 %vm2420_vm1, %v2419_v2  ;;  %2388 = vmatprep.subr.bf16.mxu0 %v2419_v2 }
  0x8f   : > { %2394 = vmatprep.subr.bf16.mxu1 %v2419_v2 }
  0x93   : > { %2379 = vmatmul.mubr.msk.bf16.vlgmr.msra.gmra.mxu0 %vm241_vm2, %v1763_v23 }
  0x94   : > { %2385 = vmatmul.mubr.msk.bf16.vlgmr.msra.gmra.mxu1 %vm241_vm2, %v1810_v24  ;;  %2389 = vmatpush3.bf16.msra.mxu0 %v2549_v28 }
  0x95   : > { %2395 = vmatpush3.bf16.msra.mxu1 %v2567_v34  ;;  %2390 = vmatprep.mubr.msk.bf16.mxu0 %vm2420_vm1, %v2419_v2 }
  0x96   : > { %2396 = vmatprep.mubr.msk.bf16.mxu1 %vm2420_vm1, %v2419_v2 }
  0x9b   : > { %2391 = vmatmul.mubr.msk.bf16.vlgmr.msra.gmra.mxu0 %vm241_vm2, %v1857_v26 }
  0x9c   : > { %2397 = vmatmul.mubr.msk.bf16.vlgmr.msra.gmra.mxu1 %vm241_vm2, %v1903_v27 }
  0xd3   : > { %v283_v29 = vpop.f32.mrf.mxu0 }
  0xd4   : > { %v329_v30 = vpop.f32.mrf.mxu1 }
  0xd5   : > { %v2188_v31 = vpop.f32.mrf.mxu0  ;;  %v330_v41 = vadd.f32 %v329_v30, %v283_v29 }
  0xd6   : > { %v2194_v28 = vpop.f32.mrf.mxu1 }
  0xd7   : > { %v286_v32 = vpop.f32.mrf.mxu0 }
  0xd8   : > { %v332_v33 = vpop.f32.mrf.mxu1 }
  0xd9   : > { %v2189_v34 = vpop.f32.mrf.mxu0 }
  0xda   : > { %v2195_v35 = vpop.f32.mrf.mxu1 }
  0xdb   : > { %v377_v36 = vpop.f32.mrf.mxu0 }
  0xdc   : > { %v427_v37 = vpop.f32.mrf.mxu1  ;;  %v383_v44 = vadd.f32 %v377_v36, %v330_v41 }
  0xdd   : > { %v2200_v38 = vpop.f32.mrf.mxu0 }
  0xde   : > { %v2206_v39 = vpop.f32.mrf.mxu1  ;;  %v433_v49 = vadd.f32 %v427_v37, %v383_v44 }
  0xdf   : > { %v380_v40 = vpop.f32.mrf.mxu0 }
  0xe0   : > { %v430_v2 = vpop.f32.mrf.mxu1 }
  0xe1   : > { %v2201_v42 = vpop.f32.mrf.mxu0 }
  0xe2   : > { %v2207_v43 = vpop.f32.mrf.mxu1 }
  0xe3   : > { %v477_v45 = vpop.f32.mrf.mxu0 }
  0xe4   : > { %v526_v46 = vpop.f32.mrf.mxu1  ;;  %v483_v52 = vadd.f32 %v477_v45, %v433_v49 }
  0xe5   : > { %v2212_v47 = vpop.f32.mrf.mxu0 }
  0xe6   : > { %v2218_v48 = vpop.f32.mrf.mxu1  ;;  %v532_v57 = vadd.f32 %v526_v46, %v483_v52 }
  0xe7   : > { %v480_v50 = vpop.f32.mrf.mxu0 }
  0xe8   : > { %v529_v51 = vpop.f32.mrf.mxu1 }
  0xe9   : > { %v2213_v53 = vpop.f32.mrf.mxu0 }
  0xea   : > { %v2219_v54 = vpop.f32.mrf.mxu1 }
  0xeb   : > { %v576_v55 = vpop.f32.mrf.mxu0 }
  0xec   : > { %v626_v56 = vpop.f32.mrf.mxu1  ;;  %v582_v60 = vadd.f32 %v576_v55, %v532_v57 }
  0xed   : > { %v2224_v58 = vpop.f32.mrf.mxu0 }
  0xee   : > { %v2230_v59 = vpop.f32.mrf.mxu1  ;;  %v632_v1 = vadd.f32 %v626_v56, %v582_v60 }
  0xef   : > { %v579_v61 = vpop.f32.mrf.mxu0 }
  0xf0   : > { %v629_v62 = vpop.f32.mrf.mxu1 }
  0xf1   : > { %v2225_v63 = vpop.f32.mrf.mxu0 }
  0xf2   : > { %v2231_v0 = vpop.f32.mrf.mxu1 }
  0xf3   : > { %v675_v6 = vpop.f32.mrf.mxu0 }
  0xf4   : > { %v733_v7 = vpop.f32.mrf.mxu1  ;;  %v681_v8 = vadd.f32 %v675_v6, %v632_v1 }
  0xf5   : > { %v2236_v9 = vpop.f32.mrf.mxu0 }
  0xf6   : > { %v2242_v10 = vpop.f32.mrf.mxu1  ;;  %v688_v13 = vadd.f32 %v2740_v5, %v681_v8 }
  0xf7   : > { %v678_v14 = vpop.f32.mrf.mxu0 }
  0xf8   : > { %v736_v15 = vpop.f32.mrf.mxu1  ;;  %v689_v3 = vmax.f32 %v688_v13, 0.0 }
  0xf9   : > { %v2237_v16 = vpop.f32.mrf.mxu0 }
  0xfa   : > { %v2243_v17 = vpop.f32.mrf.mxu1  ;;  %691 = vst.msk [vmem:[%s2747_s23] sm:$0xf] %vm690_vm3, %v689_v3 }
  0xfb   : > { %v776_v18 = vpop.f32.mrf.mxu0 }
  0xfc   : > { %v821_v4 = vpop.f32.mrf.mxu1  ;;  %v777_v24 = vadd.f32 %v776_v18, %v733_v7 }
  0xfd   : > { %v2248_v11 = vpop.f32.mrf.mxu0 }
  0xfe   : > { %v2254_v21 = vpop.f32.mrf.mxu1  ;;  %v827_v29 = vadd.f32 %v821_v4, %v777_v24 }
  0xff   : > { %v779_v22 = vpop.f32.mrf.mxu0 }
 0x100   : > { %v824_v12 = vpop.f32.mrf.mxu1 }
 0x101   : > { %v2249_v19 = vpop.f32.mrf.mxu0 }
 0x102   : > { %v2255_v23 = vpop.f32.mrf.mxu1 }
 0x103   : > { %v868_v20 = vpop.f32.mrf.mxu0 }
 0x104   : > { %v915_v25 = vpop.f32.mrf.mxu1  ;;  %v874_v28 = vadd.f32 %v868_v20, %v827_v29 }
 0x105   : > { %v2260_v26 = vpop.f32.mrf.mxu0 }
 0x106   : > { %v2266_v27 = vpop.f32.mrf.mxu1  ;;  %v921_v36 = vadd.f32 %v915_v25, %v874_v28 }
 0x107   : > { %v871_v30 = vpop.f32.mrf.mxu0 }
 0x108   : > { %v918_v31 = vpop.f32.mrf.mxu1 }
 0x109   : > { %v2261_v32 = vpop.f32.mrf.mxu0 }
 0x10a   : > { %v2267_v33 = vpop.f32.mrf.mxu1 }
 0x10b   : > { %v961_v34 = vpop.f32.mrf.mxu0 }
 0x10c   : > { %v1008_v35 = vpop.f32.mrf.mxu1  ;;  %v967_v39 = vadd.f32 %v961_v34, %v921_v36 }
 0x10d   : > { %v2272_v37 = vpop.f32.mrf.mxu0 }
 0x10e   : > { %v2278_v38 = vpop.f32.mrf.mxu1  ;;  %v1014_v43 = vadd.f32 %v1008_v35, %v967_v39 }
 0x10f   : > { %v964_v40 = vpop.f32.mrf.mxu0 }
 0x110   : > { %v1011_v2 = vpop.f32.mrf.mxu1 }
 0x111   : > { %v2273_v41 = vpop.f32.mrf.mxu0 }
 0x112   : > { %v2279_v42 = vpop.f32.mrf.mxu1 }
 0x113   : > { %v1055_v44 = vpop.f32.mrf.mxu0 }
 0x114   : > { %v1101_v45 = vpop.f32.mrf.mxu1  ;;  %v1061_v46 = vadd.f32 %v1055_v44, %v1014_v43 }
 0x115   : > { %v2284_v47 = vpop.f32.mrf.mxu0 }
 0x116   : > { %v2290_v48 = vpop.f32.mrf.mxu1  ;;  %v1107_v49 = vadd.f32 %v1101_v45, %v1061_v46 }
 0x117   : > { %v1058_v50 = vpop.f32.mrf.mxu0 }
 0x118   : > { %v1104_v51 = vpop.f32.mrf.mxu1  ;;  %v1108_v52 = vadd.f32 %v2740_v5, %v1107_v49 }
 0x119   : > { %v2285_v53 = vpop.f32.mrf.mxu0 }
 0x11a   : > { %v2291_v54 = vpop.f32.mrf.mxu1  ;;  %v1109_v55 = vmax.f32 %v1108_v52, 0.0 }
 0x11b   : > { %v1153_v56 = vpop.f32.mrf.mxu0 }
 0x11c   : > { %v1196_v57 = vpop.f32.mrf.mxu1  ;;  %2070 = vst.msk [vmem:[%s2747_s23 + $0x4] sm:$0xf] %vm690_vm3, %v1109_v55 }
 0x11d   : > { %v2296_v58 = vpop.f32.mrf.mxu0  ;;  %v1197_v10 = vadd.f32 %v1196_v57, %v1153_v56 }
 0x11e   : > { %v2302_v59 = vpop.f32.mrf.mxu1 }
 0x11f   : > { %v1156_v60 = vpop.f32.mrf.mxu0 }
 0x120   : > { %v1199_v61 = vpop.f32.mrf.mxu1 }
 0x121   : > { %v2297_v62 = vpop.f32.mrf.mxu0 }
 0x122   : > { %v2303_v63 = vpop.f32.mrf.mxu1 }
 0x123   : > { %v1241_v0 = vpop.f32.mrf.mxu0 }
 0x124   : > { %v1288_v1 = vpop.f32.mrf.mxu1  ;;  %v1247_v15 = vadd.f32 %v1241_v0, %v1197_v10 }
 0x125   : > { %v2308_v6 = vpop.f32.mrf.mxu0 }
 0x126   : > { %v2314_v7 = vpop.f32.mrf.mxu1  ;;  %v1294_v4 = vadd.f32 %v1288_v1, %v1247_v15 }
 0x127   : > { %v1244_v8 = vpop.f32.mrf.mxu0 }
 0x128   : > { %v1291_v9 = vpop.f32.mrf.mxu1 }
 0x129   : > { %v2309_v13 = vpop.f32.mrf.mxu0 }
 0x12a   : > { %v2315_v14 = vpop.f32.mrf.mxu1 }
 0x12b   : > { %v1335_v3 = vpop.f32.mrf.mxu0 }
 0x12c   : > { %v1381_v16 = vpop.f32.mrf.mxu1  ;;  %v1341_v22 = vadd.f32 %v1335_v3, %v1294_v4 }
 0x12d   : > { %v2320_v17 = vpop.f32.mrf.mxu0 }
 0x12e   : > { %v2326_v18 = vpop.f32.mrf.mxu1  ;;  %v1387_v20 = vadd.f32 %v1381_v16, %v1341_v22 }
 0x12f   : > { %v1338_v11 = vpop.f32.mrf.mxu0 }
 0x130   : > { %v1384_v21 = vpop.f32.mrf.mxu1 }
 0x131   : > { %v2321_v12 = vpop.f32.mrf.mxu0 }
 0x132   : > { %v2327_v19 = vpop.f32.mrf.mxu1 }
 0x133   : > { %v1428_v23 = vpop.f32.mrf.mxu0 }
 0x134   : > { %v1475_v24 = vpop.f32.mrf.mxu1  ;;  %v1434_v27 = vadd.f32 %v1428_v23, %v1387_v20 }
 0x135   : > { %v2332_v25 = vpop.f32.mrf.mxu0 }
 0x136   : > { %v2338_v26 = vpop.f32.mrf.mxu1  ;;  %v1481_v32 = vadd.f32 %v1475_v24, %v1434_v27 }
 0x137   : > { %v1431_v29 = vpop.f32.mrf.mxu0 }
 0x138   : > { %v1478_v30 = vpop.f32.mrf.mxu1 }
 0x139   : > { %v2333_v31 = vpop.f32.mrf.mxu0 }
 0x13a   : > { %v2339_v28 = vpop.f32.mrf.mxu1 }
 0x13b   : > { %v1521_v33 = vpop.f32.mrf.mxu0 }
 0x13c   : > { %v1573_v34 = vpop.f32.mrf.mxu1  ;;  %v1527_v35 = vadd.f32 %v1521_v33, %v1481_v32 }
 0x13d   : > { %v2344_v36 = vpop.f32.mrf.mxu0 }
 0x13e   : > { %v2350_v37 = vpop.f32.mrf.mxu1  ;;  %v1528_v38 = vadd.f32 %v2740_v5, %v1527_v35 }
 0x13f   : > { %v1524_v39 = vpop.f32.mrf.mxu0 }
 0x140   : > { %v1576_v40 = vpop.f32.mrf.mxu1  ;;  %v1529_v2 = vmax.f32 %v1528_v38, 0.0 }
 0x141   : > { %v2345_v41 = vpop.f32.mrf.mxu0 }
 0x142   : > { %v2351_v42 = vpop.f32.mrf.mxu1  ;;  %2089 = vst.msk [vmem:[%s2747_s23 + $0x8] sm:$0xf] %vm690_vm3, %v1529_v2 }
 0x143   : > { %v1616_v43 = vpop.f32.mrf.mxu0 }
 0x144   : > { %v1661_v44 = vpop.f32.mrf.mxu1  ;;  %v1617_v51 = vadd.f32 %v1616_v43, %v1573_v34 }
 0x145   : > { %v2356_v45 = vpop.f32.mrf.mxu0 }
 0x146   : > { %v2362_v46 = vpop.f32.mrf.mxu1  ;;  %v1667_v56 = vadd.f32 %v1661_v44, %v1617_v51 }
 0x147   : > { %v1619_v47 = vpop.f32.mrf.mxu0 }
 0x148   : > { %v1664_v48 = vpop.f32.mrf.mxu1 }
 0x149   : > { %v2357_v49 = vpop.f32.mrf.mxu0 }
 0x14a   : > { %v2363_v50 = vpop.f32.mrf.mxu1 }
 0x14b   : > { %v1708_v52 = vpop.f32.mrf.mxu0 }
 0x14c   : > { %v1755_v53 = vpop.f32.mrf.mxu1  ;;  %v1714_v59 = vadd.f32 %v1708_v52, %v1667_v56 }
 0x14d   : > { %v2368_v54 = vpop.f32.mrf.mxu0 }
 0x14e   : > { %v2374_v55 = vpop.f32.mrf.mxu1  ;;  %v1761_v0 = vadd.f32 %v1755_v53, %v1714_v59 }
 0x14f   : > { %v1711_v57 = vpop.f32.mrf.mxu0 }
 0x150   : > { %v1758_v58 = vpop.f32.mrf.mxu1 }
 0x151   : > { %v2369_v60 = vpop.f32.mrf.mxu0 }
 0x152   : > { %v2375_v61 = vpop.f32.mrf.mxu1 }
 0x153   : > { %v1801_v62 = vpop.f32.mrf.mxu0 }
 0x154   : > { %v1848_v63 = vpop.f32.mrf.mxu1  ;;  %v1807_v7 = vadd.f32 %v1801_v62, %v1761_v0 }
 0x155   : > { %v2380_v1 = vpop.f32.mrf.mxu0 }
 0x156   : > { %v2386_v6 = vpop.f32.mrf.mxu1  ;;  %v1854_v14 = vadd.f32 %v1848_v63, %v1807_v7 }
 0x157   : > { %v1804_v8 = vpop.f32.mrf.mxu0 }
 0x158   : > { %v1851_v9 = vpop.f32.mrf.mxu1 }
 0x159   : > { %v2381_v10 = vpop.f32.mrf.mxu0 }
 0x15a   : > { %v2387_v13 = vpop.f32.mrf.mxu1 }
 0x15b   : > { %v1895_v15 = vpop.f32.mrf.mxu0 }
 0x15c   : > { %v1941_v3 = vpop.f32.mrf.mxu1  ;;  %v1901_v16 = vadd.f32 %v1895_v15, %v1854_v14 }
 0x15d   : > { %v2392_v17 = vpop.f32.mrf.mxu0 }
 0x15e   : > { %v2398_v18 = vpop.f32.mrf.mxu1  ;;  %v1947_v4 = vadd.f32 %v1941_v3, %v1901_v16 }
 0x15f   : > { %v1898_v11 = vpop.f32.mrf.mxu0 }
 0x160   : > { %v1944_v21 = vpop.f32.mrf.mxu1  ;;  %v1948_v22 = vadd.f32 %v2740_v5, %v1947_v4 }
 0x161   : > { %v2393_v12 = vpop.f32.mrf.mxu0 }
 0x162   : > { %v2399_v19 = vpop.f32.mrf.mxu1  ;;  %v1949_v23 = vmax.f32 %v1948_v22, 0.0 }
 0x164   : > { %2108 = vst.msk [vmem:[%s2747_s23 + $0xc] sm:$0xf] %vm690_vm3, %v1949_v23 }
 0x165 PF: > { %s14_s15 = sadd.s32 1, %s2417_s15  }
 0x166   : > { %p11_p4 = scmp.ge.s32.totalorder %s14_s15, 4  }
 0x168   :  { %13 = sbr.rel (!%p11_p4) target bundleno = 1 (0x1), region = 96 }

// kernel: _lambda_.3
= control target key start
LH: loop header
LB: loop body
LE: loop exit
PB: predicated region body
PF: predicated region fallthrough
CT: control target
= control target key end

     0   :  { %s4490_s15 = smov 0   ;;  %s5014_s0 = inlined_call_operand.vmem [shape: f32[2,18,9,4], index: 0, kind: input, shape index: {}]   ;;  %s5015_s1 = inlined_call_operand.vmem [shape: f32[2,18,9,4], index: 1, kind: input, shape index: {}]   ;;  %s5016_s2 = inlined_call_operand.vmem [shape: bf16[9,4,8], index: 2, kind: input, shape index: {}]   ;;  %s5017_s3 = inlined_call_operand.vmem [shape: f32[1,8], index: 3, kind: input, shape index: {}]   ;;  %s5018_s4 = inlined_call_operand.vmem [shape: f32[2,8,8,8], index: 4, kind: output, shape index: {}]  }
   0x1 LB: > { %s3699_s16 = sadd.s32 4294967295, %s4461_s15   ;;  %p3703_p0 = scmp.ge.s32.totalorder %s4461_s15, 1  ;;  %s4461_s15 = sphi %s4490_s15, %s14_s15  }
   0x2   : > { %p172_p1 = scmp.lt.s32.totalorder %s4461_s15, 3 }
   0x4   : > { %p173_p2 = pnand %p3703_p0, %p172_p1 }
   0x5   : > { %p203_p3 = scmp.lt.s32.totalorder (!%p173_p2), %s3699_s16, 1 }
   0x6   : > { %176 = sbr.rel (%p173_p2) target bundleno = 501 (0x1f5), region = 36 }
   0xb   : > { %v3708_v0 = vld [vmem:[%s5016_s2 + $0x2] sm:$0x3]  ;;  %vm245_vm0 = vcmask 1041408   ;;  %v220_v1 = vld [vmem:[%s5016_s2] sm:$0x3]  ;;  %v4463_v2 = vmov 0.0  }
   0xc   : > { %4012 = vmatprep.subr.bf16.mxu0 %v4463_v2  ;;  %v4506_v3 = vsel %vm245_vm0, %v3708_v0, 0  ;;  %4018 = vmatprep.subr.bf16.mxu1 %v4463_v2  ;;  %v4510_v4 = vsel %vm245_vm0, %v220_v1, 0  ;;  %vm4464_vm1 = vmmov 0   ;;  %s5020_s16 = smov (!%p203_p3, %s3699_s16), 1  ;;  %v3709_v5 = vld [vmem:[%s5016_s2 + $0x4] sm:$0x3] }
   0xd   : > { %4013 = vmatpush3.bf16.msra.mxu0 %v4506_v3  ;;  %4019 = vmatpush3.bf16.msra.mxu1 %v4510_v4  ;;  %s4444_s21 = smul.u32 288, %s5020_s16  ;;  %v3710_v6 = vld [vmem:[%s5016_s2 + $0x6] sm:$0x3]  ;;  %vm241_vm2 = vcmask 31744   ;;  %v4542_v11 = vsel %vm245_vm0, %v3709_v5, 0  ;;  %s3867_s20 = sshll.u32 %s5020_s16, 6 }
   0xe   : > { %4014 = vmatprep.mubr.msk.bf16.mxu0 %vm4464_vm1, %v4463_v2  ;;  %4020 = vmatprep.mubr.msk.bf16.mxu1 %vm4464_vm1, %v4463_v2  ;;  %v4545_v12 = vsel %vm245_vm0, %v3710_v6, 0  ;;  %v3711_v15 = vld [vmem:[%s5016_s2 + $0x8] sm:$0x3]  ;;  %v3712_v16 = vld [vmem:[%s5016_s2 + $0xa] sm:$0x3]  ;;  %s4917_s22 = scalar_lea.vmem %s5018_s4, %s3867_s20  ;;  %vm690_vm3 = vcmask 64512  }
   0xf   : > { %4024 = vmatprep.subr.bf16.mxu0 %v4463_v2  ;;  %4030 = vmatprep.subr.bf16.mxu1 %v4463_v2  ;;  %s4532_s28 = scalar_lea.vmem %s5014_s0, %s4444_s21  ;;  %s4537_s5 = scalar_lea.vmem %s5015_s1, %s4444_s21  ;;  %v4566_v19 = vsel %vm245_vm0, %v3711_v15, 0  ;;  %v4569_v20 = vsel %vm245_vm0, %v3712_v16, 0  ;;  %v3713_v23 = vld [vmem:[%s5016_s2 + $0xc] sm:$0x3]  ;;  %v3714_v24 = vld [vmem:[%s5016_s2 + $0xe] sm:$0x3] }
  0x10   : > { %v239_v7 = vld [vmem:[%s4537_s5] sm:$0xff]  ;;  %v3719_v14 = vld [vmem:[%s4532_s28 + $0x10] sm:$0xff]  ;;  %v4590_v27 = vsel %vm245_vm0, %v3713_v23, 0  ;;  %v4593_v28 = vsel %vm245_vm0, %v3714_v24, 0 }
  0x11   : > { %v237_v8 = vld [vmem:[%s4532_s28] sm:$0xff]  ;;  %v240_v9 = vpack.c.bf16 %v239_v7, %v239_v7  ;;  %v386_v18 = vpack.c.bf16 %v3719_v14, %v3719_v14  ;;  %v3721_v21 = vld [vmem:[%s4537_s5 + $0x10] sm:$0xff] }
  0x12   : > { %v238_v10 = vpack.c.bf16 %v237_v8, %v237_v8  ;;  %v335_v13 = vld [vmem:[%s4532_s28 + $0x1] sm:$0xff]  ;;  %v3723_v22 = vld [vmem:[%s4532_s28 + $0x11] sm:$0xff]  ;;  %v436_v25 = vpack.c.bf16 %v3721_v21, %v3721_v21 }
  0x13   : > { %4015 = vmatmul.mubr.msk.bf16.vlgmr.msra.gmra.mxu0 %vm241_vm2, %v240_v9  ;;  %v336_v17 = vpack.c.bf16 %v335_v13, %v335_v13  ;;  %v485_v26 = vpack.c.bf16 %v3723_v22, %v3723_v22  ;;  %v3725_v29 = vld [vmem:[%s4532_s28 + $0x20] sm:$0xff]  ;;  %v3715_v31 = vld [vmem:[%s5016_s2 + $0x10] sm:$0x3] }
  0x14   : > { %4021 = vmatmul.mubr.msk.bf16.vlgmr.msra.gmra.mxu1 %vm241_vm2, %v238_v10  ;;  %4025 = vmatpush3.bf16.msra.mxu0 %v4542_v11  ;;  %v3727_v30 = vld [vmem:[%s4537_s5 + $0x20] sm:$0xff]  ;;  %v535_v32 = vpack.c.bf16 %v3725_v29, %v3725_v29  ;;  %v4611_v34 = vsel %vm245_vm0, %v3715_v31, 0  ;;  %v3738_v37 = vld [vmem:[%s4532_s28 + $0x30] sm:$0xff] }
  0x15   : > { %4031 = vmatpush3.bf16.msra.mxu1 %v4545_v12  ;;  %4026 = vmatprep.mubr.msk.bf16.mxu0 %vm4464_vm1, %v4463_v2  ;;  %v585_v33 = vpack.c.bf16 %v3727_v30, %v3727_v30  ;;  %v3729_v35 = vld [vmem:[%s4532_s28 + $0x21] sm:$0xff]  ;;  %v3740_v38 = vld [vmem:[%s4537_s5 + $0x30] sm:$0xff]  ;;  %v830_v39 = vpack.c.bf16 %v3738_v37, %v3738_v37 }
  0x16   : > { %4032 = vmatprep.mubr.msk.bf16.mxu1 %vm4464_vm1, %v4463_v2  ;;  %4036 = vmatprep.subr.bf16.mxu0 %v4463_v2  ;;  %v634_v36 = vpack.c.bf16 %v3729_v35, %v3729_v35  ;;  %v877_v40 = vpack.c.bf16 %v3740_v38, %v3740_v38  ;;  %v3742_v41 = vld [vmem:[%s4532_s28 + $0x31] sm:$0xff]  ;;  %v3744_v42 = vld [vmem:[%s4532_s28 + $0x40] sm:$0xff] }
  0x17   : > { %4042 = vmatprep.subr.bf16.mxu1 %v4463_v2  ;;  %v923_v43 = vpack.c.bf16 %v3742_v41, %v3742_v41  ;;  %v970_v44 = vpack.c.bf16 %v3744_v42, %v3744_v42  ;;  %v3746_v45 = vld [vmem:[%s4537_s5 + $0x40] sm:$0xff]  ;;  %v3757_v49 = vld [vmem:[%s4532_s28 + $0x50] sm:$0xff] }
  0x18   : > { %v3748_v46 = vld [vmem:[%s4532_s28 + $0x41] sm:$0xff]  ;;  %v1017_v47 = vpack.c.bf16 %v3746_v45, %v3746_v45  ;;  %v1250_v50 = vpack.c.bf16 %v3757_v49, %v3757_v49  ;;  %v3759_v51 = vld [vmem:[%s4537_s5 + $0x50] sm:$0xff] }
  0x19   : > { %v1063_v48 = vpack.c.bf16 %v3748_v46, %v3748_v46  ;;  %v3761_v52 = vld [vmem:[%s4532_s28 + $0x51] sm:$0xff]  ;;  %v1297_v53 = vpack.c.bf16 %v3759_v51, %v3759_v51  ;;  %v3763_v55 = vld [vmem:[%s4532_s28 + $0x60] sm:$0xff] }
  0x1a   : > { %v1343_v54 = vpack.c.bf16 %v3761_v52, %v3761_v52  ;;  %v3765_v56 = vld [vmem:[%s4537_s5 + $0x60] sm:$0xff]  ;;  %v1390_v57 = vpack.c.bf16 %v3763_v55, %v3763_v55  ;;  %v3776_v61 = vld [vmem:[%s4532_s28 + $0x70] sm:$0xff] }
  0x1b   : > { %4027 = vmatmul.mubr.msk.bf16.vlgmr.msra.gmra.mxu0 %vm241_vm2, %v336_v17  ;;  %v1437_v58 = vpack.c.bf16 %v3765_v56, %v3765_v56  ;;  %v3767_v59 = vld [vmem:[%s4532_s28 + $0x61] sm:$0xff]  ;;  %v3778_v62 = vld [vmem:[%s4537_s5 + $0x70] sm:$0xff]  ;;  %v1670_v63 = vpack.c.bf16 %v3776_v61, %v3776_v61 }
  0x1c   : > { %4033 = vmatmul.mubr.msk.bf16.vlgmr.msra.gmra.mxu1 %vm241_vm2, %v386_v18  ;;  %4037 = vmatpush3.bf16.msra.mxu0 %v4566_v19  ;;  %v1483_v60 = vpack.c.bf16 %v3767_v59, %v3767_v59  ;;  %v1717_v0 = vpack.c.bf16 %v3778_v62, %v3778_v62  ;;  %v3780_v1 = vld [vmem:[%s4532_s28 + $0x71] sm:$0xff]  ;;  %v3782_v5 = vld [vmem:[%s4532_s28 + $0x80] sm:$0xff] }
  0x1d   : > { %4043 = vmatpush3.bf16.msra.mxu1 %v4569_v20  ;;  %4038 = vmatprep.mubr.msk.bf16.mxu0 %vm4464_vm1, %v4463_v2  ;;  %v1763_v6 = vpack.c.bf16 %v3780_v1, %v3780_v1  ;;  %v1810_v7 = vpack.c.bf16 %v3782_v5, %v3782_v5  ;;  %v3784_v8 = vld [vmem:[%s4537_s5 + $0x80] sm:$0xff]  ;;  %v3795_v14 = vld [vmem:[%s4532_s28 + $0x90] sm:$0xff] }
  0x1e   : > { %4044 = vmatprep.mubr.msk.bf16.mxu1 %vm4464_vm1, %v4463_v2  ;;  %4048 = vmatprep.subr.bf16.mxu0 %v4463_v2  ;;  %v3786_v9 = vld [vmem:[%s4532_s28 + $0x81] sm:$0xff]  ;;  %v1857_v10 = vpack.c.bf16 %v3784_v8, %v3784_v8  ;;  %v2090_v15 = vpack.c.bf16 %v3795_v14, %v3795_v14  ;;  %v3797_v16 = vld [vmem:[%s4537_s5 + $0x90] sm:$0xff] }
  0x1f   : > { %4054 = vmatprep.subr.bf16.mxu1 %v4463_v2  ;;  %v1903_v13 = vpack.c.bf16 %v3786_v9, %v3786_v9  ;;  %v3799_v17 = vld [vmem:[%s4532_s28 + $0x91] sm:$0xff]  ;;  %v2137_v18 = vpack.c.bf16 %v3797_v16, %v3797_v16  ;;  %v3801_v22 = vld [vmem:[%s4532_s28 + $0xa0] sm:$0xff] }
  0x20   : > { %v2183_v21 = vpack.c.bf16 %v3799_v17, %v3799_v17  ;;  %v3803_v23 = vld [vmem:[%s4537_s5 + $0xa0] sm:$0xff]  ;;  %v2230_v24 = vpack.c.bf16 %v3801_v22, %v3801_v22  ;;  %v3814_v30 = vld [vmem:[%s4532_s28 + $0xb0] sm:$0xff] }
  0x21   : > { %v3816_v31 = vld [vmem:[%s4537_s5 + $0xb0] sm:$0xff]  ;;  %v3820_v38 = vld [vmem:[%s4532_s28 + $0xc0] sm:$0xff] }
  0x22   : > { %v3818_v37 = vld [vmem:[%s4532_s28 + $0xb1] sm:$0xff]  ;;  %v3822_v49 = vld [vmem:[%s4537_s5 + $0xc0] sm:$0xff] }
  0x23   : > { %4039 = vmatmul.mubr.msk.bf16.vlgmr.msra.gmra.mxu0 %vm241_vm2, %v436_v25  ;;  %v2277_v25 = vpack.c.bf16 %v3803_v23, %v3803_v23  ;;  %v2697_v55 = vpack.c.bf16 %v3822_v49, %v3822_v49  ;;  %v3841_v49 = vld [vmem:[%s4537_s5 + $0xe0] sm:$0xff] }
  0x24   : > { %4045 = vmatmul.mubr.msk.bf16.vlgmr.msra.gmra.mxu1 %vm241_vm2, %v485_v26  ;;  %4049 = vmatpush3.bf16.msra.mxu0 %v4590_v27  ;;  %v3805_v26 = vld [vmem:[%s4532_s28 + $0xa1] sm:$0xff] }
  0x25   : > { %4055 = vmatpush3.bf16.msra.mxu1 %v4593_v28  ;;  %4050 = vmatprep.mubr.msk.bf16.mxu0 %vm4464_vm1, %v4463_v2  ;;  %v2323_v29 = vpack.c.bf16 %v3805_v26, %v3805_v26 }
  0x26   : > { %4056 = vmatprep.mubr.msk.bf16.mxu1 %vm4464_vm1, %v4463_v2  ;;  %4060 = vmatprep.subr.bf16.mxu0 %v4463_v2 }
  0x27   : > { %4066 = vmatprep.subr.bf16.mxu1 %v4463_v2 }
  0x2b   : > { %4051 = vmatmul.mubr.msk.bf16.vlgmr.msra.gmra.mxu0 %vm241_vm2, %v535_v32 }
  0x2c   : > { %4057 = vmatmul.mubr.msk.bf16.vlgmr.msra.gmra.mxu1 %vm241_vm2, %v585_v33  ;;  %4061 = vmatpush3.bf16.msra.mxu0 %v4611_v34 }
  0x2d   : > { %4067 = vmatpush3.bf16.msra.mxu1 %v4506_v3  ;;  %4062 = vmatprep.mubr.msk.bf16.mxu0 %vm4464_vm1, %v4463_v2 }
  0x2e   : > { %4068 = vmatprep.mubr.msk.bf16.mxu1 %vm4464_vm1, %v4463_v2  ;;  %4072 = vmatprep.subr.bf16.mxu0 %v4463_v2 }
  0x2f   : > { %4078 = vmatprep.subr.bf16.mxu1 %v4463_v2 }
  0x33   : > { %4063 = vmatmul.mubr.msk.bf16.vlgmr.msra.gmra.mxu0 %vm241_vm2, %v634_v36 }
  0x34   : > { %4069 = vmatmul.mubr.msk.bf16.vlgmr.msra.gmra.mxu1 %vm241_vm2, %v585_v33  ;;  %4073 = vmatpush3.bf16.msra.mxu0 %v4510_v4  ;;  %v2557_v33 = vpack.c.bf16 %v3816_v31, %v3816_v31 }
  0x35   : > { %4079 = vmatpush3.bf16.msra.mxu1 %v4542_v11  ;;  %4074 = vmatprep.mubr.msk.bf16.mxu0 %vm4464_vm1, %v4463_v2 }
  0x36   : > { %4080 = vmatprep.mubr.msk.bf16.mxu1 %vm4464_vm1, %v4463_v2  ;;  %4084 = vmatprep.subr.bf16.mxu0 %v4463_v2 }
  0x37   : > { %4090 = vmatprep.subr.bf16.mxu1 %v4463_v2 }
  0x3b   : > { %4075 = vmatmul.mubr.msk.bf16.vlgmr.msra.gmra.mxu0 %vm241_vm2, %v535_v32  ;;  %v2510_v32 = vpack.c.bf16 %v3814_v30, %v3814_v30 }
  0x3c   : > { %4081 = vmatmul.mubr.msk.bf16.vlgmr.msra.gmra.mxu1 %vm241_vm2, %v634_v36  ;;  %4085 = vmatpush3.bf16.msra.mxu0 %v4545_v12 }
  0x3d   : > { %4091 = vmatpush3.bf16.msra.mxu1 %v4566_v19  ;;  %4086 = vmatprep.mubr.msk.bf16.mxu0 %vm4464_vm1, %v4463_v2 }
  0x3e   : > { %4092 = vmatprep.mubr.msk.bf16.mxu1 %vm4464_vm1, %v4463_v2  ;;  %4096 = vmatprep.subr.bf16.mxu0 %v4463_v2 }
  0x3f   : > { %4102 = vmatprep.subr.bf16.mxu1 %v4463_v2 }
  0x43   : > { %4087 = vmatmul.mubr.msk.bf16.vlgmr.msra.gmra.mxu0 %vm241_vm2, %v830_v39 }
  0x44   : > { %4093 = vmatmul.mubr.msk.bf16.vlgmr.msra.gmra.mxu1 %vm241_vm2, %v877_v40  ;;  %4097 = vmatpush3.bf16.msra.mxu0 %v4569_v20 }
  0x45   : > { %4103 = vmatpush3.bf16.msra.mxu1 %v4590_v27  ;;  %4098 = vmatprep.mubr.msk.bf16.mxu0 %vm4464_vm1, %v4463_v2 }
  0x46   : > { %4104 = vmatprep.mubr.msk.bf16.mxu1 %vm4464_vm1, %v4463_v2  ;;  %4108 = vmatprep.subr.bf16.mxu0 %v4463_v2 }
  0x47   : > { %4114 = vmatprep.subr.bf16.mxu1 %v4463_v2 }
  0x4b   : > { %4099 = vmatmul.mubr.msk.bf16.vlgmr.msra.gmra.mxu0 %vm241_vm2, %v923_v43  ;;  %v2603_v43 = vpack.c.bf16 %v3818_v37, %v3818_v37 }
  0x4c   : > { %4105 = vmatmul.mubr.msk.bf16.vlgmr.msra.gmra.mxu1 %vm241_vm2, %v970_v44  ;;  %4109 = vmatpush3.bf16.msra.mxu0 %v4593_v28 }
  0x4d   : > { %4115 = vmatpush3.bf16.msra.mxu1 %v4611_v34  ;;  %4110 = vmatprep.mubr.msk.bf16.mxu0 %vm4464_vm1, %v4463_v2 }
  0x4e   : > { %4116 = vmatprep.mubr.msk.bf16.mxu1 %vm4464_vm1, %v4463_v2  ;;  %4120 = vmatprep.subr.bf16.mxu0 %v4463_v2 }
  0x4f   : > { %4126 = vmatprep.subr.bf16.mxu1 %v4463_v2 }
  0x53   : > { %4111 = vmatmul.mubr.msk.bf16.vlgmr.msra.gmra.mxu0 %vm241_vm2, %v1017_v47 }
  0x54   : > { %4117 = vmatmul.mubr.msk.bf16.vlgmr.msra.gmra.mxu1 %vm241_vm2, %v1063_v48  ;;  %4121 = vmatpush3.bf16.msra.mxu0 %v4506_v3 }
  0x55   : > { %4127 = vmatpush3.bf16.msra.mxu1 %v4510_v4  ;;  %4122 = vmatprep.mubr.msk.bf16.mxu0 %vm4464_vm1, %v4463_v2 }
  0x56   : > { %4128 = vmatprep.mubr.msk.bf16.mxu1 %vm4464_vm1, %v4463_v2  ;;  %4132 = vmatprep.subr.bf16.mxu0 %v4463_v2 }
  0x57   : > { %4138 = vmatprep.subr.bf16.mxu1 %v4463_v2 }
  0x5b   : > { %4123 = vmatmul.mubr.msk.bf16.vlgmr.msra.gmra.mxu0 %vm241_vm2, %v1017_v47 }
  0x5c   : > { %4129 = vmatmul.mubr.msk.bf16.vlgmr.msra.gmra.mxu1 %vm241_vm2, %v970_v44  ;;  %4133 = vmatpush3.bf16.msra.mxu0 %v4542_v11  ;;  %v2650_v44 = vpack.c.bf16 %v3820_v38, %v3820_v38 }
  0x5d   : > { %4139 = vmatpush3.bf16.msra.mxu1 %v4545_v12  ;;  %4134 = vmatprep.mubr.msk.bf16.mxu0 %vm4464_vm1, %v4463_v2 }
  0x5e   : > { %4140 = vmatprep.mubr.msk.bf16.mxu1 %vm4464_vm1, %v4463_v2  ;;  %4144 = vmatprep.subr.bf16.mxu0 %v4463_v2 }
  0x5f   : > { %4150 = vmatprep.subr.bf16.mxu1 %v4463_v2 }
  0x63   : > { %4135 = vmatmul.mubr.msk.bf16.vlgmr.msra.gmra.mxu0 %vm241_vm2, %v1063_v48 }
  0x64   : > { %4141 = vmatmul.mubr.msk.bf16.vlgmr.msra.gmra.mxu1 %vm241_vm2, %v1250_v50  ;;  %4145 = vmatpush3.bf16.msra.mxu0 %v4566_v19  ;;  %v3824_v50 = vld [vmem:[%s4532_s28 + $0xc1] sm:$0xff] }
  0x65   : > { %4151 = vmatpush3.bf16.msra.mxu1 %v4569_v20  ;;  %4146 = vmatprep.mubr.msk.bf16.mxu0 %vm4464_vm1, %v4463_v2  ;;  %v2743_v56 = vpack.c.bf16 %v3824_v50, %v3824_v50 }
  0x66   : > { %4152 = vmatprep.mubr.msk.bf16.mxu1 %vm4464_vm1, %v4463_v2  ;;  %4156 = vmatprep.subr.bf16.mxu0 %v4463_v2 }
  0x67   : > { %4162 = vmatprep.subr.bf16.mxu1 %v4463_v2 }
  0x6b   : > { %4147 = vmatmul.mubr.msk.bf16.vlgmr.msra.gmra.mxu0 %vm241_vm2, %v1297_v53 }
  0x6c   : > { %4153 = vmatmul.mubr.msk.bf16.vlgmr.msra.gmra.mxu1 %vm241_vm2, %v1343_v54  ;;  %4157 = vmatpush3.bf16.msra.mxu0 %v4590_v27 }
  0x6d   : > { %4163 = vmatpush3.bf16.msra.mxu1 %v4593_v28  ;;  %4158 = vmatprep.mubr.msk.bf16.mxu0 %vm4464_vm1, %v4463_v2 }
  0x6e   : > { %4164 = vmatprep.mubr.msk.bf16.mxu1 %vm4464_vm1, %v4463_v2  ;;  %4168 = vmatprep.subr.bf16.mxu0 %v4463_v2 }
  0x6f   : > { %4174 = vmatprep.subr.bf16.mxu1 %v4463_v2 }
  0x73   : > { %4159 = vmatmul.mubr.msk.bf16.vlgmr.msra.gmra.mxu0 %vm241_vm2, %v1390_v57 }
  0x74   : > { %4165 = vmatmul.mubr.msk.bf16.vlgmr.msra.gmra.mxu1 %vm241_vm2, %v1437_v58  ;;  %4169 = vmatpush3.bf16.msra.mxu0 %v4611_v34 }
  0x75   : > { %4175 = vmatpush3.bf16.msra.mxu1 %v4506_v3  ;;  %4170 = vmatprep.mubr.msk.bf16.mxu0 %vm4464_vm1, %v4463_v2 }
  0x76   : > { %4176 = vmatprep.mubr.msk.bf16.mxu1 %vm4464_vm1, %v4463_v2  ;;  %4180 = vmatprep.subr.bf16.mxu0 %v4463_v2 }
  0x77   : > { %4186 = vmatprep.subr.bf16.mxu1 %v4463_v2 }
  0x7b   : > { %4171 = vmatmul.mubr.msk.bf16.vlgmr.msra.gmra.mxu0 %vm241_vm2, %v1483_v60 }
  0x7c   : > { %4177 = vmatmul.mubr.msk.bf16.vlgmr.msra.gmra.mxu1 %vm241_vm2, %v1437_v58  ;;  %4181 = vmatpush3.bf16.msra.mxu0 %v4510_v4 }
  0x7d   : > { %4187 = vmatpush3.bf16.msra.mxu1 %v4542_v11  ;;  %4182 = vmatprep.mubr.msk.bf16.mxu0 %vm4464_vm1, %v4463_v2 }
  0x7e   : > { %4188 = vmatprep.mubr.msk.bf16.mxu1 %vm4464_vm1, %v4463_v2  ;;  %4192 = vmatprep.subr.bf16.mxu0 %v4463_v2 }
  0x7f   : > { %4198 = vmatprep.subr.bf16.mxu1 %v4463_v2 }
  0x83   : > { %4183 = vmatmul.mubr.msk.bf16.vlgmr.msra.gmra.mxu0 %vm241_vm2, %v1390_v57 }
  0x84   : > { %4189 = vmatmul.mubr.msk.bf16.vlgmr.msra.gmra.mxu1 %vm241_vm2, %v1483_v60  ;;  %4193 = vmatpush3.bf16.msra.mxu0 %v4545_v12 }
  0x85   : > { %4199 = vmatpush3.bf16.msra.mxu1 %v4566_v19  ;;  %4194 = vmatprep.mubr.msk.bf16.mxu0 %vm4464_vm1, %v4463_v2 }
  0x86   : > { %4200 = vmatprep.mubr.msk.bf16.mxu1 %vm4464_vm1, %v4463_v2  ;;  %4204 = vmatprep.subr.bf16.mxu0 %v4463_v2 }
  0x87   : > { %4210 = vmatprep.subr.bf16.mxu1 %v4463_v2 }
  0x8b   : > { %4195 = vmatmul.mubr.msk.bf16.vlgmr.msra.gmra.mxu0 %vm241_vm2, %v1670_v63 }
  0x8c   : > { %4201 = vmatmul.mubr.msk.bf16.vlgmr.msra.gmra.mxu1 %vm241_vm2, %v1717_v0  ;;  %4205 = vmatpush3.bf16.msra.mxu0 %v4569_v20 }
  0x8d   : > { %4211 = vmatpush3.bf16.msra.mxu1 %v4590_v27  ;;  %4206 = vmatprep.mubr.msk.bf16.mxu0 %vm4464_vm1, %v4463_v2 }
  0x8e   : > { %4212 = vmatprep.mubr.msk.bf16.mxu1 %vm4464_vm1, %v4463_v2  ;;  %4216 = vmatprep.subr.bf16.mxu0 %v4463_v2 }
  0x8f   : > { %4222 = vmatprep.subr.bf16.mxu1 %v4463_v2 }
  0x93   : > { %4207 = vmatmul.mubr.msk.bf16.vlgmr.msra.gmra.mxu0 %vm241_vm2, %v1763_v6 }
  0x94   : > { %4213 = vmatmul.mubr.msk.bf16.vlgmr.msra.gmra.mxu1 %vm241_vm2, %v1810_v7  ;;  %4217 = vmatpush3.bf16.msra.mxu0 %v4593_v28 }
  0x95   : > { %4223 = vmatpush3.bf16.msra.mxu1 %v4611_v34  ;;  %4218 = vmatprep.mubr.msk.bf16.mxu0 %vm4464_vm1, %v4463_v2 }
  0x96   : > { %4224 = vmatprep.mubr.msk.bf16.mxu1 %vm4464_vm1, %v4463_v2  ;;  %4228 = vmatprep.subr.bf16.mxu0 %v4463_v2 }
  0x97   : > { %4234 = vmatprep.subr.bf16.mxu1 %v4463_v2 }
  0x9b   : > { %4219 = vmatmul.mubr.msk.bf16.vlgmr.msra.gmra.mxu0 %vm241_vm2, %v1857_v10 }
  0x9c   : > { %4225 = vmatmul.mubr.msk.bf16.vlgmr.msra.gmra.mxu1 %vm241_vm2, %v1903_v13  ;;  %4229 = vmatpush3.bf16.msra.mxu0 %v4506_v3 }
  0x9d   : > { %4235 = vmatpush3.bf16.msra.mxu1 %v4510_v4  ;;  %4230 = vmatprep.mubr.msk.bf16.mxu0 %vm4464_vm1, %v4463_v2 }
  0x9e   : > { %4236 = vmatprep.mubr.msk.bf16.mxu1 %vm4464_vm1, %v4463_v2  ;;  %4240 = vmatprep.subr.bf16.mxu0 %v4463_v2 }
  0x9f   : > { %4246 = vmatprep.subr.bf16.mxu1 %v4463_v2 }
  0xa3   : > { %4231 = vmatmul.mubr.msk.bf16.vlgmr.msra.gmra.mxu0 %vm241_vm2, %v1857_v10 }
  0xa4   : > { %4237 = vmatmul.mubr.msk.bf16.vlgmr.msra.gmra.mxu1 %vm241_vm2, %v1810_v7  ;;  %4241 = vmatpush3.bf16.msra.mxu0 %v4542_v11 }
  0xa5   : > { %4247 = vmatpush3.bf16.msra.mxu1 %v4545_v12  ;;  %4242 = vmatprep.mubr.msk.bf16.mxu0 %vm4464_vm1, %v4463_v2 }
  0xa6   : > { %4248 = vmatprep.mubr.msk.bf16.mxu1 %vm4464_vm1, %v4463_v2  ;;  %4252 = vmatprep.subr.bf16.mxu0 %v4463_v2 }
  0xa7   : > { %4258 = vmatprep.subr.bf16.mxu1 %v4463_v2 }
  0xab   : > { %4243 = vmatmul.mubr.msk.bf16.vlgmr.msra.gmra.mxu0 %vm241_vm2, %v1903_v13 }
  0xac   : > { %4249 = vmatmul.mubr.msk.bf16.vlgmr.msra.gmra.mxu1 %vm241_vm2, %v2090_v15  ;;  %4253 = vmatpush3.bf16.msra.mxu0 %v4566_v19  ;;  %v3833_v15 = vld [vmem:[%s4532_s28 + $0xd0] sm:$0xff] }
  0xad   : > { %4259 = vmatpush3.bf16.msra.mxu1 %v4569_v20  ;;  %4254 = vmatprep.mubr.msk.bf16.mxu0 %vm4464_vm1, %v4463_v2  ;;  %v2930_v23 = vpack.c.bf16 %v3833_v15, %v3833_v15 }
  0xae   : > { %4260 = vmatprep.mubr.msk.bf16.mxu1 %vm4464_vm1, %v4463_v2  ;;  %4264 = vmatprep.subr.bf16.mxu0 %v4463_v2 }
  0xaf   : > { %4270 = vmatprep.subr.bf16.mxu1 %v4463_v2 }
  0xb3   : > { %4255 = vmatmul.mubr.msk.bf16.vlgmr.msra.gmra.mxu0 %vm241_vm2, %v2137_v18 }
  0xb4   : > { %4261 = vmatmul.mubr.msk.bf16.vlgmr.msra.gmra.mxu1 %vm241_vm2, %v2183_v21  ;;  %4265 = vmatpush3.bf16.msra.mxu0 %v4590_v27 }
  0xb5   : > { %4271 = vmatpush3.bf16.msra.mxu1 %v4593_v28  ;;  %4266 = vmatprep.mubr.msk.bf16.mxu0 %vm4464_vm1, %v4463_v2 }
  0xb6   : > { %4272 = vmatprep.mubr.msk.bf16.mxu1 %vm4464_vm1, %v4463_v2  ;;  %4276 = vmatprep.subr.bf16.mxu0 %v4463_v2 }
  0xb7   : > { %4282 = vmatprep.subr.bf16.mxu1 %v4463_v2 }
  0xbb   : > { %4267 = vmatmul.mubr.msk.bf16.vlgmr.msra.gmra.mxu0 %vm241_vm2, %v2230_v24 }
  0xbc   : > { %4273 = vmatmul.mubr.msk.bf16.vlgmr.msra.gmra.mxu1 %vm241_vm2, %v2277_v25  ;;  %4277 = vmatpush3.bf16.msra.mxu0 %v4611_v34 }
  0xbd   : > { %4283 = vmatpush3.bf16.msra.mxu1 %v4506_v3  ;;  %4278 = vmatprep.mubr.msk.bf16.mxu0 %vm4464_vm1, %v4463_v2 }
  0xbe   : > { %4284 = vmatprep.mubr.msk.bf16.mxu1 %vm4464_vm1, %v4463_v2  ;;  %4288 = vmatprep.subr.bf16.mxu0 %v4463_v2 }
  0xbf   : > { %4294 = vmatprep.subr.bf16.mxu1 %v4463_v2 }
  0xc3   : > { %4279 = vmatmul.mubr.msk.bf16.vlgmr.msra.gmra.mxu0 %vm241_vm2, %v2323_v29 }
  0xc4   : > { %4285 = vmatmul.mubr.msk.bf16.vlgmr.msra.gmra.mxu1 %vm241_vm2, %v2277_v25  ;;  %4289 = vmatpush3.bf16.msra.mxu0 %v4510_v4 }
  0xc5   : > { %4295 = vmatpush3.bf16.msra.mxu1 %v4542_v11  ;;  %4290 = vmatprep.mubr.msk.bf16.mxu0 %vm4464_vm1, %v4463_v2 }
  0xc6   : > { %4296 = vmatprep.mubr.msk.bf16.mxu1 %vm4464_vm1, %v4463_v2  ;;  %4300 = vmatprep.subr.bf16.mxu0 %v4463_v2 }
  0xc7   : > { %4306 = vmatprep.subr.bf16.mxu1 %v4463_v2 }
  0xcb   : > { %4291 = vmatmul.mubr.msk.bf16.vlgmr.msra.gmra.mxu0 %vm241_vm2, %v2230_v24 }
  0xcc   : > { %4297 = vmatmul.mubr.msk.bf16.vlgmr.msra.gmra.mxu1 %vm241_vm2, %v2323_v29  ;;  %4301 = vmatpush3.bf16.msra.mxu0 %v4545_v12  ;;  %v4898_v29 = vld [vmem:[%s5017_s3] ss:$0 sm:$0xff] }
  0xcd   : > { %4307 = vmatpush3.bf16.msra.mxu1 %v4566_v19  ;;  %4302 = vmatprep.mubr.msk.bf16.mxu0 %vm4464_vm1, %v4463_v2 }
  0xce   : > { %4308 = vmatprep.mubr.msk.bf16.mxu1 %vm4464_vm1, %v4463_v2  ;;  %4312 = vmatprep.subr.bf16.mxu0 %v4463_v2 }
  0xcf   : > { %4318 = vmatprep.subr.bf16.mxu1 %v4463_v2 }
  0xd3   : > { %v283_v35 = vpop.f32.mrf.mxu0  ;;  %4303 = vmatmul.mubr.msk.bf16.vlgmr.msra.gmra.mxu0 %vm241_vm2, %v2510_v32 }
  0xd4   : > { %v329_v36 = vpop.f32.mrf.mxu1  ;;  %4309 = vmatmul.mubr.msk.bf16.vlgmr.msra.gmra.mxu1 %vm241_vm2, %v2557_v33  ;;  %4313 = vmatpush3.bf16.msra.mxu0 %v4569_v20  ;;  %v3835_v33 = vld [vmem:[%s4537_s5 + $0xd0] sm:$0xff] }
  0xd5   : > { %4319 = vmatpush3.bf16.msra.mxu1 %v4590_v27  ;;  %v4016_v39 = vpop.f32.mrf.mxu0  ;;  %4314 = vmatprep.mubr.msk.bf16.mxu0 %vm4464_vm1, %v4463_v2  ;;  %v330_v57 = vadd.f32 %v329_v36, %v283_v35  ;;  %v3837_v35 = vld [vmem:[%s4532_s28 + $0xd1] sm:$0xff] }
  0xd6   : > { %v4022_v40 = vpop.f32.mrf.mxu1  ;;  %4320 = vmatprep.mubr.msk.bf16.mxu1 %vm4464_vm1, %v4463_v2  ;;  %4324 = vmatprep.subr.bf16.mxu0 %v4463_v2 }
  0xd7   : > { %4330 = vmatprep.subr.bf16.mxu1 %v4463_v2  ;;  %v286_v41 = vpop.f32.mrf.mxu0 }
  0xd8   : > { %v332_v42 = vpop.f32.mrf.mxu1  ;;  %v2977_v41 = vpack.c.bf16 %v3835_v33, %v3835_v33 }
  0xd9   : > { %v4017_v45 = vpop.f32.mrf.mxu0  ;;  %v3023_v42 = vpack.c.bf16 %v3837_v35, %v3837_v35 }
  0xda   : > { %v4023_v46 = vpop.f32.mrf.mxu1 }
  0xdb   : > { %v377_v47 = vpop.f32.mrf.mxu0  ;;  %4315 = vmatmul.mubr.msk.bf16.vlgmr.msra.gmra.mxu0 %vm241_vm2, %v2603_v43 }
  0xdc   : > { %v427_v48 = vpop.f32.mrf.mxu1  ;;  %4321 = vmatmul.mubr.msk.bf16.vlgmr.msra.gmra.mxu1 %vm241_vm2, %v2650_v44  ;;  %4325 = vmatpush3.bf16.msra.mxu0 %v4593_v28  ;;  %v383_v60 = vadd.f32 %v377_v47, %v330_v57 }
  0xdd   : > { %4331 = vmatpush3.bf16.msra.mxu1 %v4611_v34  ;;  %v4028_v51 = vpop.f32.mrf.mxu0  ;;  %4326 = vmatprep.mubr.msk.bf16.mxu0 %vm4464_vm1, %v4463_v2 }
  0xde   : > { %v4034_v52 = vpop.f32.mrf.mxu1  ;;  %4332 = vmatprep.mubr.msk.bf16.mxu1 %vm4464_vm1, %v4463_v2  ;;  %4336 = vmatprep.subr.bf16.mxu0 %v4463_v2  ;;  %v433_v1 = vadd.f32 %v427_v48, %v383_v60  ;;  %v3839_v48 = vld [vmem:[%s4532_s28 + $0xe0] sm:$0xff] }
  0xdf   : > { %4342 = vmatprep.subr.bf16.mxu1 %v4463_v2  ;;  %v380_v53 = vpop.f32.mrf.mxu0 }
  0xe0   : > { %v430_v54 = vpop.f32.mrf.mxu1 }
  0xe1   : > { %v4029_v58 = vpop.f32.mrf.mxu0  ;;  %v3070_v54 = vpack.c.bf16 %v3839_v48, %v3839_v48 }
  0xe2   : > { %v4035_v59 = vpop.f32.mrf.mxu1 }
  0xe3   : > { %v477_v61 = vpop.f32.mrf.mxu0  ;;  %4327 = vmatmul.mubr.msk.bf16.vlgmr.msra.gmra.mxu0 %vm241_vm2, %v2697_v55 }
  0xe4   : > { %v526_v62 = vpop.f32.mrf.mxu1  ;;  %4333 = vmatmul.mubr.msk.bf16.vlgmr.msra.gmra.mxu1 %vm241_vm2, %v2743_v56  ;;  %4337 = vmatpush3.bf16.msra.mxu0 %v4506_v3  ;;  %v483_v7 = vadd.f32 %v477_v61, %v433_v1  ;;  %v3843_v61 = vld [vmem:[%s4532_s28 + $0xe1] sm:$0xff] }
  0xe5   : > { %4343 = vmatpush3.bf16.msra.mxu1 %v4510_v4  ;;  %v4040_v63 = vpop.f32.mrf.mxu0  ;;  %4338 = vmatprep.mubr.msk.bf16.mxu0 %vm4464_vm1, %v4463_v2 }
  0xe6   : > { %v4046_v0 = vpop.f32.mrf.mxu1  ;;  %4344 = vmatprep.mubr.msk.bf16.mxu1 %vm4464_vm1, %v4463_v2  ;;  %4348 = vmatprep.subr.bf16.mxu0 %v4463_v2  ;;  %v532_v14 = vadd.f32 %v526_v62, %v483_v7 }
  0xe7   : > { %4354 = vmatprep.subr.bf16.mxu1 %v4463_v2  ;;  %v480_v5 = vpop.f32.mrf.mxu0 }
  0xe8   : > { %v529_v6 = vpop.f32.mrf.mxu1 }
  0xe9   : > { %v4041_v8 = vpop.f32.mrf.mxu0  ;;  %v3163_v6 = vpack.c.bf16 %v3843_v61, %v3843_v61 }
  0xea   : > { %v4047_v9 = vpop.f32.mrf.mxu1 }
  0xeb   : > { %v576_v10 = vpop.f32.mrf.mxu0  ;;  %4339 = vmatmul.mubr.msk.bf16.vlgmr.msra.gmra.mxu0 %vm241_vm2, %v2697_v55  ;;  %v3117_v55 = vpack.c.bf16 %v3841_v49, %v3841_v49 }
  0xec   : > { %v626_v13 = vpop.f32.mrf.mxu1  ;;  %4345 = vmatmul.mubr.msk.bf16.vlgmr.msra.gmra.mxu1 %vm241_vm2, %v2650_v44  ;;  %4349 = vmatpush3.bf16.msra.mxu0 %v4542_v11  ;;  %v582_v18 = vadd.f32 %v576_v10, %v532_v14 }
  0xed   : > { %4355 = vmatpush3.bf16.msra.mxu1 %v4545_v12  ;;  %v4052_v16 = vpop.f32.mrf.mxu0  ;;  %4350 = vmatprep.mubr.msk.bf16.mxu0 %vm4464_vm1, %v4463_v2 }
  0xee   : > { %v4058_v17 = vpop.f32.mrf.mxu1  ;;  %4356 = vmatprep.mubr.msk.bf16.mxu1 %vm4464_vm1, %v4463_v2  ;;  %4360 = vmatprep.subr.bf16.mxu0 %v4463_v2  ;;  %v632_v26 = vadd.f32 %v626_v13, %v582_v18 }
  0xef   : > { %4366 = vmatprep.subr.bf16.mxu1 %v4463_v2  ;;  %v579_v21 = vpop.f32.mrf.mxu0 }
  0xf0   : > { %v629_v22 = vpop.f32.mrf.mxu1 }
  0xf1   : > { %v4053_v24 = vpop.f32.mrf.mxu0 }
  0xf2   : > { %v4059_v25 = vpop.f32.mrf.mxu1 }
  0xf3   : > { %v675_v30 = vpop.f32.mrf.mxu0  ;;  %4351 = vmatmul.mubr.msk.bf16.vlgmr.msra.gmra.mxu0 %vm241_vm2, %v2743_v56  ;;  %v3852_v25 = vld [vmem:[%s4532_s28 + $0xf0] sm:$0xff] }
  0xf4   : > { %v733_v31 = vpop.f32.mrf.mxu1  ;;  %4357 = vmatmul.mubr.msk.bf16.vlgmr.msra.gmra.mxu1 %vm241_vm2, %v2930_v23  ;;  %v681_v32 = vadd.f32 %v675_v30, %v632_v26  ;;  %4361 = vmatpush3.bf16.msra.mxu0 %v4566_v19  ;;  %v3854_v26 = vld [vmem:[%s4537_s5 + $0xf0] sm:$0xff]  ;;  %v3350_v33 = vpack.c.bf16 %v3852_v25, %v3852_v25 }
  0xf5   : > { %4367 = vmatpush3.bf16.msra.mxu1 %v4569_v20  ;;  %v4064_v36 = vpop.f32.mrf.mxu0  ;;  %4362 = vmatprep.mubr.msk.bf16.mxu0 %vm4464_vm1, %v4463_v2  ;;  %v3397_v35 = vpack.c.bf16 %v3854_v26, %v3854_v26 }
  0xf6   : > { %v4070_v37 = vpop.f32.mrf.mxu1  ;;  %4368 = vmatprep.mubr.msk.bf16.mxu1 %vm4464_vm1, %v4463_v2  ;;  %v688_v38 = vadd.f32 %v4898_v29, %v681_v32  ;;  %4372 = vmatprep.subr.bf16.mxu0 %v4463_v2 }
  0xf7   : > { %4378 = vmatprep.subr.bf16.mxu1 %v4463_v2  ;;  %v678_v39 = vpop.f32.mrf.mxu0 }
  0xf8   : > { %v736_v40 = vpop.f32.mrf.mxu1  ;;  %v689_v43 = vmax.f32 %v688_v38, 0.0 }
  0xf9   : > { %v4065_v44 = vpop.f32.mrf.mxu0 }
  0xfa   : > { %v4071_v45 = vpop.f32.mrf.mxu1  ;;  %691 = vst.msk [vmem:[%s4917_s22] sm:$0xff] %vm690_vm3, %v689_v43  ;;  %v3858_v43 = vld [vmem:[%s4532_s28 + $0x100] sm:$0xff] }
  0xfb   : > { %v776_v46 = vpop.f32.mrf.mxu0  ;;  %4363 = vmatmul.mubr.msk.bf16.vlgmr.msra.gmra.mxu0 %vm241_vm2, %v2977_v41 }
  0xfc   : > { %v821_v47 = vpop.f32.mrf.mxu1  ;;  %4369 = vmatmul.mubr.msk.bf16.vlgmr.msra.gmra.mxu1 %vm241_vm2, %v3023_v42  ;;  %4373 = vmatpush3.bf16.msra.mxu0 %v4590_v27  ;;  %v777_v58 = vadd.f32 %v776_v46, %v733_v31  ;;  %v3856_v42 = vld [vmem:[%s4532_s28 + $0xf1] sm:$0xff] }
  0xfd   : > { %4379 = vmatpush3.bf16.msra.mxu1 %v4593_v28  ;;  %v4076_v50 = vpop.f32.mrf.mxu0  ;;  %4374 = vmatprep.mubr.msk.bf16.mxu0 %vm4464_vm1, %v4463_v2 }
  0xfe   : > { %v4082_v51 = vpop.f32.mrf.mxu1  ;;  %4380 = vmatprep.mubr.msk.bf16.mxu1 %vm4464_vm1, %v4463_v2  ;;  %4384 = vmatprep.subr.bf16.mxu0 %v4463_v2  ;;  %v827_v0 = vadd.f32 %v821_v47, %v777_v58  ;;  %v3443_v47 = vpack.c.bf16 %v3856_v42, %v3856_v42 }
  0xff   : > { %4390 = vmatprep.subr.bf16.mxu1 %v4463_v2  ;;  %v779_v52 = vpop.f32.mrf.mxu0 }
 0x100   : > { %v824_v53 = vpop.f32.mrf.mxu1  ;;  %v3860_v52 = vld [vmem:[%s4537_s5 + $0x100] sm:$0xff] }
 0x101   : > { %v4077_v56 = vpop.f32.mrf.mxu0  ;;  %v3862_v53 = vld [vmem:[%s4532_s28 + $0x101] sm:$0xff]  ;;  %v3537_v58 = vpack.c.bf16 %v3860_v52, %v3860_v52 }
 0x102   : > { %v4083_v57 = vpop.f32.mrf.mxu1 }
 0x103   : > { %v868_v59 = vpop.f32.mrf.mxu0  ;;  %4375 = vmatmul.mubr.msk.bf16.vlgmr.msra.gmra.mxu0 %vm241_vm2, %v3070_v54 }
 0x104   : > { %v915_v60 = vpop.f32.mrf.mxu1  ;;  %4381 = vmatmul.mubr.msk.bf16.vlgmr.msra.gmra.mxu1 %vm241_vm2, %v3117_v55  ;;  %4385 = vmatpush3.bf16.msra.mxu0 %v4611_v34  ;;  %v874_v7 = vadd.f32 %v868_v59, %v827_v0  ;;  %v3583_v59 = vpack.c.bf16 %v3862_v53, %v3862_v53 }
 0x105   : > { %4391 = vmatpush3.bf16.msra.mxu1 %v4506_v3  ;;  %v4088_v62 = vpop.f32.mrf.mxu0  ;;  %4386 = vmatprep.mubr.msk.bf16.mxu0 %vm4464_vm1, %v4463_v2 }
 0x106   : > { %v4094_v63 = vpop.f32.mrf.mxu1  ;;  %4392 = vmatprep.mubr.msk.bf16.mxu1 %vm4464_vm1, %v4463_v2  ;;  %4396 = vmatprep.subr.bf16.mxu0 %v4463_v2  ;;  %v921_v13 = vadd.f32 %v915_v60, %v874_v7 }
 0x107   : > { %4402 = vmatprep.subr.bf16.mxu1 %v4463_v2  ;;  %v871_v1 = vpop.f32.mrf.mxu0 }
 0x108   : > { %v918_v5 = vpop.f32.mrf.mxu1 }
 0x109   : > { %v4089_v8 = vpop.f32.mrf.mxu0 }
 0x10a   : > { %v4095_v3 = vpop.f32.mrf.mxu1 }
 0x10b   : > { %v961_v9 = vpop.f32.mrf.mxu0  ;;  %4387 = vmatmul.mubr.msk.bf16.vlgmr.msra.gmra.mxu0 %vm241_vm2, %v3163_v6 }
 0x10c   : > { %v1008_v10 = vpop.f32.mrf.mxu1  ;;  %4393 = vmatmul.mubr.msk.bf16.vlgmr.msra.gmra.mxu1 %vm241_vm2, %v3117_v55  ;;  %4397 = vmatpush3.bf16.msra.mxu0 %v4510_v4  ;;  %v967_v16 = vadd.f32 %v961_v9, %v921_v13 }
 0x10d   : > { %4403 = vmatpush3.bf16.msra.mxu1 %v4542_v11  ;;  %v4100_v14 = vpop.f32.mrf.mxu0  ;;  %4398 = vmatprep.mubr.msk.bf16.mxu0 %vm4464_vm1, %v4463_v2 }
 0x10e   : > { %v4106_v15 = vpop.f32.mrf.mxu1  ;;  %4404 = vmatprep.mubr.msk.bf16.mxu1 %vm4464_vm1, %v4463_v2  ;;  %4408 = vmatprep.subr.bf16.mxu0 %v4463_v2  ;;  %v1014_v11 = vadd.f32 %v1008_v10, %v967_v16 }
 0x10f   : > { %4414 = vmatprep.subr.bf16.mxu1 %v4463_v2  ;;  %v964_v17 = vpop.f32.mrf.mxu0 }
 0x110   : > { %v1011_v18 = vpop.f32.mrf.mxu1 }
 0x111   : > { %v4101_v4 = vpop.f32.mrf.mxu0 }
 0x112   : > { %v4107_v21 = vpop.f32.mrf.mxu1 }
 0x113   : > { %v1055_v22 = vpop.f32.mrf.mxu0  ;;  %4399 = vmatmul.mubr.msk.bf16.vlgmr.msra.gmra.mxu0 %vm241_vm2, %v3070_v54 }
 0x114   : > { %v1101_v23 = vpop.f32.mrf.mxu1  ;;  %4405 = vmatmul.mubr.msk.bf16.vlgmr.msra.gmra.mxu1 %vm241_vm2, %v3163_v6  ;;  %v1061_v24 = vadd.f32 %v1055_v22, %v1014_v11  ;;  %4409 = vmatpush3.bf16.msra.mxu0 %v4545_v12 }
 0x115   : > { %4415 = vmatpush3.bf16.msra.mxu1 %v4566_v19  ;;  %v4112_v30 = vpop.f32.mrf.mxu0  ;;  %4410 = vmatprep.mubr.msk.bf16.mxu0 %vm4464_vm1, %v4463_v2 }
 0x116   : > { %v4118_v31 = vpop.f32.mrf.mxu1  ;;  %4416 = vmatprep.mubr.msk.bf16.mxu1 %vm4464_vm1, %v4463_v2  ;;  %v1107_v32 = vadd.f32 %v1101_v23, %v1061_v24  ;;  %4420 = vmatprep.subr.bf16.mxu0 %v4463_v2 }
 0x117   : > { %4426 = vmatprep.subr.bf16.mxu1 %v4463_v2  ;;  %v1058_v12 = vpop.f32.mrf.mxu0 }
 0x118   : > { %v1104_v19 = vpop.f32.mrf.mxu1  ;;  %v1108_v36 = vadd.f32 %v4898_v29, %v1107_v32 }
 0x119   : > { %v4113_v37 = vpop.f32.mrf.mxu0 }
 0x11a   : > { %v4119_v38 = vpop.f32.mrf.mxu1  ;;  %v1109_v39 = vmax.f32 %v1108_v36, 0.0 }
 0x11b   : > { %v1153_v40 = vpop.f32.mrf.mxu0  ;;  %4411 = vmatmul.mubr.msk.bf16.vlgmr.msra.gmra.mxu0 %vm241_vm2, %v3350_v33 }
 0x11c   : > { %v1196_v41 = vpop.f32.mrf.mxu1  ;;  %4417 = vmatmul.mubr.msk.bf16.vlgmr.msra.gmra.mxu1 %vm241_vm2, %v3397_v35  ;;  %3750 = vst.msk [vmem:[%s4917_s22 + $0x8] sm:$0xff] %vm690_vm3, %v1109_v39  ;;  %4421 = vmatpush3.bf16.msra.mxu0 %v4569_v20 }
 0x11d   : > { %4427 = vmatpush3.bf16.msra.mxu1 %v4590_v27  ;;  %v4124_v44 = vpop.f32.mrf.mxu0  ;;  %4422 = vmatprep.mubr.msk.bf16.mxu0 %vm4464_vm1, %v4463_v2  ;;  %v3490_v27 = vpack.c.bf16 %v3858_v43, %v3858_v43  ;;  %v1197_v60 = vadd.f32 %v1196_v41, %v1153_v40 }
 0x11e   : > { %v4130_v45 = vpop.f32.mrf.mxu1  ;;  %4428 = vmatprep.mubr.msk.bf16.mxu1 %vm4464_vm1, %v4463_v2  ;;  %4432 = vmatprep.subr.bf16.mxu0 %v4463_v2 }
 0x11f   : > { %4438 = vmatprep.subr.bf16.mxu1 %v4463_v2  ;;  %v1156_v46 = vpop.f32.mrf.mxu0 }
 0x120   : > { %v1199_v20 = vpop.f32.mrf.mxu1 }
 0x121   : > { %v4125_v48 = vpop.f32.mrf.mxu0 }
 0x122   : > { %v4131_v49 = vpop.f32.mrf.mxu1 }
 0x123   : > { %v1241_v50 = vpop.f32.mrf.mxu0  ;;  %4423 = vmatmul.mubr.msk.bf16.vlgmr.msra.gmra.mxu0 %vm241_vm2, %v3443_v47 }
 0x124   : > { %v1288_v51 = vpop.f32.mrf.mxu1  ;;  %4429 = vmatmul.mubr.msk.bf16.vlgmr.msra.gmra.mxu1 %vm241_vm2, %v3490_v27  ;;  %4433 = vmatpush3.bf16.msra.mxu0 %v4593_v28  ;;  %v1247_v28 = vadd.f32 %v1241_v50, %v1197_v60 }
 0x125   : > { %4439 = vmatpush3.bf16.msra.mxu1 %v4611_v34  ;;  %v4136_v54 = vpop.f32.mrf.mxu0  ;;  %4434 = vmatprep.mubr.msk.bf16.mxu0 %vm4464_vm1, %v4463_v2 }
 0x126   : > { %v4142_v55 = vpop.f32.mrf.mxu1  ;;  %4440 = vmatprep.mubr.msk.bf16.mxu1 %vm4464_vm1, %v4463_v2  ;;  %v1294_v5 = vadd.f32 %v1288_v51, %v1247_v28 }
 0x127   : > { %v1244_v56 = vpop.f32.mrf.mxu0 }
 0x128   : > { %v1291_v57 = vpop.f32.mrf.mxu1 }
 0x129   : > { %v4137_v61 = vpop.f32.mrf.mxu0 }
 0x12a   : > { %v4143_v62 = vpop.f32.mrf.mxu1 }
 0x12b   : > { %v1335_v63 = vpop.f32.mrf.mxu0  ;;  %4435 = vmatmul.mubr.msk.bf16.vlgmr.msra.gmra.mxu0 %vm241_vm2, %v3537_v58 }
 0x12c   : > { %v1381_v34 = vpop.f32.mrf.mxu1  ;;  %4441 = vmatmul.mubr.msk.bf16.vlgmr.msra.gmra.mxu1 %vm241_vm2, %v3583_v59  ;;  %v1341_v2 = vadd.f32 %v1335_v63, %v1294_v5 }
 0x12d   : > { %v4148_v0 = vpop.f32.mrf.mxu0 }
 0x12e   : > { %v4154_v1 = vpop.f32.mrf.mxu1  ;;  %v1387_v13 = vadd.f32 %v1381_v34, %v1341_v2 }
 0x12f   : > { %v1338_v6 = vpop.f32.mrf.mxu0 }
 0x130   : > { %v1384_v7 = vpop.f32.mrf.mxu1 }
 0x131   : > { %v4149_v8 = vpop.f32.mrf.mxu0 }
 0x132   : > { %v4155_v3 = vpop.f32.mrf.mxu1 }
 0x133   : > { %v1428_v9 = vpop.f32.mrf.mxu0 }
 0x134   : > { %v1475_v10 = vpop.f32.mrf.mxu1  ;;  %v1434_v16 = vadd.f32 %v1428_v9, %v1387_v13 }
 0x135   : > { %v4160_v14 = vpop.f32.mrf.mxu0 }
 0x136   : > { %v4166_v15 = vpop.f32.mrf.mxu1  ;;  %v1481_v11 = vadd.f32 %v1475_v10, %v1434_v16 }
 0x137   : > { %v1431_v17 = vpop.f32.mrf.mxu0 }
 0x138   : > { %v1478_v18 = vpop.f32.mrf.mxu1 }
 0x139   : > { %v4161_v4 = vpop.f32.mrf.mxu0 }
 0x13a   : > { %v4167_v21 = vpop.f32.mrf.mxu1 }
 0x13b   : > { %v1521_v22 = vpop.f32.mrf.mxu0 }
 0x13c   : > { %v1573_v23 = vpop.f32.mrf.mxu1  ;;  %v1527_v24 = vadd.f32 %v1521_v22, %v1481_v11 }
 0x13d   : > { %v4172_v25 = vpop.f32.mrf.mxu0 }
 0x13e   : > { %v4178_v26 = vpop.f32.mrf.mxu1  ;;  %v1528_v30 = vadd.f32 %v4898_v29, %v1527_v24 }
 0x13f   : > { %v1524_v31 = vpop.f32.mrf.mxu0 }
 0x140   : > { %v1576_v32 = vpop.f32.mrf.mxu1  ;;  %v1529_v12 = vmax.f32 %v1528_v30, 0.0 }
 0x141   : > { %v4173_v19 = vpop.f32.mrf.mxu0 }
 0x142   : > { %v4179_v33 = vpop.f32.mrf.mxu1  ;;  %3769 = vst.msk [vmem:[%s4917_s22 + $0x10] sm:$0xff] %vm690_vm3, %v1529_v12 }
 0x143   : > { %v1616_v35 = vpop.f32.mrf.mxu0 }
 0x144   : > { %v1661_v36 = vpop.f32.mrf.mxu1  ;;  %v1617_v43 = vadd.f32 %v1616_v35, %v1573_v23 }
 0x145   : > { %v4184_v37 = vpop.f32.mrf.mxu0 }
 0x146   : > { %v4190_v38 = vpop.f32.mrf.mxu1  ;;  %v1667_v47 = vadd.f32 %v1661_v36, %v1617_v43 }
 0x147   : > { %v1619_v39 = vpop.f32.mrf.mxu0 }
 0x148   : > { %v1664_v40 = vpop.f32.mrf.mxu1 }
 0x149   : > { %v4185_v41 = vpop.f32.mrf.mxu0 }
 0x14a   : > { %v4191_v42 = vpop.f32.mrf.mxu1 }
 0x14b   : > { %v1708_v44 = vpop.f32.mrf.mxu0 }
 0x14c   : > { %v1755_v45 = vpop.f32.mrf.mxu1  ;;  %v1714_v49 = vadd.f32 %v1708_v44, %v1667_v47 }
 0x14d   : > { %v4196_v46 = vpop.f32.mrf.mxu0 }
 0x14e   : > { %v4202_v20 = vpop.f32.mrf.mxu1  ;;  %v1761_v54 = vadd.f32 %v1755_v45, %v1714_v49 }
 0x14f   : > { %v1711_v27 = vpop.f32.mrf.mxu0 }
 0x150   : > { %v1758_v48 = vpop.f32.mrf.mxu1 }
 0x151   : > { %v4197_v50 = vpop.f32.mrf.mxu0 }
 0x152   : > { %v4203_v51 = vpop.f32.mrf.mxu1 }
 0x153   : > { %v1801_v52 = vpop.f32.mrf.mxu0 }
 0x154   : > { %v1848_v53 = vpop.f32.mrf.mxu1  ;;  %v1807_v57 = vadd.f32 %v1801_v52, %v1761_v54 }
 0x155   : > { %v4208_v55 = vpop.f32.mrf.mxu0 }
 0x156   : > { %v4214_v56 = vpop.f32.mrf.mxu1  ;;  %v1854_v62 = vadd.f32 %v1848_v53, %v1807_v57 }
 0x157   : > { %v1804_v58 = vpop.f32.mrf.mxu0 }
 0x158   : > { %v1851_v59 = vpop.f32.mrf.mxu1 }
 0x159   : > { %v4209_v60 = vpop.f32.mrf.mxu0 }
 0x15a   : > { %v4215_v61 = vpop.f32.mrf.mxu1 }
 0x15b   : > { %v1895_v28 = vpop.f32.mrf.mxu0 }
 0x15c   : > { %v1941_v63 = vpop.f32.mrf.mxu1  ;;  %v1901_v34 = vadd.f32 %v1895_v28, %v1854_v62 }
 0x15d   : > { %v4220_v0 = vpop.f32.mrf.mxu0 }
 0x15e   : > { %v4226_v1 = vpop.f32.mrf.mxu1  ;;  %v1947_v5 = vadd.f32 %v1941_v63, %v1901_v34 }
 0x15f   : > { %v1898_v6 = vpop.f32.mrf.mxu0 }
 0x160   : > { %v1944_v7 = vpop.f32.mrf.mxu1  ;;  %v1948_v2 = vadd.f32 %v4898_v29, %v1947_v5 }
 0x161   : > { %v4221_v8 = vpop.f32.mrf.mxu0 }
 0x162   : > { %v4227_v3 = vpop.f32.mrf.mxu1  ;;  %v1949_v9 = vmax.f32 %v1948_v2, 0.0 }
 0x163   : > { %v1993_v10 = vpop.f32.mrf.mxu0 }
 0x164   : > { %v2036_v13 = vpop.f32.mrf.mxu1  ;;  %3788 = vst.msk [vmem:[%s4917_s22 + $0x18] sm:$0xff] %vm690_vm3, %v1949_v9 }
 0x165   : > { %v4232_v14 = vpop.f32.mrf.mxu0  ;;  %v2037_v26 = vadd.f32 %v2036_v13, %v1993_v10 }
 0x166   : > { %v4238_v15 = vpop.f32.mrf.mxu1 }
 0x167   : > { %v1996_v16 = vpop.f32.mrf.mxu0 }
 0x168   : > { %v2039_v17 = vpop.f32.mrf.mxu1 }
 0x169   : > { %v4233_v18 = vpop.f32.mrf.mxu0 }
 0x16a   : > { %v4239_v4 = vpop.f32.mrf.mxu1 }
 0x16b   : > { %v2081_v21 = vpop.f32.mrf.mxu0 }
 0x16c   : > { %v2128_v11 = vpop.f32.mrf.mxu1  ;;  %v2087_v32 = vadd.f32 %v2081_v21, %v2037_v26 }
 0x16d   : > { %v4244_v22 = vpop.f32.mrf.mxu0 }
 0x16e   : > { %v4250_v23 = vpop.f32.mrf.mxu1  ;;  %v2134_v36 = vadd.f32 %v2128_v11, %v2087_v32 }
 0x16f   : > { %v2084_v24 = vpop.f32.mrf.mxu0 }
 0x170   : > { %v2131_v25 = vpop.f32.mrf.mxu1 }
 0x171   : > { %v4245_v30 = vpop.f32.mrf.mxu0 }
 0x172   : > { %v4251_v31 = vpop.f32.mrf.mxu1 }
 0x173   : > { %v2175_v12 = vpop.f32.mrf.mxu0 }
 0x174   : > { %v2221_v19 = vpop.f32.mrf.mxu1  ;;  %v2181_v39 = vadd.f32 %v2175_v12, %v2134_v36 }
 0x175   : > { %v4256_v33 = vpop.f32.mrf.mxu0 }
 0x176   : > { %v4262_v35 = vpop.f32.mrf.mxu1  ;;  %v2227_v44 = vadd.f32 %v2221_v19, %v2181_v39 }
 0x177   : > { %v2178_v37 = vpop.f32.mrf.mxu0 }
 0x178   : > { %v2224_v38 = vpop.f32.mrf.mxu1 }
 0x179   : > { %v4257_v40 = vpop.f32.mrf.mxu0 }
 0x17a   : > { %v4263_v41 = vpop.f32.mrf.mxu1 }
 0x17b   : > { %v2268_v42 = vpop.f32.mrf.mxu0 }
 0x17c   : > { %v2315_v43 = vpop.f32.mrf.mxu1  ;;  %v2274_v20 = vadd.f32 %v2268_v42, %v2227_v44 }
 0x17d   : > { %v4268_v45 = vpop.f32.mrf.mxu0 }
 0x17e   : > { %v4274_v46 = vpop.f32.mrf.mxu1  ;;  %v2321_v50 = vadd.f32 %v2315_v43, %v2274_v20 }
 0x17f   : > { %v2271_v47 = vpop.f32.mrf.mxu0 }
 0x180   : > { %v2318_v27 = vpop.f32.mrf.mxu1 }
 0x181   : > { %v4269_v48 = vpop.f32.mrf.mxu0 }
 0x182   : > { %v4275_v49 = vpop.f32.mrf.mxu1 }
 0x183   : > { %v2361_v51 = vpop.f32.mrf.mxu0 }
 0x184   : > { %v2413_v52 = vpop.f32.mrf.mxu1  ;;  %v2367_v53 = vadd.f32 %v2361_v51, %v2321_v50 }
 0x185   : > { %v4280_v54 = vpop.f32.mrf.mxu0 }
 0x186   : > { %v4286_v55 = vpop.f32.mrf.mxu1  ;;  %v2368_v56 = vadd.f32 %v4898_v29, %v2367_v53 }
 0x187   : > { %v2364_v57 = vpop.f32.mrf.mxu0 }
 0x188   : > { %v2416_v58 = vpop.f32.mrf.mxu1  ;;  %v2369_v59 = vmax.f32 %v2368_v56, 0.0 }
 0x189   : > { %v4281_v60 = vpop.f32.mrf.mxu0 }
 0x18a   : > { %v4287_v61 = vpop.f32.mrf.mxu1  ;;  %3807 = vst.msk [vmem:[%s4917_s22 + $0x20] sm:$0xff] %vm690_vm3, %v2369_v59 }
 0x18b   : > { %v2456_v62 = vpop.f32.mrf.mxu0 }
 0x18c   : > { %v2501_v28 = vpop.f32.mrf.mxu1  ;;  %v2457_v7 = vadd.f32 %v2456_v62, %v2413_v52 }
 0x18d   : > { %v4292_v63 = vpop.f32.mrf.mxu0 }
 0x18e   : > { %v4298_v34 = vpop.f32.mrf.mxu1  ;;  %v2507_v10 = vadd.f32 %v2501_v28, %v2457_v7 }
 0x18f   : > { %v2459_v0 = vpop.f32.mrf.mxu0 }
 0x190   : > { %v2504_v1 = vpop.f32.mrf.mxu1 }
 0x191   : > { %v4293_v5 = vpop.f32.mrf.mxu0 }
 0x192   : > { %v4299_v6 = vpop.f32.mrf.mxu1 }
 0x193   : > { %v2548_v2 = vpop.f32.mrf.mxu0 }
 0x194   : > { %v2595_v8 = vpop.f32.mrf.mxu1  ;;  %v2554_v15 = vadd.f32 %v2548_v2, %v2507_v10 }
 0x195   : > { %v4304_v3 = vpop.f32.mrf.mxu0 }
 0x196   : > { %v4310_v9 = vpop.f32.mrf.mxu1  ;;  %v2601_v21 = vadd.f32 %v2595_v8, %v2554_v15 }
 0x197   : > { %v2551_v13 = vpop.f32.mrf.mxu0 }
 0x198   : > { %v2598_v14 = vpop.f32.mrf.mxu1 }
 0x199   : > { %v4305_v16 = vpop.f32.mrf.mxu0 }
 0x19a   : > { %v4311_v17 = vpop.f32.mrf.mxu1 }
 0x19b   : > { %v2641_v18 = vpop.f32.mrf.mxu0 }
 0x19c   : > { %v2688_v4 = vpop.f32.mrf.mxu1  ;;  %v2647_v23 = vadd.f32 %v2641_v18, %v2601_v21 }
 0x19d   : > { %v4316_v11 = vpop.f32.mrf.mxu0 }
 0x19e   : > { %v4322_v22 = vpop.f32.mrf.mxu1  ;;  %v2694_v31 = vadd.f32 %v2688_v4, %v2647_v23 }
 0x19f   : > { %v2644_v24 = vpop.f32.mrf.mxu0 }
 0x1a0   : > { %v2691_v25 = vpop.f32.mrf.mxu1 }
 0x1a1   : > { %v4317_v26 = vpop.f32.mrf.mxu0 }
 0x1a2   : > { %v4323_v30 = vpop.f32.mrf.mxu1 }
 0x1a3   : > { %v2735_v32 = vpop.f32.mrf.mxu0 }
 0x1a4   : > { %v2781_v12 = vpop.f32.mrf.mxu1  ;;  %v2741_v19 = vadd.f32 %v2735_v32, %v2694_v31 }
 0x1a5   : > { %v4328_v33 = vpop.f32.mrf.mxu0 }
 0x1a6   : > { %v4334_v35 = vpop.f32.mrf.mxu1  ;;  %v2787_v36 = vadd.f32 %v2781_v12, %v2741_v19 }
 0x1a7   : > { %v2738_v37 = vpop.f32.mrf.mxu0 }
 0x1a8   : > { %v2784_v38 = vpop.f32.mrf.mxu1  ;;  %v2788_v39 = vadd.f32 %v4898_v29, %v2787_v36 }
 0x1a9   : > { %v4329_v40 = vpop.f32.mrf.mxu0 }
 0x1aa   : > { %v4335_v41 = vpop.f32.mrf.mxu1  ;;  %v2789_v42 = vmax.f32 %v2788_v39, 0.0 }
 0x1ab   : > { %v2833_v43 = vpop.f32.mrf.mxu0 }
 0x1ac   : > { %v2876_v44 = vpop.f32.mrf.mxu1  ;;  %3826 = vst.msk [vmem:[%s4917_s22 + $0x28] sm:$0xff] %vm690_vm3, %v2789_v42 }
 0x1ad   : > { %v4340_v45 = vpop.f32.mrf.mxu0  ;;  %v2877_v55 = vadd.f32 %v2876_v44, %v2833_v43 }
 0x1ae   : > { %v4346_v46 = vpop.f32.mrf.mxu1 }
 0x1af   : > { %v2836_v20 = vpop.f32.mrf.mxu0 }
 0x1b0   : > { %v2879_v47 = vpop.f32.mrf.mxu1 }
 0x1b1   : > { %v4341_v27 = vpop.f32.mrf.mxu0 }
 0x1b2   : > { %v4347_v48 = vpop.f32.mrf.mxu1 }
 0x1b3   : > { %v2921_v49 = vpop.f32.mrf.mxu0 }
 0x1b4   : > { %v2968_v50 = vpop.f32.mrf.mxu1  ;;  %v2927_v58 = vadd.f32 %v2921_v49, %v2877_v55 }
 0x1b5   : > { %v4352_v51 = vpop.f32.mrf.mxu0 }
 0x1b6   : > { %v4358_v52 = vpop.f32.mrf.mxu1  ;;  %v2974_v28 = vadd.f32 %v2968_v50, %v2927_v58 }
 0x1b7   : > { %v2924_v53 = vpop.f32.mrf.mxu0 }
 0x1b8   : > { %v2971_v54 = vpop.f32.mrf.mxu1 }
 0x1b9   : > { %v4353_v56 = vpop.f32.mrf.mxu0 }
 0x1ba   : > { %v4359_v57 = vpop.f32.mrf.mxu1 }
 0x1bb   : > { %v3015_v59 = vpop.f32.mrf.mxu0 }
 0x1bc   : > { %v3061_v60 = vpop.f32.mrf.mxu1  ;;  %v3021_v0 = vadd.f32 %v3015_v59, %v2974_v28 }
 0x1bd   : > { %v4364_v61 = vpop.f32.mrf.mxu0 }
 0x1be   : > { %v4370_v62 = vpop.f32.mrf.mxu1  ;;  %v3067_v2 = vadd.f32 %v3061_v60, %v3021_v0 }
 0x1bf   : > { %v3018_v63 = vpop.f32.mrf.mxu0 }
 0x1c0   : > { %v3064_v34 = vpop.f32.mrf.mxu1 }
 0x1c1   : > { %v4365_v1 = vpop.f32.mrf.mxu0 }
 0x1c2   : > { %v4371_v5 = vpop.f32.mrf.mxu1 }
 0x1c3   : > { %v3108_v6 = vpop.f32.mrf.mxu0 }
 0x1c4   : > { %v3155_v7 = vpop.f32.mrf.mxu1  ;;  %v3114_v9 = vadd.f32 %v3108_v6, %v3067_v2 }
 0x1c5   : > { %v4376_v8 = vpop.f32.mrf.mxu0 }
 0x1c6   : > { %v4382_v3 = vpop.f32.mrf.mxu1  ;;  %v3161_v16 = vadd.f32 %v3155_v7, %v3114_v9 }
 0x1c7   : > { %v3111_v10 = vpop.f32.mrf.mxu0 }
 0x1c8   : > { %v3158_v13 = vpop.f32.mrf.mxu1 }
 0x1c9   : > { %v4377_v14 = vpop.f32.mrf.mxu0 }
 0x1ca   : > { %v4383_v15 = vpop.f32.mrf.mxu1 }
 0x1cb   : > { %v3201_v17 = vpop.f32.mrf.mxu0 }
 0x1cc   : > { %v3253_v18 = vpop.f32.mrf.mxu1  ;;  %v3207_v4 = vadd.f32 %v3201_v17, %v3161_v16 }
 0x1cd   : > { %v4388_v21 = vpop.f32.mrf.mxu0 }
 0x1ce   : > { %v4394_v11 = vpop.f32.mrf.mxu1  ;;  %v3208_v22 = vadd.f32 %v4898_v29, %v3207_v4 }
 0x1cf   : > { %v3204_v23 = vpop.f32.mrf.mxu0 }
 0x1d0   : > { %v3256_v24 = vpop.f32.mrf.mxu1  ;;  %v3209_v25 = vmax.f32 %v3208_v22, 0.0 }
 0x1d1   : > { %v4389_v26 = vpop.f32.mrf.mxu0 }
 0x1d2   : > { %v4395_v30 = vpop.f32.mrf.mxu1  ;;  %3845 = vst.msk [vmem:[%s4917_s22 + $0x30] sm:$0xff] %vm690_vm3, %v3209_v25 }
 0x1d3   : > { %v3296_v31 = vpop.f32.mrf.mxu0 }
 0x1d4   : > { %v3341_v32 = vpop.f32.mrf.mxu1  ;;  %v3297_v38 = vadd.f32 %v3296_v31, %v3253_v18 }
 0x1d5   : > { %v4400_v12 = vpop.f32.mrf.mxu0 }
 0x1d6   : > { %v4406_v19 = vpop.f32.mrf.mxu1  ;;  %v3347_v43 = vadd.f32 %v3341_v32, %v3297_v38 }
 0x1d7   : > { %v3299_v33 = vpop.f32.mrf.mxu0 }
 0x1d8   : > { %v3344_v35 = vpop.f32.mrf.mxu1 }
 0x1d9   : > { %v4401_v36 = vpop.f32.mrf.mxu0 }
 0x1da   : > { %v4407_v37 = vpop.f32.mrf.mxu1 }
 0x1db   : > { %v3388_v39 = vpop.f32.mrf.mxu0 }
 0x1dc   : > { %v3435_v40 = vpop.f32.mrf.mxu1  ;;  %v3394_v46 = vadd.f32 %v3388_v39, %v3347_v43 }
 0x1dd   : > { %v4412_v41 = vpop.f32.mrf.mxu0 }
 0x1de   : > { %v4418_v42 = vpop.f32.mrf.mxu1  ;;  %v3441_v49 = vadd.f32 %v3435_v40, %v3394_v46 }
 0x1df   : > { %v3391_v44 = vpop.f32.mrf.mxu0 }
 0x1e0   : > { %v3438_v45 = vpop.f32.mrf.mxu1 }
 0x1e1   : > { %v4413_v20 = vpop.f32.mrf.mxu0 }
 0x1e2   : > { %v4419_v47 = vpop.f32.mrf.mxu1 }
 0x1e3   : > { %v3481_v27 = vpop.f32.mrf.mxu0 }
 0x1e4   : > { %v3528_v48 = vpop.f32.mrf.mxu1  ;;  %v3487_v52 = vadd.f32 %v3481_v27, %v3441_v49 }
 0x1e5   : > { %v4424_v50 = vpop.f32.mrf.mxu0 }
 0x1e6   : > { %v4430_v51 = vpop.f32.mrf.mxu1  ;;  %v3534_v57 = vadd.f32 %v3528_v48, %v3487_v52 }
 0x1e7   : > { %v3484_v53 = vpop.f32.mrf.mxu0 }
 0x1e8   : > { %v3531_v54 = vpop.f32.mrf.mxu1 }
 0x1e9   : > { %v4425_v55 = vpop.f32.mrf.mxu0 }
 0x1ea   : > { %v4431_v56 = vpop.f32.mrf.mxu1 }
 0x1eb   : > { %v3575_v58 = vpop.f32.mrf.mxu0 }
 0x1ec   : > { %v3621_v59 = vpop.f32.mrf.mxu1  ;;  %v3581_v60 = vadd.f32 %v3575_v58, %v3534_v57 }
 0x1ed   : > { %v4436_v61 = vpop.f32.mrf.mxu0 }
 0x1ee   : > { %v4442_v62 = vpop.f32.mrf.mxu1  ;;  %v3627_v28 = vadd.f32 %v3621_v59, %v3581_v60 }
 0x1ef   : > { %v3578_v63 = vpop.f32.mrf.mxu0 }
 0x1f0   : > { %v3624_v34 = vpop.f32.mrf.mxu1  ;;  %v3628_v0 = vadd.f32 %v4898_v29, %v3627_v28 }
 0x1f1   : > { %v4437_v1 = vpop.f32.mrf.mxu0 }
 0x1f2   : > { %v4443_v5 = vpop.f32.mrf.mxu1  ;;  %v3629_v6 = vmax.f32 %v3628_v0, 0.0 }
 0x1f4   : > { %3864 = vst.msk [vmem:[%s4917_s22 + $0x38] sm:$0xff] %vm690_vm3, %v3629_v6 }
 0x1f5 PF: > { %s14_s15 = sadd.s32 1, %s4461_s15  }
 0x1f6   : > { %p11_p4 = scmp.ge.s32.totalorder %s14_s15, 4  }
 0x1f8   :  { %13 = sbr.rel (!%p11_p4) target bundleno = 1 (0x1), region = 116 }

</bundles_post_ra>
